<compile_context>
chip_gen: v5e
topology: v5e:2x2
jax: 0.10.0
libtpu: 0.0.40
codegen_flags: <defaults>
</compile_context>

<pallas_src>
import functools
import numpy as np
import jax
import jax.numpy as jnp
from jax.experimental import pallas as pl
from jax.experimental.pallas import tpu as pltpu


# ----------------------------------------------------------------------------
# Pallas kernel: one block of `bblk` windows per grid step.
# ----------------------------------------------------------------------------
def _window_attn_kernel(x_ref, wqkv_ref, bqkv_ref, bias_ref, wproj_ref, bproj_ref,
                        o_ref, *, num_heads, bblk, n_tok):
    C = wproj_ref.shape[0]
    hd = C // num_heads
    rows = bblk * n_tok
    Wm = bias_ref.shape[0] // num_heads          # 1 (no mask) or bblk (masked)

    xf = x_ref[...]                              # (rows, C) bf16
    wqkv = wqkv_ref[...]                         # (C, 3C)  bf16, scale folded into Q cols
    # Fused QKV projection (bf16 x bf16 -> f32 accumulate on the MXU).
    qkv = jnp.dot(xf, wqkv, preferred_element_type=jnp.float32) + bqkv_ref[0]   # (rows, 3C) f32

    q = qkv[:, :C].reshape(bblk, n_tok, C)       # scale already applied
    k = qkv[:, C:2 * C].reshape(bblk, n_tok, C)
    v = qkv[:, 2 * C:].reshape(bblk, n_tok, C)

    bias = bias_ref[...]                         # (num_heads*Wm, N, N) f32, VMEM-resident
    wproj = wproj_ref[...]                       # (C, C) bf16

    acc = None
    for h in range(num_heads):                   # short static loop; each iter is window-batched
        sl = slice(h * hd, (h + 1) * hd)
        qh = q[:, :, sl].astype(jnp.bfloat16)    # (bblk, N, hd)
        kh = k[:, :, sl].astype(jnp.bfloat16)
        vh = v[:, :, sl].astype(jnp.bfloat16)

        # scores for all bblk windows of this head at once
        attn = jnp.einsum('bnd,bmd->bnm', qh, kh,
                          preferred_element_type=jnp.float32)        # (bblk, N, N) f32
        attn = attn + bias[h * Wm:(h + 1) * Wm]                      # broadcasts if Wm == 1

        # softmax (f32); reciprocal on the EUP slot (effectively free)
        attn = attn - jnp.max(attn, axis=-1, keepdims=True)
        attn = jnp.exp(attn)
        attn = attn * pl.reciprocal(jnp.sum(attn, axis=-1, keepdims=True), approx=True)

        # attn @ v
        oh = jnp.einsum('bnm,bmd->bnd', attn.astype(jnp.bfloat16), vh,
                        preferred_element_type=jnp.float32)          # (bblk, N, hd)

        # fold this head straight into the output projection (no lane concatenate)
        ph = jnp.dot(oh.reshape(rows, hd).astype(jnp.bfloat16), wproj[sl, :],
                     preferred_element_type=jnp.float32)             # (rows, C)
        acc = ph if acc is None else acc + ph

    o_ref[...] = (acc + bproj_ref[0]).astype(o_ref.dtype)


# ----------------------------------------------------------------------------
# Block-size selection: divide B_ into blocks of whole windows; when a mask is
# present the block must be a multiple of nW so the per-block mask pattern is
# identical for every block (keeps the combined bias+mask VMEM-resident with a
# constant index_map).
# ----------------------------------------------------------------------------
def _choose_bblk(B_, N, nW, has_mask, max_rows=1024, min_grid=4):
    base = nW if has_mask else 1
    assert B_ % base == 0
    quot = B_ // base
    cands = [base * d for d in range(1, quot + 1) if quot % d == 0]
    good = [c for c in cands if c * N <= max_rows and B_ // c >= min_grid]
    if good:
        return max(good)
    ok = [c for c in cands if c * N <= max_rows]
    if ok:
        return max(ok)
    return base


# ----------------------------------------------------------------------------
# One-time parameter preparation (scale folding + bf16 casts).
# ----------------------------------------------------------------------------
def prepare_window_attention_params(w_qkv, b_qkv, w_proj, b_proj, rel_bias, num_heads):
    C = w_proj.shape[0]
    hd = C // num_heads
    scale = float(hd) ** (-0.5)
    col_scale = jnp.concatenate([jnp.full((C,), scale, jnp.float32),
                                 jnp.ones((2 * C,), jnp.float32)])
    return dict(
        w_qkv=(w_qkv.astype(jnp.float32) * col_scale[None, :]).astype(jnp.bfloat16),
        b_qkv=(b_qkv.astype(jnp.float32) * col_scale).reshape(1, 3 * C),
        w_proj=w_proj.astype(jnp.bfloat16),
        b_proj=b_proj.astype(jnp.float32).reshape(1, C),
        rel_bias=rel_bias.astype(jnp.float32),       # (num_heads, N, N)
    )


# ----------------------------------------------------------------------------
# Wrapper: builds grid / BlockSpecs and the combined bias(+mask) tensor.
# ----------------------------------------------------------------------------
def window_attention_pallas(x, params, num_heads, mask=None):
    """x: (B_, N, C) f32; mask: (nW, N, N) additive (0 / -100) mask or None."""
    B_, N, C = x.shape
    has_mask = mask is not None
    nW = mask.shape[0] if has_mask else 1
    if has_mask:
        assert B_ % nW == 0, "B_ must be a multiple of num_windows"

    bblk = _choose_bblk(B_, N, nW, has_mask)
    grid = (B_ // bblk,)
    rows = bblk * N

    rel_bias = params["rel_bias"]                                    # (H, N, N)
    if has_mask:
        widx = jnp.arange(bblk) % nW
        # (H, bblk, N, N) -> (H*bblk, N, N): per-head, per-window bias + mask.
        comb = (rel_bias[:, None, :, :] +
                mask.astype(jnp.float32)[widx][None, :, :, :]).reshape(num_heads * bblk, N, N)
        Wm = bblk
    else:
        comb = rel_bias                                              # (H, N, N), Wm == 1
        Wm = 1

    x2 = x.reshape(B_ * N, C).astype(jnp.bfloat16)                   # halve x DMA bytes

    kernel = functools.partial(_window_attn_kernel,
                               num_heads=num_heads, bblk=bblk, n_tok=N)

    out = pl.pallas_call(
        kernel,
        out_shape=jax.ShapeDtypeStruct((B_ * N, C), jnp.float32),
        grid_spec=pltpu.PrefetchScalarGridSpec(
            num_scalar_prefetch=0,
            grid=grid,
            in_specs=[
                pl.BlockSpec((rows, C), lambda b: (b, 0)),                      # x block
                pl.BlockSpec((C, 3 * C), lambda b: (0, 0)),                     # W_qkv (resident)
                pl.BlockSpec((1, 3 * C), lambda b: (0, 0)),                     # b_qkv (resident)
                pl.BlockSpec((num_heads * Wm, N, N), lambda b: (0, 0, 0)),      # bias(+mask), resident
                pl.BlockSpec((C, C), lambda b: (0, 0)),                         # W_proj (resident)
                pl.BlockSpec((1, C), lambda b: (0, 0)),                         # b_proj (resident)
            ],
            out_specs=pl.BlockSpec((rows, C), lambda b: (b, 0)),
        ),
        compiler_params=pltpu.CompilerParams(dimension_semantics=("parallel",)),
    )(x2, params["w_qkv"], params["b_qkv"], comb, params["w_proj"], params["b_proj"])
    return out.reshape(B_, N, C)


# ----------------------------------------------------------------------------
# Pure-JAX f32 reference (mirrors the PyTorch forward) for validation.
# ----------------------------------------------------------------------------
def window_attention_ref(x, w_qkv, b_qkv, rel_bias, w_proj, b_proj, num_heads, mask=None):
    B_, N, C = x.shape
    hd = C // num_heads
    scale = float(hd) ** (-0.5)
    qkv = (x @ w_qkv + b_qkv).reshape(B_, N, 3, num_heads, hd).transpose(2, 0, 3, 1, 4)
    q, k, v = qkv[0], qkv[1], qkv[2]
    q = q * scale
    attn = jnp.einsum("bhnd,bhmd->bhnm", q, k)
    attn = attn + rel_bias[None]
    if mask is not None:
        nW = mask.shape[0]
        attn = attn.reshape(B_ // nW, nW, num_heads, N, N) + mask[None, :, None]
        attn = attn.reshape(B_, num_heads, N, N)
    attn = jax.nn.softmax(attn, axis=-1)
    out = jnp.einsum("bhnm,bhmd->bhnd", attn, v).transpose(0, 2, 1, 3).reshape(B_, N, C)
    return out @ w_proj + b_proj


# ----------------------------------------------------------------------------
# Relative position index (module buffer), built with numpy at prep time.
# ----------------------------------------------------------------------------
def make_relative_position_index(window_size):
    Wh, Ww = window_size
    coords = np.stack(np.meshgrid(np.arange(Wh), np.arange(Ww), indexing="ij"))
    coords_flatten = coords.reshape(2, -1)
    rel = coords_flatten[:, :, None] - coords_flatten[:, None, :]
    rel = rel.transpose(1, 2, 0).astype(np.int64)
    rel[:, :, 0] += Wh - 1
    rel[:, :, 1] += Ww - 1
    rel[:, :, 0] *= 2 * Ww - 1
    return rel.sum(-1)                                               # (N, N)


if __name__ == "__main__":
    # Small config consistent with the module.
    dim = 32
    num_heads = 4
    window_size = (4, 4)
    Wh, Ww = window_size
    N = Wh * Ww
    batch = 8
    nW = 4
    B_ = batch * nW          # 32 windows -> bblk=8 windows/step, grid of 4 steps

    key = jax.random.PRNGKey(0)
    keys = jax.random.split(key, 8)

    # Parameters (deterministic synthetic init; shapes from __init__).
    w_qkv = jax.random.normal(keys[0], (dim, 3 * dim), jnp.float32) * 0.05
    b_qkv = jax.random.normal(keys[1], (3 * dim,), jnp.float32) * 0.05
    w_proj = jax.random.normal(keys[2], (dim, dim), jnp.float32) * 0.05
    b_proj = jax.random.normal(keys[3], (dim,), jnp.float32) * 0.05
    table = jax.random.truncated_normal(
        keys[4], -2.0, 2.0, ((2 * Wh - 1) * (2 * Ww - 1), num_heads), jnp.float32) * 0.02

    # relative_position_bias_table gather -> (num_heads, N, N) bias (parameter-prep time).
    rel_idx = make_relative_position_index(window_size)
    rel_bias = table[rel_idx.reshape(-1)].reshape(N, N, num_heads)
    rel_bias = jnp.transpose(rel_bias, (2, 0, 1)).astype(jnp.float32)

    params = prepare_window_attention_params(w_qkv, b_qkv, w_proj, b_proj, rel_bias, num_heads)

    # Input features (num_windows*B, Mh*Mw, C)
    x = jax.random.normal(keys[5], (B_, N, dim), jnp.float32)

    # Additive (0 / -100) mask as in shifted-window attention: (nW, N, N)
    blk = (np.arange(N) // 8)
    pattern = (blk[:, None] == blk[None, :])
    mask_single = np.where(pattern, 0.0, -100.0).astype(np.float32)
    mask = jnp.stack([jnp.asarray(mask_single)] * nW, axis=0)

    # ---- no-mask path ----
    out0 = jax.block_until_ready(
        window_attention_pallas(x, params, num_heads, mask=None))
    ref0 = window_attention_ref(x, w_qkv, b_qkv, rel_bias, w_proj, b_proj, num_heads, mask=None)
    np.testing.assert_allclose(np.asarray(out0), np.asarray(ref0), rtol=5e-3, atol=5e-3)

    # ---- masked path ----
    out1 = jax.block_until_ready(
        window_attention_pallas(x, params, num_heads, mask=mask))
    ref1 = window_attention_ref(x, w_qkv, b_qkv, rel_bias, w_proj, b_proj, num_heads, mask=mask)
    np.testing.assert_allclose(np.asarray(out1), np.asarray(ref1), rtol=5e-3, atol=5e-3)

    print("KERNEL_OK")
</pallas_src>

<mosaic_0001>
module attributes {stable_mosaic.version = 11 : i64} {
  func.func @_window_attn_kernel(%arg0: i32, %arg1: memref<128x32xbf16, #tpu.memory_space<vmem>>, %arg2: memref<32x96xbf16, #tpu.memory_space<vmem>>, %arg3: memref<1x96xf32, #tpu.memory_space<vmem>>, %arg4: memref<4x16x16xf32, #tpu.memory_space<vmem>>, %arg5: memref<32x32xbf16, #tpu.memory_space<vmem>>, %arg6: memref<1x32xf32, #tpu.memory_space<vmem>>, %arg7: memref<128x32xf32, #tpu.memory_space<vmem>>) attributes {dimension_semantics = [#tpu.dimension_semantics<parallel>], iteration_bounds = array<i64: 4>, scalar_prefetch = 0 : i64, scratch_operands = 0 : i64, tpu.core_type = #tpu.core_type<tc>, window_params = [{transform_indices = @transform_0, window_bounds = array<i64: 128, 32>}, {pipeline_mode = #tpu.pipeline_mode<synchronous>, transform_indices = @transform_1, window_bounds = array<i64: 32, 96>}, {pipeline_mode = #tpu.pipeline_mode<synchronous>, transform_indices = @transform_2, window_bounds = array<i64: 1, 96>}, {pipeline_mode = #tpu.pipeline_mode<synchronous>, transform_indices = @transform_3, window_bounds = array<i64: 4, 16, 16>}, {pipeline_mode = #tpu.pipeline_mode<synchronous>, transform_indices = @transform_4, window_bounds = array<i64: 32, 32>}, {pipeline_mode = #tpu.pipeline_mode<synchronous>, transform_indices = @transform_5, window_bounds = array<i64: 1, 32>}, {transform_indices = @transform_6, window_bounds = array<i64: 128, 32>}]} {
    %c0 = arith.constant 0 : index
    %c0_0 = arith.constant 0 : index
    %0 = vector.load %arg1[%c0, %c0_0] : memref<128x32xbf16, #tpu.memory_space<vmem>>, vector<128x32xbf16>
    %c0_1 = arith.constant 0 : index
    %c0_2 = arith.constant 0 : index
    %1 = vector.load %arg2[%c0_1, %c0_2] : memref<32x96xbf16, #tpu.memory_space<vmem>>, vector<32x96xbf16>
    %cst = arith.constant dense<0.000000e+00> : vector<128x96xf32>
    %2 = tpu.matmul %0, %1, %cst {dimension_numbers = #tpu.dot_dimension_numbers<[1], [0], [0], [1], [0, 0, 1, 1], [], []>} : vector<128x32xbf16>, vector<32x96xbf16>, vector<128x96xf32> -> vector<128x96xf32>
    %c0_3 = arith.constant 0 : index
    %c0_4 = arith.constant 0 : index
    %3 = vector.load %arg3[%c0_3, %c0_4] : memref<1x96xf32, #tpu.memory_space<vmem>>, vector<1x96xf32>
    %4 = vector.shape_cast %3 : vector<1x96xf32> to vector<96xf32>
    %5 = vector.shape_cast %4 : vector<96xf32> to vector<1x96xf32>
    %6 = vector.broadcast %5 : vector<1x96xf32> to vector<128x96xf32>
    %7 = arith.addf %2, %6 : vector<128x96xf32>
    %8 = vector.extract_strided_slice %7 {offsets = [0, 0], sizes = [128, 32], strides = [1, 1]} : vector<128x96xf32> to vector<128x32xf32>
    %9 = vector.shape_cast %8 : vector<128x32xf32> to vector<8x16x32xf32>
    %10 = vector.extract_strided_slice %7 {offsets = [0, 32], sizes = [128, 32], strides = [1, 1]} : vector<128x96xf32> to vector<128x32xf32>
    %11 = vector.shape_cast %10 : vector<128x32xf32> to vector<8x16x32xf32>
    %12 = vector.extract_strided_slice %7 {offsets = [0, 64], sizes = [128, 32], strides = [1, 1]} : vector<128x96xf32> to vector<128x32xf32>
    %13 = vector.shape_cast %12 : vector<128x32xf32> to vector<8x16x32xf32>
    %c0_5 = arith.constant 0 : index
    %c0_6 = arith.constant 0 : index
    %c0_7 = arith.constant 0 : index
    %14 = vector.load %arg4[%c0_5, %c0_6, %c0_7] : memref<4x16x16xf32, #tpu.memory_space<vmem>>, vector<4x16x16xf32>
    %c0_8 = arith.constant 0 : index
    %c0_9 = arith.constant 0 : index
    %15 = vector.load %arg5[%c0_8, %c0_9] : memref<32x32xbf16, #tpu.memory_space<vmem>>, vector<32x32xbf16>
    %16 = vector.extract_strided_slice %9 {offsets = [0, 0, 0], sizes = [8, 16, 8], strides = [1, 1, 1]} : vector<8x16x32xf32> to vector<8x16x8xf32>
    %17 = arith.truncf %16 : vector<8x16x8xf32> to vector<8x16x8xbf16>
    %18 = vector.extract_strided_slice %11 {offsets = [0, 0, 0], sizes = [8, 16, 8], strides = [1, 1, 1]} : vector<8x16x32xf32> to vector<8x16x8xf32>
    %19 = arith.truncf %18 : vector<8x16x8xf32> to vector<8x16x8xbf16>
    %20 = vector.extract_strided_slice %13 {offsets = [0, 0, 0], sizes = [8, 16, 8], strides = [1, 1, 1]} : vector<8x16x32xf32> to vector<8x16x8xf32>
    %21 = arith.truncf %20 : vector<8x16x8xf32> to vector<8x16x8xbf16>
    "tpu.trace_start"() <{level = 10 : i32, message = "bnd,bmd->bnm"}> : () -> ()
    %cst_10 = arith.constant dense<0.000000e+00> : vector<8x16x16xf32>
    %22 = tpu.matmul %17, %19, %cst_10 {dimension_numbers = #tpu.dot_dimension_numbers<[2], [2], [1], [1], [0, 0, 0, 1, 1, 1], [0], [0]>} : vector<8x16x8xbf16>, vector<8x16x8xbf16>, vector<8x16x16xf32> -> vector<8x16x16xf32>
    "tpu.trace_stop"() : () -> ()
    %23 = vector.extract_strided_slice %14 {offsets = [0, 0, 0], sizes = [1, 16, 16], strides = [1, 1, 1]} : vector<4x16x16xf32> to vector<1x16x16xf32>
    %24 = vector.broadcast %23 : vector<1x16x16xf32> to vector<8x16x16xf32>
    %25 = arith.addf %22, %24 : vector<8x16x16xf32>
    %cst_11 = arith.constant dense<0xFF800000> : vector<8x16xf32>
    %26 = vector.multi_reduction <maximumf>, %25, %cst_11 [2] : vector<8x16x16xf32> to vector<8x16xf32>
    %27 = vector.shape_cast %26 : vector<8x16xf32> to vector<8x16x1xf32>
    %28 = vector.broadcast %27 : vector<8x16x1xf32> to vector<8x16x16xf32>
    %29 = arith.subf %25, %28 : vector<8x16x16xf32>
    %30 = math.exp %29 : vector<8x16x16xf32>
    %cst_12 = arith.constant dense<0.000000e+00> : vector<8x16xf32>
    %31 = vector.multi_reduction <add>, %30, %cst_12 [2] : vector<8x16x16xf32> to vector<8x16xf32>
    %32 = vector.shape_cast %31 : vector<8x16xf32> to vector<8x16x1xf32>
    %33 = tpu.reciprocal %32 {approx = true} : vector<8x16x1xf32> -> vector<8x16x1xf32>
    %34 = vector.broadcast %33 : vector<8x16x1xf32> to vector<8x16x16xf32>
    %35 = arith.mulf %30, %34 : vector<8x16x16xf32>
    %36 = arith.truncf %35 : vector<8x16x16xf32> to vector<8x16x16xbf16>
    "tpu.trace_start"() <{level = 10 : i32, message = "bnm,bmd->bnd"}> : () -> ()
    %cst_13 = arith.constant dense<0.000000e+00> : vector<8x16x8xf32>
    %37 = tpu.matmul %36, %21, %cst_13 {dimension_numbers = #tpu.dot_dimension_numbers<[2], [1], [1], [2], [0, 0, 0, 1, 1, 2], [0], [0]>} : vector<8x16x16xbf16>, vector<8x16x8xbf16>, vector<8x16x8xf32> -> vector<8x16x8xf32>
    "tpu.trace_stop"() : () -> ()
    %38 = vector.shape_cast %37 : vector<8x16x8xf32> to vector<128x8xf32>
    %39 = arith.truncf %38 : vector<128x8xf32> to vector<128x8xbf16>
    %40 = vector.extract_strided_slice %15 {offsets = [0, 0], sizes = [8, 32], strides = [1, 1]} : vector<32x32xbf16> to vector<8x32xbf16>
    %cst_14 = arith.constant dense<0.000000e+00> : vector<128x32xf32>
    %41 = tpu.matmul %39, %40, %cst_14 {dimension_numbers = #tpu.dot_dimension_numbers<[1], [0], [0], [1], [0, 0, 1, 1], [], []>} : vector<128x8xbf16>, vector<8x32xbf16>, vector<128x32xf32> -> vector<128x32xf32>
    %42 = vector.extract_strided_slice %9 {offsets = [0, 0, 8], sizes = [8, 16, 8], strides = [1, 1, 1]} : vector<8x16x32xf32> to vector<8x16x8xf32>
    %43 = arith.truncf %42 : vector<8x16x8xf32> to vector<8x16x8xbf16>
    %44 = vector.extract_strided_slice %11 {offsets = [0, 0, 8], sizes = [8, 16, 8], strides = [1, 1, 1]} : vector<8x16x32xf32> to vector<8x16x8xf32>
    %45 = arith.truncf %44 : vector<8x16x8xf32> to vector<8x16x8xbf16>
    %46 = vector.extract_strided_slice %13 {offsets = [0, 0, 8], sizes = [8, 16, 8], strides = [1, 1, 1]} : vector<8x16x32xf32> to vector<8x16x8xf32>
    %47 = arith.truncf %46 : vector<8x16x8xf32> to vector<8x16x8xbf16>
    "tpu.trace_start"() <{level = 10 : i32, message = "bnd,bmd->bnm"}> : () -> ()
    %cst_15 = arith.constant dense<0.000000e+00> : vector<8x16x16xf32>
    %48 = tpu.matmul %43, %45, %cst_15 {dimension_numbers = #tpu.dot_dimension_numbers<[2], [2], [1], [1], [0, 0, 0, 1, 1, 1], [0], [0]>} : vector<8x16x8xbf16>, vector<8x16x8xbf16>, vector<8x16x16xf32> -> vector<8x16x16xf32>
    "tpu.trace_stop"() : () -> ()
    %49 = vector.extract_strided_slice %14 {offsets = [1, 0, 0], sizes = [1, 16, 16], strides = [1, 1, 1]} : vector<4x16x16xf32> to vector<1x16x16xf32>
    %50 = vector.broadcast %49 : vector<1x16x16xf32> to vector<8x16x16xf32>
    %51 = arith.addf %48, %50 : vector<8x16x16xf32>
    %cst_16 = arith.constant dense<0xFF800000> : vector<8x16xf32>
    %52 = vector.multi_reduction <maximumf>, %51, %cst_16 [2] : vector<8x16x16xf32> to vector<8x16xf32>
    %53 = vector.shape_cast %52 : vector<8x16xf32> to vector<8x16x1xf32>
    %54 = vector.broadcast %53 : vector<8x16x1xf32> to vector<8x16x16xf32>
    %55 = arith.subf %51, %54 : vector<8x16x16xf32>
    %56 = math.exp %55 : vector<8x16x16xf32>
    %cst_17 = arith.constant dense<0.000000e+00> : vector<8x16xf32>
    %57 = vector.multi_reduction <add>, %56, %cst_17 [2] : vector<8x16x16xf32> to vector<8x16xf32>
    %58 = vector.shape_cast %57 : vector<8x16xf32> to vector<8x16x1xf32>
    %59 = tpu.reciprocal %58 {approx = true} : vector<8x16x1xf32> -> vector<8x16x1xf32>
    %60 = vector.broadcast %59 : vector<8x16x1xf32> to vector<8x16x16xf32>
    %61 = arith.mulf %56, %60 : vector<8x16x16xf32>
    %62 = arith.truncf %61 : vector<8x16x16xf32> to vector<8x16x16xbf16>
    "tpu.trace_start"() <{level = 10 : i32, message = "bnm,bmd->bnd"}> : () -> ()
    %cst_18 = arith.constant dense<0.000000e+00> : vector<8x16x8xf32>
    %63 = tpu.matmul %62, %47, %cst_18 {dimension_numbers = #tpu.dot_dimension_numbers<[2], [1], [1], [2], [0, 0, 0, 1, 1, 2], [0], [0]>} : vector<8x16x16xbf16>, vector<8x16x8xbf16>, vector<8x16x8xf32> -> vector<8x16x8xf32>
    "tpu.trace_stop"() : () -> ()
    %64 = vector.shape_cast %63 : vector<8x16x8xf32> to vector<128x8xf32>
    %65 = arith.truncf %64 : vector<128x8xf32> to vector<128x8xbf16>
    %66 = vector.extract_strided_slice %15 {offsets = [8, 0], sizes = [8, 32], strides = [1, 1]} : vector<32x32xbf16> to vector<8x32xbf16>
    %cst_19 = arith.constant dense<0.000000e+00> : vector<128x32xf32>
    %67 = tpu.matmul %65, %66, %cst_19 {dimension_numbers = #tpu.dot_dimension_numbers<[1], [0], [0], [1], [0, 0, 1, 1], [], []>} : vector<128x8xbf16>, vector<8x32xbf16>, vector<128x32xf32> -> vector<128x32xf32>
    %68 = arith.addf %41, %67 : vector<128x32xf32>
    %69 = vector.extract_strided_slice %9 {offsets = [0, 0, 16], sizes = [8, 16, 8], strides = [1, 1, 1]} : vector<8x16x32xf32> to vector<8x16x8xf32>
    %70 = arith.truncf %69 : vector<8x16x8xf32> to vector<8x16x8xbf16>
    %71 = vector.extract_strided_slice %11 {offsets = [0, 0, 16], sizes = [8, 16, 8], strides = [1, 1, 1]} : vector<8x16x32xf32> to vector<8x16x8xf32>
    %72 = arith.truncf %71 : vector<8x16x8xf32> to vector<8x16x8xbf16>
    %73 = vector.extract_strided_slice %13 {offsets = [0, 0, 16], sizes = [8, 16, 8], strides = [1, 1, 1]} : vector<8x16x32xf32> to vector<8x16x8xf32>
    %74 = arith.truncf %73 : vector<8x16x8xf32> to vector<8x16x8xbf16>
    "tpu.trace_start"() <{level = 10 : i32, message = "bnd,bmd->bnm"}> : () -> ()
    %cst_20 = arith.constant dense<0.000000e+00> : vector<8x16x16xf32>
    %75 = tpu.matmul %70, %72, %cst_20 {dimension_numbers = #tpu.dot_dimension_numbers<[2], [2], [1], [1], [0, 0, 0, 1, 1, 1], [0], [0]>} : vector<8x16x8xbf16>, vector<8x16x8xbf16>, vector<8x16x16xf32> -> vector<8x16x16xf32>
    "tpu.trace_stop"() : () -> ()
    %76 = vector.extract_strided_slice %14 {offsets = [2, 0, 0], sizes = [1, 16, 16], strides = [1, 1, 1]} : vector<4x16x16xf32> to vector<1x16x16xf32>
    %77 = vector.broadcast %76 : vector<1x16x16xf32> to vector<8x16x16xf32>
    %78 = arith.addf %75, %77 : vector<8x16x16xf32>
    %cst_21 = arith.constant dense<0xFF800000> : vector<8x16xf32>
    %79 = vector.multi_reduction <maximumf>, %78, %cst_21 [2] : vector<8x16x16xf32> to vector<8x16xf32>
    %80 = vector.shape_cast %79 : vector<8x16xf32> to vector<8x16x1xf32>
    %81 = vector.broadcast %80 : vector<8x16x1xf32> to vector<8x16x16xf32>
    %82 = arith.subf %78, %81 : vector<8x16x16xf32>
    %83 = math.exp %82 : vector<8x16x16xf32>
    %cst_22 = arith.constant dense<0.000000e+00> : vector<8x16xf32>
    %84 = vector.multi_reduction <add>, %83, %cst_22 [2] : vector<8x16x16xf32> to vector<8x16xf32>
    %85 = vector.shape_cast %84 : vector<8x16xf32> to vector<8x16x1xf32>
    %86 = tpu.reciprocal %85 {approx = true} : vector<8x16x1xf32> -> vector<8x16x1xf32>
    %87 = vector.broadcast %86 : vector<8x16x1xf32> to vector<8x16x16xf32>
    %88 = arith.mulf %83, %87 : vector<8x16x16xf32>
    %89 = arith.truncf %88 : vector<8x16x16xf32> to vector<8x16x16xbf16>
    "tpu.trace_start"() <{level = 10 : i32, message = "bnm,bmd->bnd"}> : () -> ()
    %cst_23 = arith.constant dense<0.000000e+00> : vector<8x16x8xf32>
    %90 = tpu.matmul %89, %74, %cst_23 {dimension_numbers = #tpu.dot_dimension_numbers<[2], [1], [1], [2], [0, 0, 0, 1, 1, 2], [0], [0]>} : vector<8x16x16xbf16>, vector<8x16x8xbf16>, vector<8x16x8xf32> -> vector<8x16x8xf32>
    "tpu.trace_stop"() : () -> ()
    %91 = vector.shape_cast %90 : vector<8x16x8xf32> to vector<128x8xf32>
    %92 = arith.truncf %91 : vector<128x8xf32> to vector<128x8xbf16>
    %93 = vector.extract_strided_slice %15 {offsets = [16, 0], sizes = [8, 32], strides = [1, 1]} : vector<32x32xbf16> to vector<8x32xbf16>
    %cst_24 = arith.constant dense<0.000000e+00> : vector<128x32xf32>
    %94 = tpu.matmul %92, %93, %cst_24 {dimension_numbers = #tpu.dot_dimension_numbers<[1], [0], [0], [1], [0, 0, 1, 1], [], []>} : vector<128x8xbf16>, vector<8x32xbf16>, vector<128x32xf32> -> vector<128x32xf32>
    %95 = arith.addf %68, %94 : vector<128x32xf32>
    %96 = vector.extract_strided_slice %9 {offsets = [0, 0, 24], sizes = [8, 16, 8], strides = [1, 1, 1]} : vector<8x16x32xf32> to vector<8x16x8xf32>
    %97 = arith.truncf %96 : vector<8x16x8xf32> to vector<8x16x8xbf16>
    %98 = vector.extract_strided_slice %11 {offsets = [0, 0, 24], sizes = [8, 16, 8], strides = [1, 1, 1]} : vector<8x16x32xf32> to vector<8x16x8xf32>
    %99 = arith.truncf %98 : vector<8x16x8xf32> to vector<8x16x8xbf16>
    %100 = vector.extract_strided_slice %13 {offsets = [0, 0, 24], sizes = [8, 16, 8], strides = [1, 1, 1]} : vector<8x16x32xf32> to vector<8x16x8xf32>
    %101 = arith.truncf %100 : vector<8x16x8xf32> to vector<8x16x8xbf16>
    "tpu.trace_start"() <{level = 10 : i32, message = "bnd,bmd->bnm"}> : () -> ()
    %cst_25 = arith.constant dense<0.000000e+00> : vector<8x16x16xf32>
    %102 = tpu.matmul %97, %99, %cst_25 {dimension_numbers = #tpu.dot_dimension_numbers<[2], [2], [1], [1], [0, 0, 0, 1, 1, 1], [0], [0]>} : vector<8x16x8xbf16>, vector<8x16x8xbf16>, vector<8x16x16xf32> -> vector<8x16x16xf32>
    "tpu.trace_stop"() : () -> ()
    %103 = vector.extract_strided_slice %14 {offsets = [3, 0, 0], sizes = [1, 16, 16], strides = [1, 1, 1]} : vector<4x16x16xf32> to vector<1x16x16xf32>
    %104 = vector.broadcast %103 : vector<1x16x16xf32> to vector<8x16x16xf32>
    %105 = arith.addf %102, %104 : vector<8x16x16xf32>
    %cst_26 = arith.constant dense<0xFF800000> : vector<8x16xf32>
    %106 = vector.multi_reduction <maximumf>, %105, %cst_26 [2] : vector<8x16x16xf32> to vector<8x16xf32>
    %107 = vector.shape_cast %106 : vector<8x16xf32> to vector<8x16x1xf32>
    %108 = vector.broadcast %107 : vector<8x16x1xf32> to vector<8x16x16xf32>
    %109 = arith.subf %105, %108 : vector<8x16x16xf32>
    %110 = math.exp %109 : vector<8x16x16xf32>
    %cst_27 = arith.constant dense<0.000000e+00> : vector<8x16xf32>
    %111 = vector.multi_reduction <add>, %110, %cst_27 [2] : vector<8x16x16xf32> to vector<8x16xf32>
    %112 = vector.shape_cast %111 : vector<8x16xf32> to vector<8x16x1xf32>
    %113 = tpu.reciprocal %112 {approx = true} : vector<8x16x1xf32> -> vector<8x16x1xf32>
    %114 = vector.broadcast %113 : vector<8x16x1xf32> to vector<8x16x16xf32>
    %115 = arith.mulf %110, %114 : vector<8x16x16xf32>
    %116 = arith.truncf %115 : vector<8x16x16xf32> to vector<8x16x16xbf16>
    "tpu.trace_start"() <{level = 10 : i32, message = "bnm,bmd->bnd"}> : () -> ()
    %cst_28 = arith.constant dense<0.000000e+00> : vector<8x16x8xf32>
    %117 = tpu.matmul %116, %101, %cst_28 {dimension_numbers = #tpu.dot_dimension_numbers<[2], [1], [1], [2], [0, 0, 0, 1, 1, 2], [0], [0]>} : vector<8x16x16xbf16>, vector<8x16x8xbf16>, vector<8x16x8xf32> -> vector<8x16x8xf32>
    "tpu.trace_stop"() : () -> ()
    %118 = vector.shape_cast %117 : vector<8x16x8xf32> to vector<128x8xf32>
    %119 = arith.truncf %118 : vector<128x8xf32> to vector<128x8xbf16>
    %120 = vector.extract_strided_slice %15 {offsets = [24, 0], sizes = [8, 32], strides = [1, 1]} : vector<32x32xbf16> to vector<8x32xbf16>
    %cst_29 = arith.constant dense<0.000000e+00> : vector<128x32xf32>
    %121 = tpu.matmul %119, %120, %cst_29 {dimension_numbers = #tpu.dot_dimension_numbers<[1], [0], [0], [1], [0, 0, 1, 1], [], []>} : vector<128x8xbf16>, vector<8x32xbf16>, vector<128x32xf32> -> vector<128x32xf32>
    %122 = arith.addf %95, %121 : vector<128x32xf32>
    %c0_30 = arith.constant 0 : index
    %c0_31 = arith.constant 0 : index
    %123 = vector.load %arg6[%c0_30, %c0_31] : memref<1x32xf32, #tpu.memory_space<vmem>>, vector<1x32xf32>
    %124 = vector.shape_cast %123 : vector<1x32xf32> to vector<32xf32>
    %125 = vector.shape_cast %124 : vector<32xf32> to vector<1x32xf32>
    %126 = vector.broadcast %125 : vector<1x32xf32> to vector<128x32xf32>
    %127 = arith.addf %122, %126 : vector<128x32xf32>
    %c0_32 = arith.constant 0 : index
    %c0_33 = arith.constant 0 : index
    %128 = vector.load %arg7[%c0_32, %c0_33] : memref<128x32xf32, #tpu.memory_space<vmem>>, vector<128x32xf32>
    tpu.vector_store %arg7[%c0_32, %c0_33], %127 {strides = array<i32>} : memref<128x32xf32, #tpu.memory_space<vmem>>, vector<128x32xf32>,
    return
  }
  func.func @transform_0(%arg0: i32) -> (i32, i32) {
    %c0_i32 = arith.constant 0 : i32
    %c0_i32_0 = arith.constant 0 : i32
    return %arg0, %c0_i32 : i32, i32
  }
  func.func @transform_1(%arg0: i32) -> (i32, i32) {
    %c0_i32 = arith.constant 0 : i32
    %c0_i32_0 = arith.constant 0 : i32
    %c0_i32_1 = arith.constant 0 : i32
    return %c0_i32, %c0_i32_0 : i32, i32
  }
  func.func @transform_2(%arg0: i32) -> (i32, i32) {
    %c0_i32 = arith.constant 0 : i32
    %c0_i32_0 = arith.constant 0 : i32
    %c0_i32_1 = arith.constant 0 : i32
    return %c0_i32, %c0_i32_0 : i32, i32
  }
  func.func @transform_3(%arg0: i32) -> (i32, i32, i32) {
    %c0_i32 = arith.constant 0 : i32
    %c0_i32_0 = arith.constant 0 : i32
    %c0_i32_1 = arith.constant 0 : i32
    %c0_i32_2 = arith.constant 0 : i32
    return %c0_i32, %c0_i32_0, %c0_i32_1 : i32, i32, i32
  }
  func.func @transform_4(%arg0: i32) -> (i32, i32) {
    %c0_i32 = arith.constant 0 : i32
    %c0_i32_0 = arith.constant 0 : i32
    %c0_i32_1 = arith.constant 0 : i32
    return %c0_i32, %c0_i32_0 : i32, i32
  }
  func.func @transform_5(%arg0: i32) -> (i32, i32) {
    %c0_i32 = arith.constant 0 : i32
    %c0_i32_0 = arith.constant 0 : i32
    %c0_i32_1 = arith.constant 0 : i32
    return %c0_i32, %c0_i32_0 : i32, i32
  }
  func.func @transform_6(%arg0: i32) -> (i32, i32) {
    %c0_i32 = arith.constant 0 : i32
    %c0_i32_0 = arith.constant 0 : i32
    return %arg0, %c0_i32 : i32, i32
  }
}

</mosaic_0001>

<bundles_post_ra>
// kernel: tpu_custom_call.1
= control target key start
LH: loop header
LB: loop body
LE: loop exit
PB: predicated region body
PF: predicated region fallthrough
CT: control target
= control target key end

     0   :  { %s3757_s21 = smov 0   ;;  %s5325_s0 = inlined_call_operand.vmem [shape: bf16[512,32], index: 0, kind: input, shape index: {}]   ;;  %s5326_s1 = inlined_call_operand.vmem [shape: bf16[32,96], index: 1, kind: input, shape index: {}]   ;;  %s5327_s2 = inlined_call_operand.vmem [shape: f32[1,96], index: 2, kind: input, shape index: {}]   ;;  %s5328_s3 = inlined_call_operand.vmem [shape: f32[4,16,16], index: 3, kind: input, shape index: {}]   ;;  %s5329_s4 = inlined_call_operand.vmem [shape: bf16[32,32], index: 4, kind: input, shape index: {}]   ;;  %s5330_s5 = inlined_call_operand.vmem [shape: f32[1,32], index: 5, kind: input, shape index: {}]   ;;  %s5331_s6 = inlined_call_operand.vmem [shape: f32[512,32], index: 6, kind: output, shape index: {}]  }
   0x1 LB: > { %s3257_s22 = sadd.s32 4294967295, %s3709_s21   ;;  %p3261_p0 = scmp.ge.s32.totalorder %s3709_s21, 1  ;;  %s3709_s21 = sphi %s3757_s21, %s16_s21  }
   0x2   : > { %p213_p1 = scmp.lt.s32.totalorder %s3709_s21, 5 }
   0x4   : > { %p214_p2 = pnand %p3261_p0, %p213_p1 }
   0x6   : > { %217 = sbr.rel (%p214_p2) target bundleno = 2858 (0xb2a), region = 44 }
   0xb   : > { %v3421_v0 = vld [vmem:[%s5326_s1 + $0x8] sm:$0xff]  ;;  %s3262_s25 = sshll.u32 %s3257_s22, 4  ;;  %v3420_v1 = vld [vmem:[%s5326_s1] sm:$0xff]  ;;  %vm332_vm0 = vcmask 261120   ;;  %s3711_s10 = smov 96   ;;  %vm441_vm1 = vcmask 64512  }
   0xc   : > { %p244_p3 = scmp.lt.s32.totalorder %s3262_s25, 63  ;;  %363 = vmatpush.bf16.msra.mxu0 %v3421_v0  ;;  %v3788_v11 = vld [vmem:[%s5327_s2] ss:$0 sm:$0xff]  ;;  %s3712_s11 = smov 64   ;;  %vm651_vm2 = vcmask 130048   ;;  %vm1668_vm3 = vcmask 1043456  }
   0xd   : > { %s3713_s16 = smov 88   ;;  %s3714_s17 = smov 120  }
   0xe   : > { %s5379_s25 = smov (!%p244_p3, %s3262_s25), 63  ;;  %s3715_s18 = smov 56  }
   0xf   : > { %s3263_s28 = sshll.u32 %s5379_s25, 2  ;;  %s3716_s19 = smov 112  }
  0x10   : > { %364 = vmatpush.bf16.msra.mxu0 %v3420_v1  ;;  %s247_s7 = scalar_lea.vmem %s5325_s0, %s3263_s28  ;;  %s3717_s20 = smov 80  }
  0x11   : > { %v3412_v2 = vld [vmem:[%s247_s7] sm:$0xff]  ;;  %v3413_v3 = vld [vmem:[%s247_s7 + $0x8] sm:$0xff]  ;;  %v3414_v4 = vld [vmem:[%s247_s7 + $0x10] sm:$0xff]  ;;  %s3718_s27 = smov 72   ;;  %s3719_s28 = smov 48  }
  0x12   : > { %v3415_v5 = vld [vmem:[%s247_s7 + $0x18] sm:$0xff]  ;;  %v3416_v6 = vld [vmem:[%s247_s7 + $0x20] sm:$0xff]  ;;  %v3417_v7 = vld [vmem:[%s247_s7 + $0x28] sm:$0xff]  ;;  %s3720_s29 = smov 104   ;;  %s3721_s23 = smov 40  }
  0x13   : > { %3306 = vmatmul.msk.bf16.vlgmr.msra.gmra.mxu0 %vm332_vm0, %v3412_v2  ;;  %v3418_v8 = vld [vmem:[%s247_s7 + $0x30] sm:$0xff]  ;;  %v3419_v9 = vld [vmem:[%s247_s7 + $0x38] sm:$0xff] }
  0x23   : > { %3307 = vmatmul.msk.bf16.gmra.mxu0 %vm332_vm0, %v3413_v3 }
  0x33   : > { %3308 = vmatmul.msk.bf16.gmra.mxu0 %vm332_vm0, %v3414_v4 }
  0x43   : > { %3309 = vmatmul.msk.bf16.gmra.mxu0 %vm332_vm0, %v3415_v5 }
  0x53   : > { %3310 = vmatmul.msk.bf16.gmra.mxu0 %vm332_vm0, %v3416_v6 }
  0x63   : > { %3311 = vmatmul.msk.bf16.gmra.mxu0 %vm332_vm0, %v3417_v7 }
  0x73   : > { %3312 = vmatmul.msk.bf16.gmra.mxu0 %vm332_vm0, %v3418_v8 }
  0x83   : > { %3313 = vmatmul.msk.bf16.gmra.mxu0 %vm332_vm0, %v3419_v9 }
  0x90   : > { %v366_v10 = vpop.f32.mrf.mxu0 }
  0x91   : > { %v367_v12 = vadd.f32 %v3788_v11, %v366_v10 }
  0x93   : > { %v418_v14 = vpack.c.bf16 %v367_v12, %v367_v12 }
  0x95   : > { %v436_v17 = vunpack.c.l.b16 %v418_v14 }
  0x98   : > { %v368_v13 = vpop.f32.mrf.mxu0 }
  0x99   : > { %v369_v15 = vadd.f32 %v3788_v11, %v368_v13 }
  0x9b   : > { %v419_v16 = vpack.c.bf16 %v369_v15, %v369_v15 }
  0x9d   : > { %v437_v18 = vunpack.c.l.b16 %v419_v16 }
  0x9f   : > { %v3792_v19 = vpack.c.b16 %v437_v18, %v436_v17 }
  0xa0   : > { %v371_v20 = vpop.f32.mrf.mxu0 }
  0xa1   : > { %439 = vrot.lane.b32.xlu0 %v3792_v19, %s3711_s10  ;;  %v372_v1 = vadd.f32 %v3788_v11, %v371_v20 }
  0xa3   : > { %v420_v7 = vpack.c.bf16 %v372_v1, %v372_v1 }
  0xa5   : > { %v464_v10 = vunpack.c.l.b16 %v420_v7 }
  0xa8   : > { %v373_v21 = vpop.f32.mrf.mxu0 }
  0xa9   : > { %v374_v63 = vadd.f32 %v3788_v11, %v373_v21 }
  0xab   : > { %v421_v4 = vpack.c.bf16 %v374_v63, %v374_v63 }
  0xad   : > { %v465_v8 = vunpack.c.l.b16 %v421_v4 }
  0xaf   : > { %v3833_v12 = vpack.c.b16 %v465_v8, %v464_v10 }
  0xb0   : > { %v376_v22 = vpop.f32.mrf.mxu0 }
  0xb1   : > { %v377_v23 = vadd.f32 %v3788_v11, %v376_v22 }
  0xb3   : > { %v422_v25 = vpack.c.bf16 %v377_v23, %v377_v23 }
  0xb5   : > { %v491_v28 = vunpack.c.l.b16 %v422_v25 }
  0xb8   : > { %v378_v24 = vpop.f32.mrf.mxu0 }
  0xb9   : > { %v379_v26 = vadd.f32 %v3788_v11, %v378_v24 }
  0xbb   : > { %v423_v27 = vpack.c.bf16 %v379_v26, %v379_v26 }
  0xbd   : > { %v492_v29 = vunpack.c.l.b16 %v423_v27 }
  0xbf   : > { %v3798_v30 = vpack.c.b16 %v492_v29, %v491_v28 }
  0xc0   : > { %v381_v31 = vpop.f32.mrf.mxu0 }
  0xc1   : > { %494 = vrot.lane.b32.xlu0 %v3798_v30, %s3711_s10  ;;  %v382_v32 = vadd.f32 %v3788_v11, %v381_v31 }
  0xc3   : > { %v424_v34 = vpack.c.bf16 %v382_v32, %v382_v32 }
  0xc5   : > { %v518_v37 = vunpack.c.l.b16 %v424_v34 }
  0xc8   : > { %v383_v33 = vpop.f32.mrf.mxu0 }
  0xc9   : > { %v384_v35 = vadd.f32 %v3788_v11, %v383_v33 }
  0xcb   : > { %v425_v36 = vpack.c.bf16 %v384_v35, %v384_v35 }
  0xcd   : > { %v519_v38 = vunpack.c.l.b16 %v425_v36 }
  0xcf   : > { %v3804_v39 = vpack.c.b16 %v519_v38, %v518_v37 }
  0xd0   : > { %v386_v40 = vpop.f32.mrf.mxu0 }
  0xd1   : > { %521 = vrot.lane.b32.xlu1 %v3804_v39, %s3711_s10  ;;  %v387_v41 = vadd.f32 %v3788_v11, %v386_v40 }
  0xd3   : > { %v426_v43 = vpack.c.bf16 %v387_v41, %v387_v41 }
  0xd5   : > { %v545_v46 = vunpack.c.l.b16 %v426_v43 }
  0xd8   : > { %v388_v42 = vpop.f32.mrf.mxu0 }
  0xd9   : > { %v389_v44 = vadd.f32 %v3788_v11, %v388_v42  ;;  %v406_v42 = vld [vmem:[%s5328_s3] sm:$0xff] }
  0xdb   : > { %v427_v45 = vpack.c.bf16 %v389_v44, %v389_v44 }
  0xdd   : > { %v546_v47 = vunpack.c.l.b16 %v427_v45 }
  0xdf   : > { %v3810_v48 = vpack.c.b16 %v546_v47, %v545_v46  ;;  %v3880_v46 = vld [vmem:[%s5328_s3 + $0x8] sm:$0xff] }
  0xe0   : > { %v391_v49 = vpop.f32.mrf.mxu0 }
  0xe1   : > { %548 = vrot.lane.b32.xlu0 %v3810_v48, %s3711_s10  ;;  %v392_v50 = vadd.f32 %v3788_v11, %v391_v49 }
  0xe3   : > { %v428_v52 = vpack.c.bf16 %v392_v50, %v392_v50 }
  0xe5   : > { %v572_v55 = vunpack.c.l.b16 %v428_v52 }
  0xe8   : > { %v393_v51 = vpop.f32.mrf.mxu0 }
  0xe9   : > { %v394_v53 = vadd.f32 %v3788_v11, %v393_v51  ;;  %924 = vrot.lane.b32.xlu0 %v3804_v39, %s3712_s11 }
  0xeb   : > { %v429_v54 = vpack.c.bf16 %v394_v53, %v394_v53 }
  0xed   : > { %v573_v56 = vunpack.c.l.b16 %v429_v54 }
  0xef   : > { %v3818_v57 = vpack.c.b16 %v573_v56, %v572_v55 }
  0xf0   : > { %v396_v58 = vpop.f32.mrf.mxu0 }
  0xf1   : > { %575 = vrot.lane.b32.xlu1 %v3818_v57, %s3711_s10  ;;  %v397_v59 = vadd.f32 %v3788_v11, %v396_v58 }
  0xf3   : > { %v430_v61 = vpack.c.bf16 %v397_v59, %v397_v59 }
  0xf5   : > { %v599_v2 = vunpack.c.l.b16 %v430_v61 }
  0xf8   : > { %v398_v60 = vpop.f32.mrf.mxu0 }
  0xf9   : > { %v399_v62 = vadd.f32 %v3788_v11, %v398_v60  ;;  %974 = vrot.lane.b32.xlu1 %v3818_v57, %s3712_s11 }
  0xfb   : > { %v431_v0 = vpack.c.bf16 %v399_v62, %v399_v62 }
  0xfd   : > { %v600_v3 = vunpack.c.l.b16 %v431_v0 }
  0xff   : > { %v3828_v5 = vpack.c.b16 %v600_v3, %v599_v2 }
 0x100   : > { %v401_v6 = vpop.f32.mrf.mxu0 }
 0x101   : > { %602 = vrot.lane.b32.xlu2 %v3828_v5, %s3711_s10  ;;  %v402_v9 = vadd.f32 %v3788_v11, %v401_v6 }
 0x103   : > { %v432_v13 = vpack.c.bf16 %v402_v9, %v402_v9 }
 0x105   : > { %v626_v16 = vunpack.c.l.b16 %v432_v13 }
 0x108   : > { %v403_v14 = vpop.f32.mrf.mxu0 }
 0x109   : > { %v404_v15 = vadd.f32 %v3788_v11, %v403_v14  ;;  %467 = vrot.lane.b32.xlu2 %v3833_v12, %s3711_s10 }
 0x10b   : > { %v433_v17 = vpack.c.bf16 %v404_v15, %v404_v15 }
 0x10d   : > { %v627_v18 = vunpack.c.l.b16 %v433_v17 }
 0x10f   : > { %v3838_v20 = vpack.c.b16 %v627_v18, %v626_v16 }
 0x111   : > { %629 = vrot.lane.b32.xlu1 %v3838_v20, %s3711_s10  ;;  %849 = vrot.lane.b32.xlu2 %v3792_v19, %s3712_s11 }
 0x113   : > { %v440_v21 = vpop.permute.xlu0 %439 }
 0x114   : > { %v446_v22 = vsel %vm441_vm1, %v440_v21, 0 }
 0x115   : > { %455 = vmatpush.bf16.xpose.msra.mxu1 %v446_v22 }
 0x119   : > { %899 = vrot.lane.b32.xlu2 %v3798_v30, %s3712_s11 }
 0x11c   : > { %3314 = vmatmul.msk.bf16.vlgmr.msra.gmra.mxu1 %vm441_vm1, %v3792_v19 }
 0x133   : > { %v495_v11 = vpop.permute.xlu0 %494 }
 0x134   : > { %v500_v23 = vsel %vm441_vm1, %v495_v11, 0 }
 0x135   : > { %509 = vmatpush.bf16.xpose.msra.mxu3 %v500_v23 }
 0x13c   : > { %3316 = vmatmul.msk.bf16.vlgmr.msra.gmra.mxu3 %vm441_vm1, %v3798_v30 }
 0x143   : > { %v522_v24 = vpop.permute.xlu1 %521 }
 0x144   : > { %v527_v25 = vsel %vm441_vm1, %v522_v24, 0 }
 0x145   : > { %536 = vmatpush.bf16.xpose.msrb.mxu1 %v527_v25 }
 0x14c   : > { %3317 = vmatmul.msk.bf16.vlgmr.msrb.gmra.mxu1 %vm441_vm1, %v3804_v39 }
 0x153   : > { %v549_v28 = vpop.permute.xlu0 %548 }
 0x154   : > { %v554_v34 = vsel %vm441_vm1, %v549_v28, 0 }
 0x15b   : > { %v603_v26 = vpop.permute.xlu2 %602  ;;  %v925_v36 = vpop.permute.xlu0 %924 }
 0x15c   : > { %v608_v27 = vsel %vm441_vm1, %v603_v26, 0 }
 0x15d   : > { %617 = vmatpush.bf16.xpose.msra.mxu1 %v608_v27 }
 0x163   : > { %v576_v29 = vpop.permute.xlu1 %575  ;;  %v468_v31 = vpop.permute.xlu2 %467 }
 0x164   : > { %3320 = vmatmul.msk.bf16.vlgmr.msra.gmra.mxu1 %vm441_vm1, %v3828_v5  ;;  %v473_v32 = vsel %vm441_vm1, %v468_v31, 0  ;;  %v581_v33 = vsel %vm441_vm1, %v576_v29, 0 }
 0x165   : > { %482 = vmatpush.bf16.xpose.msra.mxu2 %v473_v32  ;;  %590 = vmatpush.bf16.xpose.msrb.mxu3 %v581_v33 }
 0x16b   : > { %v850_v35 = vpop.permute.xlu2 %849  ;;  %v975_v37 = vpop.permute.xlu1 %974 }
 0x16c   : > { %3315 = vmatmul.msk.bf16.vlgmr.msra.gmra.mxu2 %vm441_vm1, %v3833_v12  ;;  %3319 = vmatmul.msk.bf16.vlgmr.msrb.gmra.mxu3 %vm441_vm1, %v3818_v57 }
 0x16d   : > { %563 = vmatpush.bf16.xpose.msrb.mxu2 %v554_v34  ;;  %862 = vmatpush.bf16.msra.mxu3 %v850_v35 }
 0x171   : > { %937 = vmatpush.bf16.msrb.mxu3 %v925_v36 }
 0x173   : > { %v900_v41 = vpop.permute.xlu2 %899 }
 0x17c   : > { %3318 = vmatmul.msk.bf16.vlgmr.msrb.gmra.mxu2 %vm441_vm1, %v3810_v48 }
 0x183   : > { %v630_v38 = vpop.permute.xlu1 %629 }
 0x184   : > { %v635_v40 = vsel %vm441_vm1, %v630_v38, 0 }
 0x185   : > { %644 = vmatpush.bf16.xpose.msra.mxu2 %v635_v40 }
 0x18c   : > { %3321 = vmatmul.msk.bf16.vlgmr.msra.gmra.mxu2 %vm441_vm1, %v3838_v20 }
 0x18d   : > { %912 = vmatpush.bf16.msrb.mxu2 %v900_v41 }
 0x191   : > { %987 = vmatpush.bf16.msra.mxu2 %v975_v37 }
 0x199   : > { %v457_v43 = vpop.f32.mrf.mxu1 }
 0x19a   : > { %v3873_v44 = vadd.f32 %v457_v43, %v406_v42 }
 0x19c   : > { %v652_v45 = vsel %vm651_vm2, %v3873_v44, -inf }
 0x19d   : > { %653 = vmax.xlane.f32.xlu2 %v652_v45 }
 0x1a1   : > { %v459_v47 = vpop.f32.mrf.mxu1 }
 0x1a2   : > { %v460_v49 = vadd.f32 %v459_v47, %v3880_v46 }
 0x1a4   : > { %v655_v50 = vsel %vm651_vm2, %v460_v49, -inf }
 0x1a5   : > { %656 = vmax.xlane.f32.xlu0 %v655_v50 }
 0x1bf   : > { %v511_v51 = vpop.f32.mrf.mxu3 }
 0x1c0   : > { %v3884_v52 = vadd.f32 %v511_v51, %v406_v42 }
 0x1c2   : > { %v664_v53 = vsel %vm651_vm2, %v3884_v52, -inf }
 0x1c3   : > { %665 = vmax.xlane.f32.xlu1 %v664_v53 }
 0x1c7   : > { %v513_v56 = vpop.f32.mrf.mxu3 }
 0x1c8   : > { %v3893_v60 = vadd.f32 %v513_v56, %v3880_v46 }
 0x1c9   : > { %v538_v58 = vpop.f32.mrf.mxu1 }
 0x1ca   : > { %v667_v1 = vsel %vm651_vm2, %v3893_v60, -inf  ;;  %v3902_v3 = vadd.f32 %v538_v58, %v406_v42 }
 0x1cc   : > { %v670_v8 = vsel %vm651_vm2, %v3902_v3, -inf }
 0x1d1   : > { %v540_v2 = vpop.f32.mrf.mxu1 }
 0x1d2   : > { %v3905_v4 = vadd.f32 %v540_v2, %v3880_v46 }
 0x1d4   : > { %v673_v7 = vsel %vm651_vm2, %v3905_v4, -inf }
 0x1e1   : > { %v619_v16 = vpop.f32.mrf.mxu1 }
 0x1e2   : > { %v3927_v11 = vadd.f32 %v619_v16, %v406_v42 }
 0x1e4   : > { %v688_v26 = vsel %vm651_vm2, %v3927_v11, -inf }
 0x1e9   : > { %v621_v25 = vpop.f32.mrf.mxu1 }
 0x1ea   : > { %v3934_v27 = vadd.f32 %v621_v25, %v3880_v46 }
 0x1ec   : > { %v691_v34 = vsel %vm651_vm2, %v3934_v27, -inf }
 0x1ef   : > { %v484_v54 = vpop.f32.mrf.mxu2  ;;  %v592_v63 = vpop.f32.mrf.mxu3 }
 0x1f0   : > { %v3888_v55 = vadd.f32 %v484_v54, %v406_v42  ;;  %v3925_v22 = vadd.f32 %v592_v63, %v406_v42 }
 0x1f2   : > { %v658_v59 = vsel %vm651_vm2, %v3888_v55, -inf  ;;  %v682_v24 = vsel %vm651_vm2, %v3925_v22, -inf }
 0x1f3   : > { %659 = vmax.xlane.f32.xlu2 %v658_v59 }
 0x1f7   : > { %v486_v61 = vpop.f32.mrf.mxu2  ;;  %v594_v9 = vpop.f32.mrf.mxu3 }
 0x1f8   : > { %v3896_v62 = vadd.f32 %v486_v61, %v3880_v46  ;;  %v3912_v10 = vadd.f32 %v594_v9, %v3880_v46 }
 0x1fa   : > { %v661_v0 = vsel %vm651_vm2, %v3896_v62, -inf  ;;  %v685_v17 = vsel %vm651_vm2, %v3912_v10, -inf }
 0x1fb   : > { %662 = vmax.xlane.f32.xlu0 %v661_v0  ;;  %668 = vmax.xlane.f32.xlu2 %v667_v1 }
 0x1ff   : > { %v565_v6 = vpop.f32.mrf.mxu2 }
 0x200   : > { %v3914_v13 = vadd.f32 %v565_v6, %v406_v42 }
 0x202   : > { %v676_v21 = vsel %vm651_vm2, %v3914_v13, -inf }
 0x203   : > { %674 = vmax.xlane.f32.xlu0 %v673_v7  ;;  %671 = vmax.xlane.f32.xlu2 %v670_v8 }
 0x207   : > { %v567_v14 = vpop.f32.mrf.mxu2 }
 0x208   : > { %v3917_v15 = vadd.f32 %v567_v14, %v3880_v46 }
 0x20a   : > { %v679_v18 = vsel %vm651_vm2, %v3917_v15, -inf }
 0x20b   : > { %686 = vmax.xlane.f32.xlu2 %v685_v17  ;;  %680 = vmax.xlane.f32.xlu1 %v679_v18 }
 0x20c   : > { %677 = vmax.xlane.f32.xlu0 %v676_v21 }
 0x20f   : > { %v646_v23 = vpop.f32.mrf.mxu2 }
 0x210   : > { %v654_v28 = vpop.xlane.xlu2 %653  ;;  %v3936_v29 = vadd.f32 %v646_v23, %v406_v42 }
 0x211   : > { %v700_v32 = vsub.f32 %v3873_v44, %v654_v28 }
 0x212   : > { %v694_v37 = vsel %vm651_vm2, %v3936_v29, -inf }
 0x213   : > { %683 = vmax.xlane.f32.xlu1 %v682_v24  ;;  %v716_v38 = vmul.f32 1.442695, %v700_v32 }
 0x214   : > { %689 = vmax.xlane.f32.xlu0 %v688_v26 }
 0x217   : > { %v648_v35 = vpop.f32.mrf.mxu2 }
 0x218   : > { %v657_v31 = vpop.xlane.xlu0 %656  ;;  %v3944_v40 = vadd.f32 %v648_v35, %v3880_v46 }
 0x219   : > { %v701_v33 = vsub.f32 %v460_v49, %v657_v31 }
 0x21a   : > { %v697_v41 = vsel %vm651_vm2, %v3944_v40, -inf }
 0x21b   : > { %v718_v36 = vmul.f32 1.442695, %v701_v33  ;;  %692 = vmax.xlane.f32.xlu1 %v691_v34 }
 0x21c   : > { %695 = vmax.xlane.f32.xlu0 %v694_v37 }
 0x21d   : > { %3445 = vpow2.f32 %v718_v36 }
 0x21e   : > { %3447 = vpow2.f32 %v716_v38 }
 0x223   : > { %v3948_v42 = vpop.eup %3445  ;;  %698 = vmax.xlane.f32.xlu1 %v697_v41 }
 0x224   : > { %v751_v43 = vsel %vm651_vm2, %v3948_v42, 0.0  ;;  %v3952_v44 = vpop.eup %3447 }
 0x225   : > { %752 = vadd.xlane.f32.xlu2 %v751_v43  ;;  %v748_v45 = vsel %vm651_vm2, %v3952_v44, 0.0 }
 0x22b   : > { %749 = vadd.xlane.f32.xlu1 %v748_v45 }
 0x230   : > { %1078 = vrot.lane.b32.xlu0 %v3833_v12, %s3713_s16 }
 0x236   : > { %v666_v50 = vpop.xlane.xlu1 %665 }
 0x237   : > { %v704_v56 = vsub.f32 %v3884_v52, %v666_v50 }
 0x238   : > { %1052 = vrot.lane.b32.xlu0 %v3792_v19, %s3714_s17 }
 0x239   : > { %v724_v61 = vmul.f32 1.442695, %v704_v56 }
 0x23d   : > { %999 = vrot.lane.b32.xlu2 %v3828_v5, %s3712_s11 }
 0x240   : > { %1076 = vrot.lane.b32.xlu0 %v3833_v12, %s3714_s17 }
 0x244   : > { %1054 = vrot.lane.b32.xlu1 %v3792_v19, %s3713_s16 }
 0x248   : > { %1126 = vrot.lane.b32.xlu0 %v3804_v39, %s3713_s16 }
 0x24c   : > { %874 = vrot.lane.b32.xlu1 %v3833_v12, %s3712_s11 }
 0x250   : > { %1150 = vrot.lane.b32.xlu0 %v3810_v48, %s3713_s16 }
 0x266   : > { %v660_v46 = vpop.xlane.xlu2 %659 }
 0x267   : > { %v702_v47 = vsub.f32 %v3888_v55, %v660_v46 }
 0x269   : > { %v720_v49 = vmul.f32 1.442695, %v702_v47 }
 0x26b   : > { %3449 = vpow2.f32 %v720_v49 }
 0x26e   : > { %v669_v51 = vpop.xlane.xlu2 %668  ;;  %v663_v53 = vpop.xlane.xlu0 %662 }
 0x26f   : > { %v703_v54 = vsub.f32 %v3896_v62, %v663_v53  ;;  %v705_v59 = vsub.f32 %v3893_v60, %v669_v51 }
 0x271   : > { %v722_v58 = vmul.f32 1.442695, %v703_v54  ;;  %v3976_v63 = vpop.eup %3449  ;;  %v726_v0 = vmul.f32 1.442695, %v705_v59 }
 0x272   : > { %v754_v6 = vsel %vm651_vm2, %v3976_v63, 0.0 }
 0x273   : > { %3451 = vpow2.f32 %v722_v58 }
 0x274   : > { %3453 = vpow2.f32 %v724_v61 }
 0x275   : > { %3455 = vpow2.f32 %v726_v0 }
 0x276   : > { %v672_v1 = vpop.xlane.xlu2 %671  ;;  %v675_v2 = vpop.xlane.xlu0 %674 }
 0x277   : > { %v706_v55 = vsub.f32 %v3902_v3, %v672_v1  ;;  %v707_v52 = vsub.f32 %v3905_v4, %v675_v2 }
 0x279   : > { %v3981_v62 = vpop.eup %3451  ;;  %v728_v7 = vmul.f32 1.442695, %v706_v55  ;;  %v730_v9 = vmul.f32 1.442695, %v707_v52 }
 0x27a   : > { %755 = vadd.xlane.f32.xlu0 %v754_v6  ;;  %v757_v60 = vsel %vm651_vm2, %v3981_v62, 0.0  ;;  %v3986_v8 = vpop.eup %3453 }
 0x27b   : > { %758 = vadd.xlane.f32.xlu1 %v757_v60  ;;  %v3988_v3 = vpop.eup %3455  ;;  %3457 = vpow2.f32 %v728_v7  ;;  %v760_v4 = vsel %vm651_vm2, %v3986_v8, 0.0 }
 0x27c   : > { %3459 = vpow2.f32 %v730_v9  ;;  %v763_v25 = vsel %vm651_vm2, %v3988_v3, 0.0 }
 0x27e   : > { %v681_v14 = vpop.xlane.xlu1 %680  ;;  %v687_v17 = vpop.xlane.xlu2 %686 }
 0x27f   : > { %v678_v16 = vpop.xlane.xlu0 %677  ;;  %v709_v21 = vsub.f32 %v3917_v15, %v681_v14  ;;  %v711_v24 = vsub.f32 %v3912_v10, %v687_v17 }
 0x280   : > { %v708_v18 = vsub.f32 %v3914_v13, %v678_v16 }
 0x281   : > { %v3997_v26 = vpop.eup %3457  ;;  %v734_v28 = vmul.f32 1.442695, %v709_v21  ;;  %v738_v13 = vmul.f32 1.442695, %v711_v24 }
 0x282   : > { %v732_v23 = vmul.f32 1.442695, %v708_v18  ;;  %761 = vadd.xlane.f32.xlu0 %v760_v4  ;;  %v3999_v32 = vpop.eup %3459  ;;  %v766_v33 = vsel %vm651_vm2, %v3997_v26, 0.0 }
 0x283   : > { %764 = vadd.xlane.f32.xlu1 %v763_v25  ;;  %v769_v34 = vsel %vm651_vm2, %v3999_v32, 0.0 }
 0x284   : > { %3461 = vpow2.f32 %v732_v23 }
 0x285   : > { %3463 = vpow2.f32 %v734_v28 }
 0x286   : > { %v684_v31 = vpop.xlane.xlu1 %683  ;;  %3465 = vpow2.f32 %v738_v13 }
 0x287   : > { %v710_v15 = vsub.f32 %v3925_v22, %v684_v31  ;;  %v690_v61 = vpop.xlane.xlu0 %689 }
 0x288   : > { %v712_v17 = vsub.f32 %v3927_v11, %v690_v61 }
 0x289   : > { %v736_v36 = vmul.f32 1.442695, %v710_v15 }
 0x28a   : > { %767 = vadd.xlane.f32.xlu0 %v766_v33  ;;  %v4004_v10 = vpop.eup %3461  ;;  %v740_v18 = vmul.f32 1.442695, %v712_v17 }
 0x28b   : > { %770 = vadd.xlane.f32.xlu1 %v769_v34  ;;  %v772_v35 = vsel %vm651_vm2, %v4004_v10, 0.0  ;;  %v4010_v38 = vpop.eup %3463  ;;  %3467 = vpow2.f32 %v736_v36 }
 0x28c   : > { %773 = vadd.xlane.f32.xlu2 %v772_v35  ;;  %v4012_v41 = vpop.eup %3465  ;;  %v775_v22 = vsel %vm651_vm2, %v4010_v38, 0.0 }
 0x28d   : > { %v781_v43 = vsel %vm651_vm2, %v4012_v41, 0.0 }
 0x28e   : > { %v693_v37 = vpop.xlane.xlu1 %692 }
 0x28f   : > { %v696_v6 = vpop.xlane.xlu0 %695  ;;  %v713_v21 = vsub.f32 %v3934_v27, %v693_v37 }
 0x291   : > { %v4020_v46 = vpop.eup %3467  ;;  %v742_v23 = vmul.f32 1.442695, %v713_v21 }
 0x292   : > { %v778_v49 = vsel %vm651_vm2, %v4020_v46, 0.0 }
 0x293   : > { %776 = vadd.xlane.f32.xlu1 %v775_v22 }
 0x294   : > { %782 = vadd.xlane.f32.xlu2 %v781_v43 }
 0x296   : > { %v4018_v45 = vpop.xlane.xlu1 %698 }
 0x298   : > { %v753_v47 = vpop.xlane.xlu2 %752 }
 0x299   : > { %3469 = vrcp.f32 %v753_v47 }
 0x29b   : > { %779 = vadd.xlane.f32.xlu1 %v778_v49 }
 0x29e   : > { %1102 = vrot.lane.b32.xlu0 %v3798_v30, %s3713_s16  ;;  %v750_v50 = vpop.xlane.xlu1 %749 }
 0x29f   : > { %v3470_v51 = vpop.eup %3469  ;;  %3471 = vrcp.f32 %v750_v50 }
 0x2a0   : > { %v813_v53 = vmul.f32 %v3470_v51, %v3948_v42  ;;  %v1000_v55 = vpop.permute.xlu2 %999  ;;  %v714_v42 = vsub.f32 %v3936_v29, %v696_v6 }
 0x2a2   : > { %v829_v56 = vpack.c.bf16 %v813_v53, %v813_v53  ;;  %v744_v52 = vmul.f32 1.442695, %v714_v42  ;;  %v4038_v60 = vpop.permute.xlu0 %1078 }
 0x2a4   : > { %v847_v0 = vunpack.c.l.b16 %v829_v56  ;;  %3473 = vpow2.f32 %v744_v52 }
 0x2a5   : > { %v3472_v54 = vpop.eup %3471  ;;  %3475 = vpow2.f32 %v740_v18 }
 0x2a6   : > { %v812_v58 = vmul.f32 %v3472_v54, %v3952_v44  ;;  %3477 = vpow2.f32 %v742_v23 }
 0x2a8   : > { %v828_v59 = vpack.c.bf16 %v812_v58, %v812_v58 }
 0x2aa   : > { %v846_v1 = vunpack.c.l.b16 %v828_v59  ;;  %v4044_v9 = vpop.eup %3473  ;;  %v4048_v29 = vpop.permute.xlu0 %1052 }
 0x2ab   : > { %v790_v14 = vsel %vm651_vm2, %v4044_v9, 0.0  ;;  %v4066_v24 = vpop.eup %3475 }
 0x2ac   : > { %v848_v2 = vpack.c.b16 %v847_v0, %v846_v1  ;;  %949 = vrot.lane.b32.xlu2 %v3810_v48, %s3712_s11  ;;  %v784_v25 = vsel %vm651_vm2, %v4066_v24, 0.0  ;;  %v4076_v27 = vpop.eup %3477 }
 0x2ad   : > { %v787_v31 = vsel %vm651_vm2, %v4076_v27, 0.0 }
 0x2ae   : > { %3322 = vmatmul.msk.bf16.vlgmr.msra.gmra.mxu3 %vm651_vm2, %v848_v2 }
 0x2af   : > { %1012 = vmatpush.bf16.msra.mxu3 %v1000_v55 }
 0x2b2   : > { %v4054_v16 = vpop.permute.xlu0 %1076 }
 0x2b4   : > { %1148 = vrot.lane.b32.xlu2 %v3810_v48, %s3714_s17  ;;  %1124 = vrot.lane.b32.xlu1 %v3804_v39, %s3714_s17 }
 0x2b6   : > { %v4036_v44 = vpop.permute.xlu1 %1054 }
 0x2ba   : > { %v4059_v4 = vpop.permute.xlu0 %1126 }
 0x2bc   : > { %1222 = vrot.lane.b32.xlu2 %v3838_v20, %s3713_s16  ;;  %1024 = vrot.lane.b32.xlu1 %v3838_v20, %s3712_s11 }
 0x2be   : > { %v875_v7 = vpop.permute.xlu1 %874 }
 0x2bf   : > { %887 = vmatpush.bf16.msrb.mxu1 %v875_v7 }
 0x2c2   : > { %v4070_v11 = vpop.permute.xlu0 %1150 }
 0x2c4   : > { %1220 = vrot.lane.b32.xlu2 %v3838_v20, %s3714_s17 }
 0x2c8   : > { %791 = vadd.xlane.f32.xlu0 %v790_v14 }
 0x2cc   : > { %1198 = vrot.lane.b32.xlu2 %v3828_v5, %s3713_s16 }
 0x2d4   : > { %1174 = vrot.lane.b32.xlu2 %v3818_v57, %s3713_s16 }
 0x2dc   : > { %1616 = vrot.lane.b32.xlu0 %v3838_v20, %s3715_s18  ;;  %1491 = vrot.lane.b32.xlu2 %v3798_v30, %s3715_s18 }
 0x2e4   : > { %1797 = vrot.lane.b32.xlu0 %v3792_v19, %s3716_s19  ;;  %1821 = vrot.lane.b32.xlu2 %v3833_v12, %s3716_s19 }
 0x2e6   : > { %785 = vadd.xlane.f32.xlu1 %v784_v25  ;;  %v1084_v25 = vsel %vm441_vm1, %v4038_v60, 0 }
 0x2ec   : > { %1965 = vrot.lane.b32.xlu0 %v3838_v20, %s3716_s19  ;;  %1591 = vrot.lane.b32.xlu2 %v3828_v5, %s3715_s18 }
 0x2ed   : > { %v756_v28 = vpop.xlane.xlu0 %755 }
 0x2ee   : > { %3479 = vrcp.f32 %v756_v28  ;;  %v759_v13 = vpop.xlane.xlu1 %758  ;;  %788 = vadd.xlane.f32.xlu1 %v787_v31 }
 0x2ef   : > { %3481 = vrcp.f32 %v759_v13 }
 0x2f4   : > { %v3480_v33 = vpop.eup %3479  ;;  %1871 = vrot.lane.b32.xlu2 %v3804_v39, %s3717_s20 }
 0x2f5   : > { %v814_v15 = vmul.f32 %v3480_v33, %v3976_v63  ;;  %v762_v34 = vpop.xlane.xlu0 %761  ;;  %v3482_v35 = vpop.eup %3481 }
 0x2f6   : > { %3483 = vrcp.f32 %v762_v34  ;;  %v815_v37 = vmul.f32 %v3482_v35, %v3981_v62  ;;  %v765_v22 = vpop.xlane.xlu1 %764 }
 0x2f7   : > { %v830_v36 = vpack.c.bf16 %v814_v15, %v814_v15  ;;  %3485 = vrcp.f32 %v765_v22 }
 0x2f8   : > { %v831_v43 = vpack.c.bf16 %v815_v37, %v815_v37 }
 0x2f9   : > { %v871_v47 = vunpack.c.l.b16 %v830_v36 }
 0x2fa   : > { %v872_v49 = vunpack.c.l.b16 %v831_v43 }
 0x2fc   : > { %v3484_v50 = vpop.eup %3483  ;;  %v873_v51 = vpack.c.b16 %v872_v49, %v871_v47  ;;  %1869 = vrot.lane.b32.xlu2 %v3804_v39, %s3716_s19 }
 0x2fd   : > { %v816_v53 = vmul.f32 %v3484_v50, %v3986_v8  ;;  %v768_v63 = vpop.xlane.xlu0 %767  ;;  %v3486_v54 = vpop.eup %3485 }
 0x2fe   : > { %3487 = vrcp.f32 %v768_v63  ;;  %v817_v58 = vmul.f32 %v3486_v54, %v3988_v3  ;;  %v771_v59 = vpop.xlane.xlu1 %770  ;;  %3323 = vmatmul.msk.bf16.vlgmr.msrb.gmra.mxu1 %vm651_vm2, %v873_v51  ;;  %v1060_v3 = vsel %vm441_vm1, %v4036_v44, 0 }
 0x2ff   : > { %v832_v56 = vpack.c.bf16 %v816_v53, %v816_v53  ;;  %3489 = vrcp.f32 %v771_v59  ;;  %v774_v62 = vpop.xlane.xlu2 %773  ;;  %v1132_v53 = vsel %vm441_vm1, %v4059_v4, 0 }
 0x300   : > { %v833_v61 = vpack.c.bf16 %v817_v58, %v817_v58  ;;  %3491 = vrcp.f32 %v774_v62 }
 0x301   : > { %v896_v0 = vunpack.c.l.b16 %v832_v56 }
 0x302   : > { %v897_v1 = vunpack.c.l.b16 %v833_v61 }
 0x304   : > { %v3488_v2 = vpop.eup %3487  ;;  %v898_v8 = vpack.c.b16 %v897_v1, %v896_v0  ;;  %1847 = vrot.lane.b32.xlu2 %v3798_v30, %s3717_s20 }
 0x305   : > { %v818_v55 = vmul.f32 %v3488_v2, %v3997_v26  ;;  %v3490_v6 = vpop.eup %3489 }
 0x306   : > { %v819_v52 = vmul.f32 %v3490_v6, %v3999_v32  ;;  %v777_v7 = vpop.xlane.xlu1 %776  ;;  %3324 = vmatmul.msk.bf16.vlgmr.msrb.gmra.mxu2 %vm651_vm2, %v898_v8  ;;  %v3492_v14 = vpop.eup %3491 }
 0x307   : > { %v834_v42 = vpack.c.bf16 %v818_v55, %v818_v55  ;;  %3493 = vrcp.f32 %v777_v7  ;;  %v783_v17 = vpop.xlane.xlu2 %782  ;;  %1069 = vmatpush.bf16.xpose.msrb.mxu2 %v1060_v3  ;;  %1100 = vrot.lane.b32.xlu1 %v3798_v30, %s3714_s17  ;;  %v820_v23 = vmul.f32 %v3492_v14, %v4004_v10 }
 0x308   : > { %v835_v26 = vpack.c.bf16 %v819_v52, %v819_v52  ;;  %3495 = vrcp.f32 %v783_v17 }
 0x309   : > { %v921_v18 = vunpack.c.l.b16 %v834_v42  ;;  %v836_v28 = vpack.c.bf16 %v820_v23, %v820_v23 }
 0x30a   : > { %v922_v21 = vunpack.c.l.b16 %v835_v26  ;;  %v1156_v26 = vsel %vm441_vm1, %v4070_v11, 0 }
 0x30b   : > { %v946_v10 = vunpack.c.l.b16 %v836_v28 }
 0x30c   : > { %v923_v44 = vpack.c.b16 %v922_v21, %v921_v18  ;;  %1845 = vrot.lane.b32.xlu2 %v3798_v30, %s3716_s19 }
 0x30d   : > { %v3494_v32 = vpop.eup %3493 }
 0x30e   : > { %v821_v31 = vmul.f32 %v3494_v32, %v4010_v38  ;;  %v780_v13 = vpop.xlane.xlu1 %779  ;;  %3325 = vmatmul.msk.bf16.vlgmr.msrb.gmra.mxu3 %vm651_vm2, %v923_v44  ;;  %v3496_v33 = vpop.eup %3495 }
 0x30f   : > { %3497 = vrcp.f32 %v780_v13  ;;  %v950_v15 = vpop.permute.xlu2 %949  ;;  %1093 = vmatpush.bf16.xpose.msrb.mxu3 %v1084_v25  ;;  %v823_v36 = vmul.f32 %v3496_v33, %v4012_v41  ;;  %v715_v41 = vsub.f32 %v3944_v40, %v4018_v45 }
 0x310   : > { %v837_v34 = vpack.c.bf16 %v821_v31, %v821_v31  ;;  %962 = vmatpush.bf16.msra.mxu1 %v950_v15  ;;  %v1103_v58 = vpop.permute.xlu0 %1102 }
 0x311   : > { %v839_v43 = vpack.c.bf16 %v823_v36, %v823_v36  ;;  %v746_v54 = vmul.f32 1.442695, %v715_v41  ;;  %v1108_v61 = vsel %vm441_vm1, %v1103_v58, 0 }
 0x312   : > { %v947_v35 = vunpack.c.l.b16 %v837_v34 }
 0x313   : > { %v972_v49 = vunpack.c.l.b16 %v839_v43  ;;  %3499 = vpow2.f32 %v746_v54 }
 0x314   : > { %v948_v37 = vpack.c.b16 %v947_v35, %v946_v10 }
 0x315   : > { %v3498_v22 = vpop.eup %3497 }
 0x316   : > { %v822_v60 = vmul.f32 %v3498_v22, %v4020_v46  ;;  %3326 = vmatmul.msk.bf16.vlgmr.msra.gmra.mxu1 %vm651_vm2, %v948_v37 }
 0x317   : > { %v1149_v38 = vpop.permute.xlu2 %1148 }
 0x318   : > { %v838_v47 = vpack.c.bf16 %v822_v60, %v822_v60  ;;  %v4168_v60 = vld [vmem:[%s5328_s3 + $0x10] sm:$0xff] }
 0x319   : > { %v3500_v59 = vpop.eup %3499 }
 0x31a   : > { %v971_v50 = vunpack.c.l.b16 %v838_v47  ;;  %v793_v40 = vsel %vm651_vm2, %v3500_v59, 0.0 }
 0x31c   : > { %v973_v51 = vpack.c.b16 %v972_v49, %v971_v50 }
 0x31e   : > { %3327 = vmatmul.msk.bf16.vlgmr.msra.gmra.mxu2 %vm651_vm2, %v973_v51  ;;  %v4179_v51 = vld [vmem:[%s5328_s3 + $0x18] sm:$0xff] }
 0x31f   : > { %v1223_v63 = vpop.permute.xlu2 %1222  ;;  %1141 = vmatpush.bf16.xpose.msra.mxu2 %v1132_v53 }
 0x326   : > { %v1125_v56 = vpop.permute.xlu1 %1124 }
 0x327   : > { %v1221_v46 = vpop.permute.xlu2 %1220 }
 0x32e   : > { %v1025_v62 = vpop.permute.xlu1 %1024  ;;  %3330 = vmatmul.msk.bf16.vlgmr.msrb.gmra.mxu2 %vm441_vm1, %v4048_v29 }
 0x32f   : > { %v1199_v4 = vpop.permute.xlu2 %1198  ;;  %1037 = vmatpush.bf16.msrb.mxu1 %v1025_v62 }
 0x330   : > { %v1204_v0 = vsel %vm441_vm1, %v1199_v4, 0 }
 0x331   : > { %1213 = vmatpush.bf16.xpose.msrb.mxu2 %v1204_v0  ;;  %794 = vadd.xlane.f32.xlu1 %v793_v40 }
 0x333   : > { %1117 = vmatpush.bf16.xpose.msra.mxu1 %v1108_v61 }
 0x337   : > { %v1175_v45 = vpop.permute.xlu2 %1174 }
 0x338   : > { %v1180_v37 = vsel %vm441_vm1, %v1175_v45, 0 }
 0x33b   : > { %v792_v18 = vpop.xlane.xlu0 %791 }
 0x33e   : > { %3333 = vmatmul.msk.bf16.vlgmr.msra.gmra.mxu2 %vm441_vm1, %v1125_v56 }
 0x33f   : > { %v1492_v1 = vpop.permute.xlu2 %1491 }
 0x340   : > { %1504 = vmatpush.bf16.msra.mxu2 %v1492_v1 }
 0x347   : > { %v4158_v36 = vpop.permute.xlu2 %1821 }
 0x34a   : > { %1196 = vrot.lane.b32.xlu1 %v3828_v5, %s3714_s17 }
 0x34e   : > { %v1617_v56 = vpop.permute.xlu0 %1616 }
 0x34f   : > { %v1592_v43 = vpop.permute.xlu2 %1591 }
 0x352   : > { %1172 = vrot.lane.b32.xlu1 %v3818_v57, %s3714_s17 }
 0x359   : > { %v786_v29 = vpop.xlane.xlu1 %785 }
 0x35a   : > { %1516 = vrot.lane.b32.xlu1 %v3804_v39, %s3715_s18  ;;  %3501 = vrcp.f32 %v786_v29 }
 0x360   : > { %v3502_v8 = vpop.eup %3501 }
 0x361   : > { %v789_v2 = vpop.xlane.xlu1 %788  ;;  %v824_v55 = vmul.f32 %v3502_v8, %v4066_v24  ;;  %v1228_v24 = vsel %vm441_vm1, %v1223_v63, 0 }
 0x362   : > { %3503 = vrcp.f32 %v789_v2  ;;  %1823 = vrot.lane.b32.xlu1 %v3833_v12, %s3717_s20 }
 0x363   : > { %v840_v3 = vpack.c.bf16 %v824_v55, %v824_v55  ;;  %3505 = vrcp.f32 %v792_v18 }
 0x365   : > { %v996_v7 = vunpack.c.l.b16 %v840_v3 }
 0x368   : > { %v3504_v6 = vpop.eup %3503 }
 0x369   : > { %v825_v42 = vmul.f32 %v3504_v6, %v4076_v27  ;;  %v3506_v32 = vpop.eup %3505 }
 0x36a   : > { %1799 = vrot.lane.b32.xlu1 %v3792_v19, %s3717_s20  ;;  %v826_v25 = vmul.f32 %v3506_v32, %v4044_v9 }
 0x36b   : > { %v841_v52 = vpack.c.bf16 %v825_v42, %v825_v42 }
 0x36c   : > { %v842_v31 = vpack.c.bf16 %v826_v25, %v826_v25 }
 0x36d   : > { %v997_v14 = vunpack.c.l.b16 %v841_v52  ;;  %v4216_v52 = vpop.permute.xlu2 %1871 }
 0x36e   : > { %v1021_v15 = vunpack.c.l.b16 %v842_v31 }
 0x36f   : > { %v998_v17 = vpack.c.b16 %v997_v14, %v996_v7 }
 0x371   : > { %3328 = vmatmul.msk.bf16.vlgmr.msra.gmra.mxu3 %vm651_vm2, %v998_v17 }
 0x372   : > { %1165 = vmatpush.bf16.xpose.msra.mxu3 %v1156_v26  ;;  %1919 = vrot.lane.b32.xlu1 %v3818_v57, %s3717_s20 }
 0x375   : > { %v4227_v18 = vpop.permute.xlu2 %1869 }
 0x379   : > { %v1101_v21 = vpop.permute.xlu1 %1100 }
 0x37a   : > { %1917 = vrot.lane.b32.xlu1 %v3818_v57, %s3716_s19 }
 0x37b   : > { %v4200_v45 = vpop.f32.mrf.mxu1 }
 0x37d   : > { %v4233_v32 = vpop.permute.xlu2 %1847 }
 0x381   : > { %3331 = vmatmul.msk.bf16.vlgmr.msrb.gmra.mxu3 %vm441_vm1, %v4054_v16 }
 0x382   : > { %1237 = vmatpush.bf16.xpose.msrb.mxu3 %v1228_v24 }
 0x383   : > { %v4204_v29 = vpop.f32.mrf.mxu1 }
 0x389   : > { %v4145_v27 = vpop.f32.mrf.mxu2 }
 0x391   : > { %3334 = vmatmul.msk.bf16.vlgmr.msra.gmra.mxu3 %vm441_vm1, %v1149_v38  ;;  %v4148_v11 = vpop.f32.mrf.mxu2 }
 0x393   : > { %v4210_v55 = vpop.f32.mrf.mxu1 }
 0x39b   : > { %v4214_v42 = vpop.f32.mrf.mxu1 }
 0x3a1   : > { %v4150_v23 = vpop.f32.mrf.mxu2  ;;  %3337 = vmatmul.msk.bf16.vlgmr.msrb.gmra.mxu3 %vm441_vm1, %v1221_v46  ;;  %v4183_v46 = vpop.f32.mrf.mxu3 }
 0x3a4   : > { %v795_v44 = vpop.xlane.xlu1 %794 }
 0x3a5   : > { %3507 = vrcp.f32 %v795_v44 }
 0x3a9   : > { %v4154_v16 = vpop.f32.mrf.mxu2  ;;  %v4186_v58 = vpop.f32.mrf.mxu3 }
 0x3ab   : > { %v3508_v28 = vpop.eup %3507 }
 0x3ac   : > { %v827_v13 = vmul.f32 %v3508_v28, %v3500_v59 }
 0x3ae   : > { %v843_v33 = vpack.c.bf16 %v827_v13, %v827_v13 }
 0x3b0   : > { %v1022_v34 = vunpack.c.l.b16 %v843_v33 }
 0x3b1   : > { %v4156_v10 = vpop.f32.mrf.mxu2  ;;  %v4190_v59 = vpop.f32.mrf.mxu3 }
 0x3b2   : > { %v1023_v35 = vpack.c.b16 %v1022_v34, %v1021_v15 }
 0x3b4   : > { %3329 = vmatmul.msk.bf16.vlgmr.msrb.gmra.mxu1 %vm651_vm2, %v1023_v35 }
 0x3b5   : > { %1189 = vmatpush.bf16.xpose.msrb.mxu1 %v1180_v37 }
 0x3b9   : > { %v4162_v22 = vpop.f32.mrf.mxu2  ;;  %v4192_v62 = vpop.f32.mrf.mxu3 }
 0x3bc   : > { %v1197_v9 = vpop.permute.xlu1 %1196 }
 0x3bd   : > { %3336 = vmatmul.msk.bf16.vlgmr.msrb.gmra.mxu2 %vm441_vm1, %v1197_v9  ;;  %v4239_v9 = vpop.permute.xlu2 %1845 }
 0x3be   : > { %1604 = vmatpush.bf16.msrb.mxu2 %v1592_v43 }
 0x3c1   : > { %v1143_v38 = vpop.f32.mrf.mxu2 }
 0x3c2   : > { %v4171_v47 = vadd.f32 %v1143_v38, %v4168_v60 }
 0x3c4   : > { %v1173_v49 = vpop.permute.xlu1 %1172  ;;  %3332 = vmatmul.msk.bf16.vlgmr.msra.gmra.mxu1 %vm441_vm1, %v1101_v21  ;;  %v1262_v50 = vsel %vm651_vm2, %v4171_v47, -inf }
 0x3c5   : > { %1263 = vmax.xlane.f32.xlu2 %v1262_v50 }
 0x3c9   : > { %v1145_v53 = vpop.f32.mrf.mxu2 }
 0x3ca   : > { %v1146_v41 = vadd.f32 %v1145_v53, %v4179_v51 }
 0x3cc   : > { %v1517_v63 = vpop.permute.xlu1 %1516  ;;  %v1265_v54 = vsel %vm651_vm2, %v1146_v41, -inf }
 0x3cd   : > { %1266 = vmax.xlane.f32.xlu1 %v1265_v54  ;;  %1529 = vmatpush.bf16.msra.mxu3 %v1517_v63 }
 0x3d1   : > { %1629 = vmatpush.bf16.msrb.mxu3 %v1617_v56 }
 0x3d4   : > { %3335 = vmatmul.msk.bf16.vlgmr.msrb.gmra.mxu1 %vm441_vm1, %v1173_v49  ;;  %v4206_v2 = vpop.permute.xlu1 %1823 }
 0x3dc   : > { %v4212_v6 = vpop.permute.xlu1 %1799 }
 0x3dd   : > { %1895 = vrot.lane.b32.xlu2 %v3810_v48, %s3717_s20 }
 0x3e4   : > { %v4221_v17 = vpop.permute.xlu1 %1919 }
 0x3ec   : > { %v4229_v21 = vpop.permute.xlu1 %1917 }
 0x3f4   : > { %v4194_v61 = vpop.f32.mrf.mxu3 }
 0x3fc   : > { %v4196_v4 = vpop.f32.mrf.mxu3 }
 0x404   : > { %v4198_v0 = vpop.f32.mrf.mxu3 }
 0x40c   : > { %v1097_v40 = vpop.f32.mrf.mxu3 }
 0x414   : > { %v4202_v1 = vpop.f32.mrf.mxu3 }
 0x415   : > { %5332 = vst [vmem:[#allocation2_spill] sm:$0xff] %v4202_v1 }
 0x41c   : > { %v4208_v8 = vpop.f32.mrf.mxu3 }
 0x41d   : > { %5333 = vst [vmem:[#allocation3_spill] sm:$0xff] %v4208_v8 }
 0x424   : > { %v1239_v3 = vpop.f32.mrf.mxu3 }
 0x42c   : > { %v1241_v7 = vpop.f32.mrf.mxu3 }
 0x42d   : > { %v4219_v14 = vadd.f32 %v1241_v7, %v4179_v51 }
 0x42f   : > { %v1289_v26 = vsel %vm651_vm2, %v4219_v14, -inf }
 0x430   : > { %1290 = vmax.xlane.f32.xlu2 %v1289_v26 }
 0x431   : > { %v4225_v24 = vpop.f32.mrf.mxu1 }
 0x432   : > { %5334 = vst [vmem:[#allocation4_spill] sm:$0xff] %v4225_v24 }
 0x438   : > { %v1264_v63 = vpop.xlane.xlu2 %1263 }
 0x439   : > { %v4231_v44 = vpop.f32.mrf.mxu1  ;;  %v1298_v56 = vsub.f32 %v4171_v47, %v1264_v63  ;;  %v4258_v47 = vadd.f32 %v1097_v40, %v4179_v51 }
 0x43a   : > { %5335 = vst [vmem:[#allocation5_spill] sm:$0xff] %v4231_v44 }
 0x43b   : > { %v1320_v26 = vmul.f32 1.442695, %v1298_v56 }
 0x440   : > { %v1215_v25 = vpop.f32.mrf.mxu2  ;;  %v1267_v28 = vpop.xlane.xlu1 %1266 }
 0x441   : > { %v1216_v31 = vadd.f32 %v1215_v25, %v4168_v60  ;;  %v1299_v13 = vsub.f32 %v1146_v41, %v1267_v28  ;;  %v1119_v33 = vpop.f32.mrf.mxu1  ;;  %v1240_v25 = vadd.f32 %v1239_v3, %v4168_v60  ;;  %v1253_v3 = vsel %vm651_vm2, %v4258_v47, -inf  ;;  %v4266_v63 = vpop.permute.xlu2 %1895 }
 0x442   : > { %v1120_v15 = vadd.f32 %v1119_v33, %v4168_v60 }
 0x443   : > { %v1322_v34 = vmul.f32 1.442695, %v1299_v13  ;;  %v1280_v35 = vsel %vm651_vm2, %v1216_v31, -inf  ;;  %v1286_v28 = vsel %vm651_vm2, %v1240_v25, -inf }
 0x444   : > { %1281 = vmax.xlane.f32.xlu0 %v1280_v35  ;;  %v1256_v37 = vsel %vm651_vm2, %v1120_v15, -inf }
 0x445   : > { %3509 = vpow2.f32 %v1322_v34  ;;  %1257 = vmax.xlane.f32.xlu1 %v1256_v37  ;;  %v4262_v34 = vpop.permute.xlu0 %1797 }
 0x446   : > { %3511 = vpow2.f32 %v1320_v26 }
 0x448   : > { %v1217_v41 = vpop.f32.mrf.mxu2 }
 0x449   : > { %v1121_v43 = vpop.f32.mrf.mxu1  ;;  %v1218_v54 = vadd.f32 %v1217_v41, %v4179_v51 }
 0x44a   : > { %v1122_v38 = vadd.f32 %v1121_v43, %v4179_v51 }
 0x44b   : > { %v4242_v49 = vpop.eup %3509  ;;  %v1283_v7 = vsel %vm651_vm2, %v1218_v54, -inf }
 0x44c   : > { %v1361_v50 = vsel %vm651_vm2, %v4242_v49, 0.0  ;;  %v1259_v53 = vsel %vm651_vm2, %v1122_v38, -inf  ;;  %v3512_v13 = vpop.eup %3511 }
 0x44d   : > { %1362 = vadd.xlane.f32.xlu2 %v1361_v50  ;;  %1260 = vmax.xlane.f32.xlu0 %v1259_v53  ;;  %v1358_v33 = vsel %vm651_vm2, %v3512_v13, 0.0  ;;  %v4264_v35 = vpop.permute.xlu0 %1965 }
 0x455   : > { %1284 = vmax.xlane.f32.xlu0 %v1283_v7 }
 0x45d   : > { %1287 = vmax.xlane.f32.xlu0 %v1286_v28 }
 0x45e   : > { %1967 = vrot.lane.b32.xlu1 %v3838_v20, %s3717_s20 }
 0x465   : > { %1943 = vrot.lane.b32.xlu2 %v3828_v5, %s3717_s20  ;;  %1359 = vadd.xlane.f32.xlu0 %v1358_v33 }
 0x48e   : > { %1254 = vmax.xlane.f32.xlu2 %v1253_v3 }
 0x4a3   : > { %v1291_v33 = vpop.xlane.xlu2 %1290 }
 0x4b7   : > { %v1282_v37 = vpop.xlane.xlu0 %1281 }
 0x4b8   : > { %v1258_v43 = vpop.xlane.xlu1 %1257  ;;  %v1304_v53 = vsub.f32 %v1216_v31, %v1282_v37 }
 0x4b9   : > { %v1296_v50 = vsub.f32 %v1120_v15, %v1258_v43  ;;  %v1307_v15 = vsub.f32 %v4219_v14, %v1291_v33 }
 0x4ba   : > { %v1332_v56 = vmul.f32 1.442695, %v1304_v53 }
 0x4bb   : > { %v1316_v41 = vmul.f32 1.442695, %v1296_v50 }
 0x4bd   : > { %3513 = vpow2.f32 %v1316_v41 }
 0x4be   : > { %3515 = vpow2.f32 %v1332_v56 }
 0x4c0   : > { %v1261_v7 = vpop.xlane.xlu0 %1260  ;;  %v1363_v50 = vpop.xlane.xlu2 %1362 }
 0x4c1   : > { %v1297_v26 = vsub.f32 %v1122_v38, %v1261_v7  ;;  %v1338_v38 = vmul.f32 1.442695, %v1307_v15 }
 0x4c3   : > { %v4268_v40 = vpop.eup %3513  ;;  %v1318_v3 = vmul.f32 1.442695, %v1297_v26 }
 0x4c4   : > { %v1352_v28 = vsel %vm651_vm2, %v4268_v40, 0.0  ;;  %v4272_v1 = vpop.eup %3515 }
 0x4c5   : > { %1353 = vadd.xlane.f32.xlu0 %v1352_v28  ;;  %3517 = vpow2.f32 %v1318_v3  ;;  %v1376_v43 = vsel %vm651_vm2, %v4272_v1, 0.0 }
 0x4c8   : > { %v1285_v8 = vpop.xlane.xlu0 %1284 }
 0x4c9   : > { %v1305_v31 = vsub.f32 %v1218_v54, %v1285_v8 }
 0x4cb   : > { %v1334_v37 = vmul.f32 1.442695, %v1305_v31  ;;  %v4277_v41 = vpop.eup %3517 }
 0x4cc   : > { %v1355_v14 = vsel %vm651_vm2, %v4277_v41, 0.0 }
 0x4cd   : > { %3519 = vpow2.f32 %v1334_v37  ;;  %1377 = vadd.xlane.f32.xlu0 %v1376_v43 }
 0x4ce   : > { %3521 = vpow2.f32 %v1338_v38 }
 0x4cf   : > { %3523 = vrcp.f32 %v1363_v50 }
 0x4d0   : > { %v1288_v53 = vpop.xlane.xlu0 %1287 }
 0x4d1   : > { %v1306_v56 = vsub.f32 %v1240_v25, %v1288_v53 }
 0x4d3   : > { %v4279_v7 = vpop.eup %3519  ;;  %v1336_v8 = vmul.f32 1.442695, %v1306_v56 }
 0x4d4   : > { %v1379_v54 = vsel %vm651_vm2, %v4279_v7, 0.0  ;;  %v4285_v26 = vpop.eup %3521 }
 0x4d5   : > { %3525 = vpow2.f32 %v1336_v8  ;;  %1356 = vadd.xlane.f32.xlu0 %v1355_v14  ;;  %1380 = vadd.xlane.f32.xlu1 %v1379_v54  ;;  %v3524_v33 = vpop.eup %3523  ;;  %v1385_v31 = vsel %vm651_vm2, %v4285_v26, 0.0  ;;  %v1829_v14 = vsel %vm441_vm1, %v4206_v2, 0 }
 0x4d6   : > { %v1411_v3 = vmul.f32 %v3524_v33, %v4242_v49  ;;  %v4301_v49 = vpop.permute.xlu2 %1943 }
 0x4d8   : > { %v1360_v28 = vpop.xlane.xlu0 %1359  ;;  %v1427_v43 = vpack.c.bf16 %v1411_v3, %v1411_v3 }
 0x4d9   : > { %3527 = vrcp.f32 %v1360_v28  ;;  %v1191_v28 = vpop.f32.mrf.mxu1 }
 0x4da   : > { %v1514_v53 = vunpack.c.l.b16 %v1427_v43  ;;  %v4305_v3 = vadd.f32 %v1191_v28, %v4168_v60 }
 0x4db   : > { %v4287_v25 = vpop.eup %3525 }
 0x4dc   : > { %v1382_v15 = vsel %vm651_vm2, %v4287_v25, 0.0  ;;  %v1274_v2 = vsel %vm651_vm2, %v4305_v3, -inf }
 0x4dd   : > { %1386 = vadd.xlane.f32.xlu1 %v1385_v31  ;;  %1383 = vadd.xlane.f32.xlu0 %v1382_v15  ;;  %v4311_v31 = vadd.f32 %v4198_v0, %v4168_v60 }
 0x4df   : > { %v3528_v37 = vpop.eup %3527 }
 0x4e0   : > { %v1410_v38 = vmul.f32 %v3528_v37, %v3512_v13  ;;  %v1250_v37 = vsel %vm651_vm2, %v4311_v31, -inf }
 0x4e2   : > { %v1426_v50 = vpack.c.bf16 %v1410_v38, %v1410_v38 }
 0x4e4   : > { %v1513_v56 = vunpack.c.l.b16 %v1426_v50 }
 0x4e6   : > { %v1515_v8 = vpack.c.b16 %v1514_v53, %v1513_v56  ;;  %v4326_v53 = vpop.permute.xlu1 %1967 }
 0x4e8   : > { %3341 = vmatmul.msk.bf16.vlgmr.msra.gmra.mxu3 %vm651_vm2, %v1515_v8 }
 0x4e9   : > { %1838 = vmatpush.bf16.xpose.msra.mxu3 %v1829_v14 }
 0x4f1   : > { %1941 = vrot.lane.b32.xlu0 %v3828_v5, %s3716_s19 }
 0x4f6   : > { %1893 = vrot.lane.b32.xlu1 %v3810_v48, %s3716_s19 }
 0x501   : > { %v1255_v54 = vpop.xlane.xlu2 %1254 }
 0x502   : > { %v1295_v13 = vsub.f32 %v4258_v47, %v1255_v54  ;;  %v1193_v47 = vpop.f32.mrf.mxu1 }
 0x503   : > { %v4320_v38 = vadd.f32 %v1193_v47, %v4179_v51 }
 0x504   : > { %v1314_v33 = vmul.f32 1.442695, %v1295_v13 }
 0x505   : > { %v1277_v50 = vsel %vm651_vm2, %v4320_v38, -inf }
 0x506   : > { %3529 = vpow2.f32 %v1314_v33 }
 0x50c   : > { %v4313_v15 = vpop.eup %3529 }
 0x50d   : > { %v1349_v43 = vsel %vm651_vm2, %v4313_v15, 0.0 }
 0x51b   : > { %1275 = vmax.xlane.f32.xlu0 %v1274_v2 }
 0x520   : > { %1251 = vmax.xlane.f32.xlu1 %v1250_v37 }
 0x523   : > { %1350 = vadd.xlane.f32.xlu0 %v1349_v43 }
 0x528   : > { %1278 = vmax.xlane.f32.xlu1 %v1277_v50 }
 0x537   : > { %2531 = vrot.lane.b32.xlu0 %v3798_v30, %s3718_s27 }
 0x538   : > { %v1354_v0 = vpop.xlane.xlu0 %1353 }
 0x539   : > { %3531 = vrcp.f32 %v1354_v0 }
 0x53f   : > { %v3532_v54 = vpop.eup %3531 }
 0x540   : > { %v1378_v56 = vpop.xlane.xlu0 %1377  ;;  %v1408_v13 = vmul.f32 %v3532_v54, %v4268_v40  ;;  %v1805_v54 = vsel %vm441_vm1, %v4212_v6, 0 }
 0x541   : > { %1466 = vrot.lane.b32.xlu1 %v3833_v12, %s3715_s18 }
 0x542   : > { %v1424_v37 = vpack.c.bf16 %v1408_v13, %v1408_v13 }
 0x544   : > { %v1488_v50 = vunpack.c.l.b16 %v1424_v37 }
 0x548   : > { %v1381_v8 = vpop.xlane.xlu1 %1380  ;;  %v1357_v14 = vpop.xlane.xlu0 %1356 }
 0x549   : > { %2211 = vrot.lane.b32.xlu1 %v3833_v12, %s3719_s28  ;;  %3533 = vrcp.f32 %v1357_v14 }
 0x54a   : > { %3535 = vrcp.f32 %v1381_v8 }
 0x54f   : > { %v3534_v28 = vpop.eup %3533 }
 0x550   : > { %v1387_v33 = vpop.xlane.xlu1 %1386  ;;  %v1384_v2 = vpop.xlane.xlu0 %1383  ;;  %v1409_v47 = vmul.f32 %v3534_v28, %v4277_v41 }
 0x551   : > { %3537 = vrcp.f32 %v1387_v33  ;;  %2261 = vrot.lane.b32.xlu1 %v3804_v39, %s3719_s28  ;;  %v3536_v44 = vpop.eup %3535 }
 0x552   : > { %3539 = vrcp.f32 %v1384_v2  ;;  %v1425_v43 = vpack.c.bf16 %v1409_v47, %v1409_v47  ;;  %v1417_v28 = vmul.f32 %v3536_v44, %v4279_v7  ;;  %v1853_v7 = vsel %vm441_vm1, %v4233_v32, 0 }
 0x553   : > { %3541 = vrcp.f32 %v1378_v56  ;;  %v1901_v32 = vsel %vm441_vm1, %v4266_v63, 0 }
 0x554   : > { %v1489_v0 = vunpack.c.l.b16 %v1425_v43 }
 0x556   : > { %v1490_v24 = vpack.c.b16 %v1489_v0, %v1488_v50 }
 0x557   : > { %v3538_v14 = vpop.eup %3537 }
 0x558   : > { %v3540_v40 = vpop.eup %3539  ;;  %v1419_v8 = vmul.f32 %v3538_v14, %v4285_v26  ;;  %3340 = vmatmul.msk.bf16.vlgmr.msra.gmra.mxu2 %vm651_vm2, %v1490_v24  ;;  %v4346_v26 = vadd.f32 %v4156_v10, %v4168_v60  ;;  %v1877_v24 = vsel %vm441_vm1, %v4216_v52, 0  ;;  %v1925_v52 = vsel %vm441_vm1, %v4221_v17, 0 }
 0x559   : > { %v1418_v41 = vmul.f32 %v3540_v40, %v4287_v25  ;;  %2186 = vrot.lane.b32.xlu1 %v3792_v19, %s3719_s28  ;;  %v3542_v13 = vpop.eup %3541  ;;  %1814 = vmatpush.bf16.xpose.msra.mxu2 %v1805_v54  ;;  %v1433_v25 = vpack.c.bf16 %v1417_v28, %v1417_v28  ;;  %v1949_v17 = vsel %vm441_vm1, %v4301_v49, 0 }
 0x55a   : > { %v1435_v56 = vpack.c.bf16 %v1419_v8, %v1419_v8  ;;  %v1416_v6 = vmul.f32 %v3542_v13, %v4272_v1  ;;  %v1244_v44 = vsel %vm651_vm2, %v4346_v26, -inf }
 0x55b   : > { %v1434_v33 = vpack.c.bf16 %v1418_v41, %v1418_v41  ;;  %v1589_v10 = vunpack.c.l.b16 %v1433_v25 }
 0x55c   : > { %v1614_v2 = vunpack.c.l.b16 %v1435_v56  ;;  %v1432_v43 = vpack.c.bf16 %v1416_v6, %v1416_v6 }
 0x55d   : > { %v1613_v37 = vunpack.c.l.b16 %v1434_v33 }
 0x55e   : > { %v1588_v60 = vunpack.c.l.b16 %v1432_v43 }
 0x55f   : > { %v1615_v47 = vpack.c.b16 %v1614_v2, %v1613_v37 }
 0x560   : > { %v1590_v1 = vpack.c.b16 %v1589_v10, %v1588_v60  ;;  %v4433_v10 = vld [vmem:[%s5328_s3 + $0x20] sm:$0xff]  ;;  %v4437_v60 = vadd.f32 %v4162_v22, %v4179_v51 }
 0x561   : > { %3345 = vmatmul.msk.bf16.vlgmr.msrb.gmra.mxu3 %vm651_vm2, %v1615_v47  ;;  %2311 = vrot.lane.b32.xlu1 %v3818_v57, %s3719_s28 }
 0x562   : > { %1886 = vmatpush.bf16.xpose.msrb.mxu3 %v1877_v24  ;;  %1245 = vmax.xlane.f32.xlu0 %v1244_v44 }
 0x568   : > { %3344 = vmatmul.msk.bf16.vlgmr.msrb.gmra.mxu2 %vm651_vm2, %v1590_v1  ;;  %v1894_v63 = vpop.permute.xlu1 %1893 }
 0x569   : > { %2236 = vrot.lane.b32.xlu1 %v3798_v30, %s3719_s28  ;;  %1862 = vmatpush.bf16.xpose.msrb.mxu2 %v1853_v7 }
 0x56b   : > { %v4414_v33 = vpop.f32.mrf.mxu3 }
 0x571   : > { %3363 = vmatmul.msk.bf16.vlgmr.msra.gmra.mxu3 %vm441_vm1, %v4158_v36  ;;  %2361 = vrot.lane.b32.xlu1 %v3838_v20, %s3719_s28  ;;  %v1973_v36 = vsel %vm441_vm1, %v4326_v53, 0 }
 0x572   : > { %1934 = vmatpush.bf16.xpose.msra.mxu3 %v1925_v52 }
 0x573   : > { %v4418_v37 = vpop.f32.mrf.mxu3 }
 0x576   : > { %2481 = vrot.lane.b32.xlu0 %v3792_v19, %s3720_s29 }
 0x578   : > { %3362 = vmatmul.msk.bf16.vlgmr.msra.gmra.mxu2 %vm441_vm1, %v4262_v34  ;;  %v1942_v34 = vpop.permute.xlu0 %1941 }
 0x579   : > { %2529 = vrot.lane.b32.xlu1 %v3798_v30, %s3720_s29  ;;  %1910 = vmatpush.bf16.xpose.msra.mxu2 %v1901_v32 }
 0x581   : > { %3365 = vmatmul.msk.bf16.vlgmr.msrb.gmra.mxu3 %vm441_vm1, %v4227_v18  ;;  %2336 = vrot.lane.b32.xlu1 %v3828_v5, %s3719_s28 }
 0x582   : > { %1982 = vmatpush.bf16.xpose.msrb.mxu3 %v1973_v36  ;;  %v1247_v36 = vsel %vm651_vm2, %v4437_v60, -inf }
 0x588   : > { %3364 = vmatmul.msk.bf16.vlgmr.msrb.gmra.mxu2 %vm441_vm1, %v4239_v9 }
 0x589   : > { %2507 = vrot.lane.b32.xlu1 %v3833_v12, %s3718_s27  ;;  %1958 = vmatpush.bf16.xpose.msrb.mxu2 %v1949_v17  ;;  %v4451_v17 = vld [vmem:[%s5328_s3 + $0x28] sm:$0xff] }
 0x58e   : > { %v1276_v18 = vpop.xlane.xlu0 %1275 }
 0x58f   : > { %v1302_v0 = vsub.f32 %v4305_v3, %v1276_v18 }
 0x591   : > { %3367 = vmatmul.msk.bf16.vlgmr.msra.gmra.mxu3 %vm441_vm1, %v4229_v21  ;;  %v1328_v9 = vmul.f32 1.442695, %v1302_v0 }
 0x593   : > { %v1252_v53 = vpop.xlane.xlu1 %1251 }
 0x594   : > { %v1294_v50 = vsub.f32 %v4311_v31, %v1252_v53 }
 0x596   : > { %v1312_v14 = vmul.f32 1.442695, %v1294_v50  ;;  %v1351_v22 = vpop.xlane.xlu0 %1350 }
 0x598   : > { %3543 = vpow2.f32 %v1312_v14  ;;  %3366 = vmatmul.msk.bf16.vlgmr.msra.gmra.mxu2 %vm441_vm1, %v1894_v63 }
 0x599   : > { %3545 = vpow2.f32 %v1328_v9 }
 0x59b   : > { %v1279_v49 = vpop.xlane.xlu1 %1278 }
 0x59c   : > { %v1303_v40 = vsub.f32 %v4320_v38, %v1279_v49 }
 0x59e   : > { %v4393_v8 = vpop.eup %3543  ;;  %v1330_v54 = vmul.f32 1.442695, %v1303_v40 }
 0x59f   : > { %v1346_v21 = vsel %vm651_vm2, %v4393_v8, 0.0  ;;  %v4399_v3 = vpop.eup %3545 }
 0x5a0   : > { %3547 = vpow2.f32 %v1330_v54  ;;  %1347 = vadd.xlane.f32.xlu2 %v1346_v21  ;;  %v1370_v38 = vsel %vm651_vm2, %v4399_v3, 0.0 }
 0x5a1   : > { %3369 = vmatmul.msk.bf16.vlgmr.msrb.gmra.mxu3 %vm441_vm1, %v4264_v35  ;;  %3549 = vrcp.f32 %v1351_v22 }
 0x5a6   : > { %v4401_v31 = vpop.eup %3547 }
 0x5a7   : > { %v1373_v41 = vsel %vm651_vm2, %v4401_v31, 0.0 }
 0x5a8   : > { %1374 = vadd.xlane.f32.xlu0 %v1373_v41  ;;  %1371 = vadd.xlane.f32.xlu2 %v1370_v38  ;;  %v3550_v38 = vpop.eup %3549 }
 0x5a9   : > { %3368 = vmatmul.msk.bf16.vlgmr.msrb.gmra.mxu2 %vm441_vm1, %v1942_v34  ;;  %v4458_v53 = vpop.permute.xlu0 %2531 }
 0x5b3   : > { %v1467_v13 = vpop.permute.xlu1 %1466 }
 0x5b4   : > { %1479 = vmatpush.bf16.msra.mxu1 %v1467_v13  ;;  %v1407_v13 = vmul.f32 %v3550_v38, %v4313_v15 }
 0x5bb   : > { %v2212_v56 = vpop.permute.xlu1 %2211 }
 0x5bc   : > { %2224 = vmatpush.bf16.msra.mxu3 %v2212_v56 }
 0x5c0   : > { %1566 = vrot.lane.b32.xlu2 %v3818_v57, %s3715_s18 }
 0x5c3   : > { %v2262_v35 = vpop.permute.xlu1 %2261 }
 0x5c4   : > { %2274 = vmatpush.bf16.msrb.mxu3 %v2262_v35 }
 0x5c8   : > { %2286 = vrot.lane.b32.xlu2 %v3810_v48, %s3719_s28 }
 0x5cb   : > { %v2187_v28 = vpop.permute.xlu1 %2186 }
 0x5cc   : > { %2199 = vmatpush.bf16.msra.mxu2 %v2187_v28  ;;  %v1423_v28 = vpack.c.bf16 %v1407_v13, %v1407_v13 }
 0x5ce   : > { %v1464_v22 = vunpack.c.l.b16 %v1423_v28 }
 0x5d0   : > { %2483 = vrot.lane.b32.xlu2 %v3792_v19, %s3718_s27 }
 0x5d3   : > { %v4416_v2 = vpop.permute.xlu1 %2311 }
 0x5d5   : > { %v4470_v54 = vpop.xlane.xlu0 %1245 }
 0x5db   : > { %v2237_v6 = vpop.permute.xlu1 %2236  ;;  %v4420_v25 = vpop.f32.mrf.mxu2 }
 0x5dc   : > { %2249 = vmatpush.bf16.msrb.mxu2 %v2237_v6 }
 0x5e3   : > { %v4422_v47 = vpop.f32.mrf.mxu2 }
 0x5e4   : > { %v4424_v24 = vpop.f32.mrf.mxu3 }
 0x5e8   : > { %v4474_v21 = vpop.permute.xlu0 %2481 }
 0x5eb   : > { %v4426_v43 = vpop.f32.mrf.mxu2 }
 0x5ec   : > { %v4428_v44 = vpop.f32.mrf.mxu3 }
 0x5ed   : > { %5336 = vst [vmem:[#allocation6_spill] sm:$0xff] %v4428_v44 }
 0x5f3   : > { %v4439_v1 = vpop.f32.mrf.mxu2 }
 0x5f4   : > { %v1840_v7 = vpop.f32.mrf.mxu3 }
 0x5f5   : > { %v4442_v52 = vadd.f32 %v1840_v7, %v4433_v10 }
 0x5f7   : > { %v1995_v32 = vsel %vm651_vm2, %v4442_v52, -inf }
 0x5f8   : > { %1996 = vmax.xlane.f32.xlu0 %v1995_v32 }
 0x5f9   : > { %1248 = vmax.xlane.f32.xlu2 %v1247_v36 }
 0x5fb   : > { %v1816_v51 = vpop.f32.mrf.mxu2 }
 0x5fc   : > { %v1842_v34 = vpop.f32.mrf.mxu3 }
 0x5fd   : > { %v4454_v63 = vadd.f32 %v1842_v34, %v4451_v17 }
 0x5ff   : > { %v1998_v18 = vsel %vm651_vm2, %v4454_v63, -inf }
 0x600   : > { %1999 = vmax.xlane.f32.xlu0 %v1998_v18  ;;  %v414_v18 = vld [vmem:[%s5329_s4] sm:$0xf] }
 0x603   : > { %v1818_v50 = vpop.f32.mrf.mxu2 }
 0x604   : > { %v1888_v0 = vpop.f32.mrf.mxu3  ;;  %v4461_v14 = vadd.f32 %v1818_v50, %v4451_v17 }
 0x605   : > { %v4464_v9 = vadd.f32 %v1888_v0, %v4433_v10  ;;  %v1746_v0 = vsel %vm1668_vm3, %v414_v18, 0 }
 0x606   : > { %v1992_v40 = vsel %vm651_vm2, %v4461_v14, -inf }
 0x607   : > { %v2007_v49 = vsel %vm651_vm2, %v4464_v9, -inf }
 0x608   : > { %2008 = vmax.xlane.f32.xlu1 %v2007_v49  ;;  %1993 = vmax.xlane.f32.xlu0 %v1992_v40 }
 0x60b   : > { %v1864_v35 = vpop.f32.mrf.mxu2 }
 0x60c   : > { %v1890_v50 = vpop.f32.mrf.mxu3 }
 0x611   : > { %2603 = vrot.lane.b32.xlu2 %v3818_v57, %s3718_s27 }
 0x613   : > { %v1348_v41 = vpop.xlane.xlu2 %1347 }
 0x614   : > { %3551 = vrcp.f32 %v1348_v41  ;;  %v1866_v41 = vpop.f32.mrf.mxu2 }
 0x61a   : > { %v3552_v56 = vpop.eup %3551 }
 0x61b   : > { %v1406_v6 = vmul.f32 %v3552_v56, %v4393_v8  ;;  %v1372_v7 = vpop.xlane.xlu2 %1371  ;;  %v1375_v32 = vpop.xlane.xlu0 %1374 }
 0x61c   : > { %2601 = vrot.lane.b32.xlu0 %v3818_v57, %s3720_s29  ;;  %3553 = vrcp.f32 %v1372_v7  ;;  %v1936_v7 = vpop.f32.mrf.mxu3 }
 0x61d   : > { %v1422_v36 = vpack.c.bf16 %v1406_v6, %v1406_v6  ;;  %3555 = vrcp.f32 %v1375_v32 }
 0x61f   : > { %v1463_v34 = vunpack.c.l.b16 %v1422_v36 }
 0x621   : > { %v1465_v15 = vpack.c.b16 %v1464_v22, %v1463_v34  ;;  %2555 = vrot.lane.b32.xlu1 %v3804_v39, %s3718_s27  ;;  %v1912_v22 = vpop.f32.mrf.mxu2 }
 0x622   : > { %v3554_v8 = vpop.eup %3553 }
 0x623   : > { %v3556_v49 = vpop.eup %3555  ;;  %v1567_v40 = vpop.permute.xlu2 %1566  ;;  %3339 = vmatmul.msk.bf16.vlgmr.msra.gmra.mxu1 %vm651_vm2, %v1465_v15  ;;  %v1414_v38 = vmul.f32 %v3554_v8, %v4399_v3 }
 0x624   : > { %1579 = vmatpush.bf16.msrb.mxu1 %v1567_v40  ;;  %v1415_v13 = vmul.f32 %v3556_v49, %v4401_v31  ;;  %v4494_v40 = vadd.f32 %v1816_v51, %v4433_v10  ;;  %v1938_v3 = vpop.f32.mrf.mxu3 }
 0x625   : > { %v1430_v56 = vpack.c.bf16 %v1414_v38, %v1414_v38  ;;  %v1044_v38 = vpack.c.bf16 %v4186_v58, %v4183_v46  ;;  %v4518_v46 = vadd.f32 %v1890_v50, %v4451_v17  ;;  %v1045_v50 = vpack.c.bf16 %v4204_v29, %v4200_v45 }
 0x626   : > { %v1431_v28 = vpack.c.bf16 %v1415_v13, %v1415_v13  ;;  %v1989_v8 = vsel %vm651_vm2, %v4494_v40, -inf  ;;  %v4504_v13 = vadd.f32 %v1864_v35, %v4433_v10  ;;  %v1046_v45 = vpack.c.bf16 %v4148_v11, %v4145_v27 }
 0x627   : > { %v1563_v32 = vunpack.c.l.b16 %v1430_v56  ;;  %v4547_v29 = vadd.f32 %v1938_v3, %v4451_v17 }
 0x628   : > { %1755 = vmatpush.bf16.msra.mxu1 %v1746_v0  ;;  %v1564_v36 = vunpack.c.l.b16 %v1431_v28  ;;  %v4499_v0 = vadd.f32 %v1912_v22, %v4433_v10 }
 0x629   : > { %v1914_v31 = vpop.f32.mrf.mxu2 }
 0x62a   : > { %v1565_v34 = vpack.c.b16 %v1564_v36, %v1563_v32  ;;  %v2013_v51 = vsel %vm651_vm2, %v4499_v0, -inf  ;;  %v2001_v32 = vsel %vm651_vm2, %v4504_v13, -inf }
 0x62b   : > { %v4489_v6 = vpop.permute.xlu2 %2286 }
 0x62c   : > { %v1984_v49 = vpop.f32.mrf.mxu3 }
 0x62d   : > { %v4515_v36 = vadd.f32 %v1984_v49, %v4433_v10 }
 0x62f   : > { %v2031_v22 = vsel %vm651_vm2, %v4515_v36, -inf }
 0x631   : > { %v1960_v56 = vpop.f32.mrf.mxu2 }
 0x632   : > { %v4510_v28 = vadd.f32 %v1960_v56, %v4433_v10  ;;  %v2022_v56 = vsel %vm651_vm2, %v4547_v29, -inf }
 0x633   : > { %v2484_v18 = vpop.permute.xlu2 %2483  ;;  %3343 = vmatmul.msk.bf16.vlgmr.msrb.gmra.mxu1 %vm651_vm2, %v1565_v34 }
 0x634   : > { %v2489_v15 = vsel %vm441_vm1, %v2484_v18, 0  ;;  %v2025_v58 = vsel %vm651_vm2, %v4510_v28, -inf  ;;  %v1986_v35 = vpop.f32.mrf.mxu3  ;;  %v2010_v18 = vsel %vm651_vm2, %v4518_v46, -inf }
 0x635   : > { %2498 = vmatpush.bf16.xpose.msrb.mxu1 %v2489_v15  ;;  %v4525_v34 = vadd.f32 %v1986_v35, %v4451_v17  ;;  %v4532_v15 = vadd.f32 %v1866_v41, %v4451_v17  ;;  %v4550_v41 = vpop.permute.xlu1 %2361  ;;  %v1047_v35 = vpack.c.bf16 %v4192_v62, %v4190_v59 }
 0x637   : > { %v2004_v49 = vsel %vm651_vm2, %v4532_v15, -inf }
 0x639   : > { %v1962_v11 = vpop.f32.mrf.mxu2 }
 0x63a   : > { %1990 = vmax.xlane.f32.xlu2 %v1989_v8  ;;  %v2034_v8 = vsel %vm651_vm2, %v4525_v34, -inf }
 0x63d   : > { %v4560_v3 = vpop.permute.xlu1 %2529 }
 0x642   : > { %2014 = vmax.xlane.f32.xlu2 %v2013_v51 }
 0x643   : > { %3354 = vmatmul.msk.bf16.vlgmr.msra.gmra.mxu1 %vm441_vm1, %v1044_v38  ;;  %v4540_v38 = vadd.f32 %v1936_v7, %v4433_v10  ;;  %v4555_v10 = vadd.f32 %v1914_v31, %v4451_v17 }
 0x645   : > { %v2019_v51 = vsel %vm651_vm2, %v4540_v38, -inf  ;;  %v2016_v27 = vsel %vm651_vm2, %v4555_v10, -inf }
 0x646   : > { %2002 = vmax.xlane.f32.xlu0 %v2001_v32 }
 0x64a   : > { %2026 = vmax.xlane.f32.xlu2 %v2025_v58 }
 0x64b   : > { %2032 = vmax.xlane.f32.xlu1 %v2031_v22  ;;  %v4565_v22 = vadd.f32 %v1962_v11, %v4451_v17 }
 0x64d   : > { %v2028_v31 = vsel %vm651_vm2, %v4565_v22, -inf }
 0x64e   : > { %2011 = vmax.xlane.f32.xlu0 %v2010_v18 }
 0x652   : > { %2035 = vmax.xlane.f32.xlu2 %v2034_v8  ;;  %v4571_v8 = vpop.permute.xlu1 %2336 }
 0x653   : > { %3355 = vmatmul.msk.bf16.gmra.mxu1 %vm441_vm1, %v1045_v50 }
 0x656   : > { %2005 = vmax.xlane.f32.xlu0 %v2004_v49 }
 0x65e   : > { %2020 = vmax.xlane.f32.xlu0 %v2019_v51  ;;  %v4583_v51 = vpop.permute.xlu1 %2507 }
 0x663   : > { %3356 = vmatmul.msk.bf16.gmra.mxu1 %vm441_vm1, %v1046_v45 }
 0x666   : > { %2023 = vmax.xlane.f32.xlu0 %v2022_v56  ;;  %v1049_v56 = vpack.c.bf16 %v4154_v16, %v4150_v23 }
 0x66b   : > { %v1997_v7 = vpop.xlane.xlu0 %1996 }
 0x66c   : > { %v2039_v32 = vsub.f32 %v4442_v52, %v1997_v7 }
 0x66e   : > { %2017 = vmax.xlane.f32.xlu0 %v2016_v27  ;;  %v2057_v58 = vmul.f32 1.442695, %v2039_v32  ;;  %v1050_v27 = vpack.c.bf16 %v4196_v4, %v4194_v61 }
 0x670   : > { %3557 = vpow2.f32 %v2057_v58 }
 0x673   : > { %v2000_v18 = vpop.xlane.xlu0 %1999  ;;  %3357 = vmatmul.msk.bf16.gmra.mxu1 %vm441_vm1, %v1047_v35 }
 0x674   : > { %v2040_v52 = vsub.f32 %v4454_v63, %v2000_v18  ;;  %v1048_v63 = vpack.c.bf16 %v4214_v42, %v4210_v55  ;;  %v4596_v55 = vpop.xlane.xlu2 %1248 }
 0x676   : > { %v2059_v50 = vmul.f32 1.442695, %v2040_v52  ;;  %2029 = vmax.xlane.f32.xlu0 %v2028_v31  ;;  %v4573_v49 = vpop.eup %3557 }
 0x677   : > { %v2091_v59 = vsel %vm651_vm2, %v4573_v49, 0.0 }
 0x678   : > { %3559 = vpow2.f32 %v2059_v50  ;;  %v5337_v50 = vld [vmem:[#allocation4_spill] sm:$0xff] }
 0x67b   : > { %v4586_v45 = vpop.xlane.xlu1 %2008  ;;  %v1994_v16 = vpop.xlane.xlu0 %1993 }
 0x67c   : > { %v4605_v23 = vpop.permute.xlu2 %2603  ;;  %v2038_v11 = vsub.f32 %v4461_v14, %v1994_v16 }
 0x67e   : > { %v4577_v62 = vpop.eup %3559  ;;  %2092 = vadd.xlane.f32.xlu0 %v2091_v59  ;;  %v2055_v35 = vmul.f32 1.442695, %v2038_v11  ;;  %v5338_v59 = vld [vmem:[#allocation5_spill] sm:$0xff] }
 0x67f   : > { %v2094_v17 = vsel %vm651_vm2, %v4577_v62, 0.0  ;;  %v1051_v61 = vpack.c.bf16 %v5338_v59, %v5337_v50 }
 0x680   : > { %2095 = vadd.xlane.f32.xlu1 %v2094_v17  ;;  %3561 = vpow2.f32 %v2055_v35 }
 0x683   : > { %3358 = vmatmul.msk.bf16.gmra.mxu1 %vm441_vm1, %v1048_v63 }
 0x686   : > { %v4618_v63 = vpop.eup %3561 }
 0x68e   : > { %v4613_v4 = vpop.permute.xlu0 %2601 }
 0x692   : > { %2579 = vrot.lane.b32.xlu0 %v3810_v48, %s3718_s27 }
 0x693   : > { %v2556_v7 = vpop.permute.xlu1 %2555  ;;  %3359 = vmatmul.msk.bf16.gmra.mxu1 %vm441_vm1, %v1049_v56 }
 0x694   : > { %v2561_v32 = vsel %vm441_vm1, %v2556_v7, 0  ;;  %v2088_v7 = vsel %vm651_vm2, %v4618_v63, 0.0 }
 0x695   : > { %2570 = vmatpush.bf16.xpose.msra.mxu1 %v2561_v32 }
 0x699   : > { %2505 = vrot.lane.b32.xlu1 %v3833_v12, %s3720_s29 }
 0x6a0   : > { %v4598_v42 = vpop.f32.mrf.mxu1 }
 0x6a1   : > { %2627 = vrot.lane.b32.xlu1 %v3828_v5, %s3718_s27 }
 0x6a3   : > { %3360 = vmatmul.msk.bf16.gmra.mxu1 %vm441_vm1, %v1050_v27 }
 0x6a8   : > { %v4608_v58 = vpop.f32.mrf.mxu1 }
 0x6ad   : > { %v1991_v18 = vpop.xlane.xlu2 %1990 }
 0x6ae   : > { %v2037_v52 = vsub.f32 %v4494_v40, %v1991_v18 }
 0x6b0   : > { %v2053_v31 = vmul.f32 1.442695, %v2037_v52  ;;  %v4616_v17 = vpop.f32.mrf.mxu1 }
 0x6b2   : > { %3563 = vpow2.f32 %v2053_v31 }
 0x6b3   : > { %3361 = vmatmul.msk.bf16.gmra.mxu1 %vm441_vm1, %v1051_v61 }
 0x6b8   : > { %v4620_v14 = vpop.eup %3563  ;;  %v4628_v32 = vpop.f32.mrf.mxu1 }
 0x6b9   : > { %v4622_v56 = vpop.xlane.xlu0 %2002  ;;  %v2085_v40 = vsel %vm651_vm2, %v4620_v14, 0.0 }
 0x6ba   : > { %2086 = vadd.xlane.f32.xlu2 %v2085_v40  ;;  %v4648_v40 = vpop.xlane.xlu2 %2014 }
 0x6bc   : > { %2089 = vadd.xlane.f32.xlu0 %v2088_v7 }
 0x6c0   : > { %v4633_v35 = vpop.f32.mrf.mxu1 }
 0x6c1   : > { %v2012_v27 = vpop.xlane.xlu0 %2011  ;;  %5339 = vst [vmem:[#allocation4_spill] sm:$0xff] %v4633_v35 }
 0x6c2   : > { %v2044_v16 = vsub.f32 %v4518_v46, %v2012_v27 }
 0x6c3   : > { %3386 = vmatmul.msk.bf16.vlgmr.msrb.gmra.mxu1 %vm441_vm1, %v4474_v21 }
 0x6c4   : > { %v2067_v11 = vmul.f32 1.442695, %v2044_v16 }
 0x6c6   : > { %3565 = vpow2.f32 %v2067_v11 }
 0x6c8   : > { %v4642_v46 = vpop.f32.mrf.mxu1 }
 0x6c9   : > { %v2006_v18 = vpop.xlane.xlu0 %2005  ;;  %5340 = vst [vmem:[#allocation5_spill] sm:$0xff] %v4642_v46 }
 0x6ca   : > { %v2042_v52 = vsub.f32 %v4532_v15, %v2006_v18  ;;  %v2027_v18 = vpop.xlane.xlu2 %2026 }
 0x6cb   : > { %v2049_v46 = vsub.f32 %v4510_v28, %v2027_v18 }
 0x6cc   : > { %v4636_v31 = vpop.eup %3565  ;;  %v2063_v50 = vmul.f32 1.442695, %v2042_v52 }
 0x6cd   : > { %v2106_v59 = vsel %vm651_vm2, %v4636_v31, 0.0 }
 0x6ce   : > { %3567 = vpow2.f32 %v2063_v50  ;;  %2107 = vadd.xlane.f32.xlu0 %v2106_v59 }
 0x6d0   : > { %v4653_v16 = vpop.f32.mrf.mxu1 }
 0x6d1   : > { %v4640_v61 = vpop.xlane.xlu0 %2020  ;;  %5341 = vst [vmem:[#allocation7_spill] sm:$0xff] %v4653_v16 }
 0x6d2   : > { %2553 = vrot.lane.b32.xlu2 %v3804_v39, %s3720_s29 }
 0x6d4   : > { %v4646_v21 = vpop.eup %3567 }
 0x6d5   : > { %v2100_v15 = vsel %vm651_vm2, %v4646_v21, 0.0 }
 0x6d6   : > { %2101 = vadd.xlane.f32.xlu0 %v2100_v15 }
 0x6d8   : > { %v4661_v15 = vpop.f32.mrf.mxu1 }
 0x6d9   : > { %v2024_v7 = vpop.xlane.xlu0 %2023  ;;  %5342 = vst [vmem:[#allocation8_spill] sm:$0xff] %v4661_v15 }
 0x6da   : > { %v2048_v27 = vsub.f32 %v4547_v29, %v2024_v7  ;;  %v2077_v29 = vmul.f32 1.442695, %v2049_v46  ;;  %v2036_v7 = vpop.xlane.xlu2 %2035 }
 0x6db   : > { %v2052_v16 = vsub.f32 %v4525_v34, %v2036_v7 }
 0x6dc   : > { %v2075_v11 = vmul.f32 1.442695, %v2048_v27  ;;  %v2043_v27 = vsub.f32 %v4464_v9, %v4586_v45  ;;  %v2041_v9 = vsub.f32 %v4504_v13, %v4622_v56 }
 0x6de   : > { %3569 = vpow2.f32 %v2075_v11  ;;  %v2061_v7 = vmul.f32 1.442695, %v2041_v9 }
 0x6e0   : > { %v4671_v46 = vpop.f32.mrf.mxu1 }
 0x6e1   : > { %v2018_v52 = vpop.xlane.xlu0 %2017  ;;  %5343 = vst [vmem:[#allocation9_spill] sm:$0xff] %v4671_v46 }
 0x6e2   : > { %v2046_v50 = vsub.f32 %v4555_v10, %v2018_v52  ;;  %v2033_v52 = vpop.xlane.xlu1 %2032 }
 0x6e4   : > { %v4656_v59 = vpop.eup %3569  ;;  %v2071_v35 = vmul.f32 1.442695, %v2046_v50  ;;  %v2065_v50 = vmul.f32 1.442695, %v2043_v27 }
 0x6e5   : > { %v2118_v44 = vsel %vm651_vm2, %v4656_v59, 0.0 }
 0x6e6   : > { %3571 = vpow2.f32 %v2071_v35  ;;  %2119 = vadd.xlane.f32.xlu0 %v2118_v44  ;;  %v2083_v44 = vmul.f32 1.442695, %v2052_v16 }
 0x6e7   : > { %3573 = vpow2.f32 %v2077_v29 }
 0x6e9   : > { %v2030_v11 = vpop.xlane.xlu0 %2029 }
 0x6ea   : > { %v2050_v10 = vsub.f32 %v4565_v22, %v2030_v11 }
 0x6ec   : > { %v4667_v28 = vpop.eup %3571  ;;  %v2079_v18 = vmul.f32 1.442695, %v2050_v10  ;;  %v2047_v10 = vsub.f32 %v4540_v38, %v4640_v61  ;;  %v2045_v61 = vsub.f32 %v4499_v0, %v4648_v40 }
 0x6ed   : > { %v2112_v35 = vsel %vm651_vm2, %v4667_v28, 0.0  ;;  %v4675_v45 = vpop.eup %3573 }
 0x6ee   : > { %3575 = vpow2.f32 %v2079_v18  ;;  %2113 = vadd.xlane.f32.xlu0 %v2112_v35  ;;  %v2121_v27 = vsel %vm651_vm2, %v4675_v45, 0.0  ;;  %v4690_v35 = vpop.f32.mrf.mxu1 }
 0x6ef   : > { %3577 = vpow2.f32 %v2065_v50  ;;  %5344 = vst [vmem:[#allocation10_spill] sm:$0xff] %v4690_v35 }
 0x6f1   : > { %v2093_v22 = vpop.xlane.xlu0 %2092 }
 0x6f2   : > { %3579 = vrcp.f32 %v2093_v22 }
 0x6f3   : > { %3581 = vpow2.f32 %v2083_v44  ;;  %v2096_v34 = vpop.xlane.xlu1 %2095 }
 0x6f4   : > { %v4677_v29 = vpop.eup %3575  ;;  %3583 = vrcp.f32 %v2096_v34  ;;  %v2073_v34 = vmul.f32 1.442695, %v2047_v10  ;;  %v2069_v10 = vmul.f32 1.442695, %v2045_v61 }
 0x6f5   : > { %v2124_v16 = vsel %vm651_vm2, %v4677_v29, 0.0  ;;  %v4683_v11 = vpop.eup %3577  ;;  %3585 = vpow2.f32 %v2061_v7 }
 0x6f6   : > { %2122 = vadd.xlane.f32.xlu0 %v2121_v27  ;;  %2125 = vadd.xlane.f32.xlu1 %v2124_v16  ;;  %v2103_v44 = vsel %vm651_vm2, %v4683_v11, 0.0  ;;  %3587 = vpow2.f32 %v2073_v34 }
 0x6f7   : > { %3589 = vpow2.f32 %v2069_v10 }
 0x6f8   : > { %v3580_v13 = vpop.eup %3579 }
 0x6f9   : > { %v4685_v56 = vpop.eup %3581  ;;  %v2151_v18 = vmul.f32 %v3580_v13, %v4573_v49 }
 0x6fa   : > { %v3584_v50 = vpop.eup %3583  ;;  %v2130_v7 = vsel %vm651_vm2, %v4685_v56, 0.0 }
 0x6fb   : > { %v2167_v9 = vpack.c.bf16 %v2151_v18, %v2151_v18  ;;  %v2152_v22 = vmul.f32 %v3584_v50, %v4577_v62  ;;  %2104 = vadd.xlane.f32.xlu2 %v2103_v44  ;;  %v4697_v16 = vpop.eup %3585  ;;  %v4704_v62 = vpop.f32.mrf.mxu1  ;;  %v2051_v44 = vsub.f32 %v4515_v36, %v2033_v52 }
 0x6fc   : > { %v2097_v18 = vsel %vm651_vm2, %v4697_v16, 0.0  ;;  %5345 = vst [vmem:[#allocation11_spill] sm:$0xff] %v4704_v62  ;;  %v4707_v50 = vpop.eup %3587 }
 0x6fd   : > { %v2168_v27 = vpack.c.bf16 %v2152_v22, %v2152_v22  ;;  %v2208_v38 = vunpack.c.l.b16 %v2167_v9  ;;  %v2115_v0 = vsel %vm651_vm2, %v4707_v50, 0.0  ;;  %v2081_v9 = vmul.f32 1.442695, %v2051_v44  ;;  %v4716_v34 = vpop.eup %3589 }
 0x6fe   : > { %2131 = vadd.xlane.f32.xlu0 %v2130_v7 }
 0x6ff   : > { %v2209_v49 = vunpack.c.l.b16 %v2168_v27  ;;  %3591 = vpow2.f32 %v2081_v9 }
 0x701   : > { %v2210_v13 = vpack.c.b16 %v2209_v49, %v2208_v38 }
 0x703   : > { %3371 = vmatmul.msk.bf16.vlgmr.msra.gmra.mxu3 %vm651_vm2, %v2210_v13  ;;  %2098 = vadd.xlane.f32.xlu2 %v2097_v18  ;;  %v4714_v22 = vpop.f32.mrf.mxu1  ;;  %v1293_v13 = vsub.f32 %v4437_v60, %v4596_v55 }
 0x704   : > { %2324 = vmatpush.bf16.msra.mxu3 %v4416_v2  ;;  %5346 = vst [vmem:[#allocation12_spill] sm:$0xff] %v4714_v22  ;;  %v2109_v2 = vsel %vm651_vm2, %v4716_v34, 0.0  ;;  %v4735_v61 = vpop.permute.xlu0 %2579 }
 0x705   : > { %v4725_v27 = vpop.eup %3591  ;;  %v1310_v44 = vmul.f32 1.442695, %v1293_v13 }
 0x706   : > { %v2127_v38 = vsel %vm651_vm2, %v4725_v27, 0.0 }
 0x70b   : > { %v4712_v40 = vpop.permute.xlu1 %2505  ;;  %2116 = vadd.xlane.f32.xlu2 %v2115_v0  ;;  %v4729_v7 = vpop.f32.mrf.mxu1 }
 0x70c   : > { %5347 = vst [vmem:[#allocation13_spill] sm:$0xff] %v4729_v7 }
 0x70f   : > { %2651 = vrot.lane.b32.xlu1 %v3838_v20, %s3718_s27 }
 0x712   : > { %2625 = vrot.lane.b32.xlu0 %v3828_v5, %s3720_s29 }
 0x713   : > { %v2628_v36 = vpop.permute.xlu1 %2627  ;;  %2110 = vadd.xlane.f32.xlu2 %v2109_v2  ;;  %v4733_v49 = vpop.f32.mrf.mxu1 }
 0x714   : > { %v2633_v52 = vsel %vm441_vm1, %v2628_v36, 0  ;;  %5348 = vst [vmem:[#allocation14_spill] sm:$0xff] %v4733_v49 }
 0x715   : > { %2642 = vmatpush.bf16.xpose.msrb.mxu1 %v2633_v52 }
 0x717   : > { %2649 = vrot.lane.b32.xlu1 %v3838_v20, %s3720_s29 }
 0x71b   : > { %2128 = vadd.xlane.f32.xlu2 %v2127_v38  ;;  %v4739_v18 = vpop.f32.mrf.mxu1 }
 0x71c   : > { %5349 = vst [vmem:[#allocation15_spill] sm:$0xff] %v4739_v18 }
 0x723   : > { %v4744_v38 = vpop.f32.mrf.mxu1 }
 0x724   : > { %5350 = vst [vmem:[#allocation16_spill] sm:$0xff] %v4744_v38 }
 0x72d   : > { %v2087_v10 = vpop.xlane.xlu2 %2086 }
 0x72e   : > { %3593 = vrcp.f32 %v2087_v10 }
 0x72f   : > { %v2090_v0 = vpop.xlane.xlu0 %2089 }
 0x730   : > { %3595 = vrcp.f32 %v2090_v0 }
 0x731   : > { %3597 = vpow2.f32 %v1310_v44 }
 0x733   : > { %2577 = vrot.lane.b32.xlu2 %v3810_v48, %s3720_s29  ;;  %s3265_s29 = sshll.u32 %s5379_s25, 3 }
 0x734   : > { %v3594_v9 = vpop.eup %3593  ;;  %s5240_s10 = scalar_lea.vmem %s5331_s6, %s3265_s29 }
 0x735   : > { %v2149_v2 = vmul.f32 %v3594_v9, %v4620_v14  ;;  %v2554_v36 = vpop.permute.xlu2 %2553  ;;  %v3701_v14 = vld [vmem:[%s5328_s3 + $0x10] sm:$0xff]  ;;  %v5351_v9 = vld [vmem:[#allocation2_spill] sm:$0xff] }
 0x736   : > { %v3596_v52 = vpop.eup %3595  ;;  %3389 = vmatmul.msk.bf16.vlgmr.msra.gmra.mxu1 %vm441_vm1, %v2554_v36  ;;  %v4756_v7 = vadd.f32 %v3701_v14, %v5351_v9  ;;  %v5356_v9 = vld [vmem:[#allocation3_spill] sm:$0xff] }
 0x737   : > { %v2165_v60 = vpack.c.bf16 %v2149_v2, %v2149_v2  ;;  %v2150_v55 = vmul.f32 %v3596_v52, %v4618_v63  ;;  %v4748_v13 = vpop.eup %3597  ;;  %v4759_v63 = vpop.f32.mrf.mxu1  ;;  %v1292_v52 = vsub.f32 %v4346_v26, %v4470_v54  ;;  %v3702_v54 = vld [vmem:[%s5328_s3 + $0x18] sm:$0xff] }
 0x738   : > { %v1343_v49 = vsel %vm651_vm2, %v4748_v13, 0.0  ;;  %5352 = vst [vmem:[#allocation2_spill] sm:$0xff] %v4759_v63  ;;  %v1268_v2 = vsel %vm651_vm2, %v4756_v7, -inf }
 0x739   : > { %v2183_v10 = vunpack.c.l.b16 %v2165_v60  ;;  %v2166_v0 = vpack.c.bf16 %v2150_v55, %v2150_v55 }
 0x73b   : > { %v2184_v44 = vunpack.c.l.b16 %v2166_v0  ;;  %v1308_v0 = vmul.f32 1.442695, %v1292_v52 }
 0x73c   : > { %1344 = vadd.xlane.f32.xlu0 %v1343_v49 }
 0x73d   : > { %v2185_v36 = vpack.c.b16 %v2184_v44, %v2183_v10  ;;  %3599 = vpow2.f32 %v1308_v0 }
 0x73f   : > { %3370 = vmatmul.msk.bf16.vlgmr.msra.gmra.mxu2 %vm651_vm2, %v2185_v36  ;;  %v4766_v60 = vpop.f32.mrf.mxu1  ;;  %v4782_v36 = vadd.f32 %v3702_v54, %v5356_v9 }
 0x740   : > { %2299 = vmatpush.bf16.msra.mxu2 %v4489_v6  ;;  %5353 = vst [vmem:[#allocation17_spill] sm:$0xff] %v4766_v60  ;;  %v4792_v60 = vld [vmem:[%s5328_s3 + $0x38] sm:$0xff] }
 0x741   : > { %1269 = vmax.xlane.f32.xlu1 %v1268_v2  ;;  %v2108_v55 = vpop.xlane.xlu0 %2107  ;;  %v1271_v2 = vsel %vm651_vm2, %v4782_v36, -inf }
 0x742   : > { %3601 = vrcp.f32 %v2108_v55 }
 0x743   : > { %v4772_v44 = vpop.eup %3599 }
 0x744   : > { %v1340_v6 = vsel %vm651_vm2, %v4772_v44, 0.0 }
 0x747   : > { %v4770_v49 = vpop.f32.mrf.mxu1 }
 0x748   : > { %5354 = vst [vmem:[#allocation18_spill] sm:$0xff] %v4770_v49 }
 0x749   : > { %v2102_v10 = vpop.xlane.xlu0 %2101 }
 0x74f   : > { %v4776_v14 = vpop.f32.mrf.mxu1 }
 0x750   : > { %1441 = vrot.lane.b32.xlu0 %v3792_v19, %s3715_s18  ;;  %5355 = vst [vmem:[#allocation19_spill] sm:$0xff] %v4776_v14 }
 0x757   : > { %v4786_v52 = vpop.f32.mrf.mxu1 }
 0x759   : > { %v2120_v26 = vpop.xlane.xlu0 %2119 }
 0x75c   : > { %1341 = vadd.xlane.f32.xlu2 %v1340_v6  ;;  %v3602_v6 = vpop.eup %3601 }
 0x75d   : > { %v2156_v14 = vmul.f32 %v3602_v6, %v4636_v31 }
 0x75f   : > { %v2502_v54 = vpop.f32.mrf.mxu1  ;;  %v2172_v38 = vpack.c.bf16 %v2156_v14, %v2156_v14 }
 0x761   : > { %v2114_v0 = vpop.xlane.xlu0 %2113 }
 0x764   : > { %1272 = vmax.xlane.f32.xlu2 %v1271_v2  ;;  %v4795_v2 = vadd.f32 %v2502_v54, %v4792_v60 }
 0x766   : > { %v2676_v31 = vsel %vm651_vm2, %v4795_v2, -inf }
 0x769   : > { %v2123_v9 = vpop.xlane.xlu0 %2122 }
 0x76e   : > { %v2105_v49 = vpop.xlane.xlu2 %2104 }
 0x76f   : > { %3603 = vrcp.f32 %v2105_v49 }
 0x770   : > { %3605 = vrcp.f32 %v2102_v10  ;;  %v2259_v10 = vunpack.c.l.b16 %v2172_v38 }
 0x771   : > { %v2132_v35 = vpop.xlane.xlu0 %2131 }
 0x775   : > { %v3604_v63 = vpop.eup %3603 }
 0x776   : > { %v2155_v55 = vmul.f32 %v3604_v63, %v4683_v11  ;;  %v2099_v18 = vpop.xlane.xlu2 %2098  ;;  %v3606_v15 = vpop.eup %3605 }
 0x777   : > { %3607 = vrcp.f32 %v2099_v18  ;;  %v2154_v6 = vmul.f32 %v3606_v15, %v4646_v21 }
 0x778   : > { %v2171_v49 = vpack.c.bf16 %v2155_v55, %v2155_v55  ;;  %3609 = vrcp.f32 %v2120_v26 }
 0x779   : > { %v2170_v46 = vpack.c.bf16 %v2154_v6, %v2154_v6 }
 0x77a   : > { %v2258_v22 = vunpack.c.l.b16 %v2171_v49  ;;  %2677 = vmax.xlane.f32.xlu0 %v2676_v31 }
 0x77b   : > { %v2234_v38 = vunpack.c.l.b16 %v2170_v46 }
 0x77c   : > { %v2260_v62 = vpack.c.b16 %v2259_v10, %v2258_v22 }
 0x77d   : > { %v3608_v54 = vpop.eup %3607 }
 0x77e   : > { %v2153_v14 = vmul.f32 %v3608_v54, %v4697_v16  ;;  %v2117_v11 = vpop.xlane.xlu2 %2116  ;;  %3373 = vmatmul.msk.bf16.vlgmr.msrb.gmra.mxu3 %vm651_vm2, %v2260_v62  ;;  %v3610_v18 = vpop.eup %3609 }
 0x77f   : > { %3611 = vrcp.f32 %v2117_v11  ;;  %2374 = vmatpush.bf16.msrb.mxu3 %v4550_v41  ;;  %v2160_v21 = vmul.f32 %v3610_v18, %v4656_v59 }
 0x780   : > { %v2169_v63 = vpack.c.bf16 %v2153_v14, %v2153_v14  ;;  %3613 = vrcp.f32 %v2114_v0  ;;  %v2126_v0 = vpop.xlane.xlu1 %2125 }
 0x781   : > { %v2176_v49 = vpack.c.bf16 %v2160_v21, %v2160_v21 }
 0x782   : > { %v2233_v15 = vunpack.c.l.b16 %v2169_v63 }
 0x783   : > { %v2309_v46 = vunpack.c.l.b16 %v2176_v49 }
 0x784   : > { %v2235_v26 = vpack.c.b16 %v2234_v38, %v2233_v15  ;;  %v2626_v22 = vpop.permute.xlu0 %2625 }
 0x785   : > { %v3612_v55 = vpop.eup %3611  ;;  %3392 = vmatmul.msk.bf16.vlgmr.msrb.gmra.mxu1 %vm441_vm1, %v2626_v22 }
 0x786   : > { %v2159_v16 = vmul.f32 %v3612_v55, %v4707_v50  ;;  %v2111_v31 = vpop.xlane.xlu2 %2110  ;;  %3372 = vmatmul.msk.bf16.vlgmr.msrb.gmra.mxu2 %vm651_vm2, %v2235_v26  ;;  %v3614_v62 = vpop.eup %3613  ;;  %v2537_v50 = vsel %vm441_vm1, %v4458_v53, 0  ;;  %v2513_v53 = vsel %vm441_vm1, %v4583_v51, 0 }
 0x787   : > { %3615 = vrcp.f32 %v2111_v31  ;;  %2349 = vmatpush.bf16.msrb.mxu2 %v4571_v8  ;;  %v2158_v59 = vmul.f32 %v3614_v62, %v4667_v28 }
 0x788   : > { %v2175_v41 = vpack.c.bf16 %v2159_v16, %v2159_v16  ;;  %3617 = vrcp.f32 %v2132_v35 }
 0x789   : > { %3619 = vrcp.f32 %v2126_v0  ;;  %v2174_v14 = vpack.c.bf16 %v2158_v59, %v2158_v59  ;;  %v2609_v59 = vsel %vm441_vm1, %v4605_v23, 0  ;;  %v2652_v0 = vpop.permute.xlu1 %2651 }
 0x78a   : > { %v2308_v10 = vunpack.c.l.b16 %v2175_v41  ;;  %3621 = vrcp.f32 %v2123_v9 }
 0x78b   : > { %v2284_v28 = vunpack.c.l.b16 %v2174_v14 }
 0x78c   : > { %v2310_v6 = vpack.c.b16 %v2309_v46, %v2308_v10 }
 0x78d   : > { %v3616_v54 = vpop.eup %3615 }
 0x78e   : > { %v2157_v11 = vmul.f32 %v3616_v54, %v4716_v34  ;;  %v2129_v18 = vpop.xlane.xlu2 %2128  ;;  %3375 = vmatmul.msk.bf16.vlgmr.msra.gmra.mxu3 %vm651_vm2, %v2310_v6  ;;  %v3618_v8 = vpop.eup %3617  ;;  %v2657_v54 = vsel %vm441_vm1, %v2652_v0, 0 }
 0x78f   : > { %3623 = vrcp.f32 %v2129_v18  ;;  %2546 = vmatpush.bf16.xpose.msra.mxu3 %v2537_v50  ;;  %v2164_v63 = vmul.f32 %v3618_v8, %v4685_v56  ;;  %v3620_v21 = vpop.eup %3619 }
 0x790   : > { %v2173_v35 = vpack.c.bf16 %v2157_v11, %v2157_v11  ;;  %v3622_v15 = vpop.eup %3621  ;;  %v2162_v55 = vmul.f32 %v3620_v21, %v4677_v29  ;;  %v2585_v29 = vsel %vm441_vm1, %v4735_v61, 0 }
 0x791   : > { %v2180_v9 = vpack.c.bf16 %v2164_v63, %v2164_v63  ;;  %v2161_v49 = vmul.f32 %v3622_v15, %v4675_v45  ;;  %v2650_v45 = vpop.permute.xlu1 %2649 }
 0x792   : > { %v2283_v38 = vunpack.c.l.b16 %v2173_v35  ;;  %v2178_v62 = vpack.c.bf16 %v2162_v55, %v2162_v55 }
 0x793   : > { %v2359_v56 = vunpack.c.l.b16 %v2180_v9  ;;  %v2177_v41 = vpack.c.bf16 %v2161_v49, %v2161_v49 }
 0x794   : > { %v2285_v26 = vpack.c.b16 %v2284_v28, %v2283_v38  ;;  %v2334_v51 = vunpack.c.l.b16 %v2178_v62  ;;  %v4868_v62 = vpop.f32.mrf.mxu3 }
 0x795   : > { %v3624_v22 = vpop.eup %3623 }
 0x796   : > { %v2163_v34 = vmul.f32 %v3624_v22, %v4725_v27  ;;  %3374 = vmatmul.msk.bf16.vlgmr.msra.gmra.mxu2 %vm651_vm2, %v2285_v26  ;;  %v2333_v27 = vunpack.c.l.b16 %v2177_v41  ;;  %v2578_v18 = vpop.permute.xlu2 %2577 }
 0x797   : > { %2522 = vmatpush.bf16.xpose.msra.mxu2 %v2513_v53 }
 0x798   : > { %v2179_v16 = vpack.c.bf16 %v2163_v34, %v2163_v34  ;;  %v2335_v10 = vpack.c.b16 %v2334_v51, %v2333_v27 }
 0x79a   : > { %v2358_v31 = vunpack.c.l.b16 %v2179_v16 }
 0x79c   : > { %v2360_v46 = vpack.c.b16 %v2359_v56, %v2358_v31 }
 0x79e   : > { %3377 = vmatmul.msk.bf16.vlgmr.msrb.gmra.mxu3 %vm651_vm2, %v2360_v46 }
 0x79f   : > { %2618 = vmatpush.bf16.xpose.msrb.mxu3 %v2609_v59  ;;  %v4875_v59 = vpop.f32.mrf.mxu3 }
 0x7a6   : > { %3376 = vmatmul.msk.bf16.vlgmr.msrb.gmra.mxu2 %vm651_vm2, %v2335_v10 }
 0x7a7   : > { %2594 = vmatpush.bf16.xpose.msrb.mxu2 %v2585_v29 }
 0x7ae   : > { %3388 = vmatmul.msk.bf16.vlgmr.msra.gmra.mxu3 %vm441_vm1, %v4560_v3 }
 0x7af   : > { %v1345_v14 = vpop.xlane.xlu0 %1344 }
 0x7b3   : > { %v2572_v49 = vpop.f32.mrf.mxu1 }
 0x7b4   : > { %v1270_v6 = vpop.xlane.xlu1 %1269 }
 0x7b5   : > { %v1300_v23 = vsub.f32 %v4756_v7, %v1270_v6 }
 0x7b6   : > { %3387 = vmatmul.msk.bf16.vlgmr.msra.gmra.mxu2 %vm441_vm1, %v4712_v40 }
 0x7b7   : > { %v1324_v50 = vmul.f32 1.442695, %v1300_v23  ;;  %2666 = vmatpush.bf16.xpose.msra.mxu2 %v2657_v54 }
 0x7b9   : > { %3625 = vpow2.f32 %v1324_v50 }
 0x7ba   : > { %3627 = vrcp.f32 %v1345_v14 }
 0x7bb   : > { %v2574_v31 = vpop.f32.mrf.mxu1 }
 0x7bc   : > { %v4871_v41 = vadd.f32 %v2574_v31, %v4792_v60 }
 0x7be   : > { %3391 = vmatmul.msk.bf16.vlgmr.msrb.gmra.mxu3 %vm441_vm1, %v4613_v4  ;;  %v2694_v46 = vsel %vm651_vm2, %v4871_v41, -inf }
 0x7bf   : > { %v4835_v61 = vpop.eup %3625 }
 0x7c0   : > { %v1364_v3 = vsel %vm651_vm2, %v4835_v61, 0.0  ;;  %v3628_v35 = vpop.eup %3627 }
 0x7c1   : > { %1365 = vadd.xlane.f32.xlu2 %v1364_v3  ;;  %v1405_v28 = vmul.f32 %v3628_v35, %v4748_v13 }
 0x7c2   : > { %v4839_v11 = vpop.f32.mrf.mxu2  ;;  %v1442_v7 = vpop.permute.xlu0 %1441 }
 0x7c3   : > { %1454 = vmatpush.bf16.msrb.mxu0 %v1442_v7  ;;  %v1421_v38 = vpack.c.bf16 %v1405_v28, %v1405_v28 }
 0x7c5   : > { %v1439_v9 = vunpack.c.l.b16 %v1421_v38 }
 0x7c6   : > { %3390 = vmatmul.msk.bf16.vlgmr.msrb.gmra.mxu2 %vm441_vm1, %v2578_v18 }
 0x7ca   : > { %v4842_v40 = vpop.f32.mrf.mxu2 }
 0x7cb   : > { %v2381_v8 = vpack.c.bf16 %v4842_v40, %v4839_v11 }
 0x7cf   : > { %v1342_v4 = vpop.xlane.xlu2 %1341 }
 0x7d0   : > { %3629 = vrcp.f32 %v1342_v4 }
 0x7d6   : > { %v3630_v63 = vpop.eup %3629  ;;  %3393 = vmatmul.msk.bf16.vlgmr.msra.gmra.mxu2 %vm441_vm1, %v2650_v45 }
 0x7d7   : > { %v1404_v21 = vmul.f32 %v3630_v63, %v4772_v44  ;;  %v1273_v15 = vpop.xlane.xlu2 %1272 }
 0x7d8   : > { %v1301_v26 = vsub.f32 %v4782_v36, %v1273_v15  ;;  %v4860_v36 = vld [vmem:[%s5328_s3 + $0x30] sm:$0xff] }
 0x7d9   : > { %v1420_v22 = vpack.c.bf16 %v1404_v21, %v1404_v21  ;;  %1541 = vrot.lane.b32.xlu2 %v3810_v48, %s3715_s18  ;;  %v4864_v16 = vadd.f32 %v4786_v52, %v4860_v36  ;;  %v4879_v27 = vadd.f32 %v2572_v49, %v4860_v36 }
 0x7da   : > { %v1326_v53 = vmul.f32 1.442695, %v1301_v26 }
 0x7db   : > { %v1438_v34 = vunpack.c.l.b16 %v1420_v22  ;;  %v2673_v56 = vsel %vm651_vm2, %v4864_v16, -inf  ;;  %v2691_v10 = vsel %vm651_vm2, %v4879_v27, -inf }
 0x7dc   : > { %3631 = vpow2.f32 %v1326_v53 }
 0x7dd   : > { %v1440_v55 = vpack.c.b16 %v1439_v9, %v1438_v34 }
 0x7df   : > { %3338 = vmatmul.msk.bf16.vlgmr.msrb.gmra.mxu0 %vm651_vm2, %v1440_v55 }
 0x7e2   : > { %v4853_v13 = vpop.eup %3631 }
 0x7e3   : > { %v1367_v44 = vsel %vm651_vm2, %v4853_v13, 0.0 }
 0x7e4   : > { %1368 = vadd.xlane.f32.xlu1 %v1367_v44 }
 0x7ec   : > { %2674 = vmax.xlane.f32.xlu1 %v2673_v56 }
 0x7ed   : > { %v2678_v51 = vpop.xlane.xlu0 %2677 }
 0x7ee   : > { %v2722_v52 = vsub.f32 %v4795_v2, %v2678_v51 }
 0x7f0   : > { %v2739_v0 = vmul.f32 1.442695, %v2722_v52 }
 0x7f2   : > { %3633 = vpow2.f32 %v2739_v0 }
 0x7f4   : > { %2695 = vmax.xlane.f32.xlu1 %v2694_v46 }
 0x7f8   : > { %v4894_v50 = vpop.eup %3633 }
 0x7f9   : > { %v2772_v4 = vsel %vm651_vm2, %v4894_v50, 0.0 }
 0x801   : > { %v4883_v29 = vpop.f32.mrf.mxu3 }
 0x802   : > { %2692 = vmax.xlane.f32.xlu2 %v2691_v10  ;;  %v2644_v45 = vpop.f32.mrf.mxu1 }
 0x803   : > { %v4886_v6 = vadd.f32 %v2644_v45, %v4860_v36 }
 0x805   : > { %v2709_v23 = vsel %vm651_vm2, %v4886_v6, -inf }
 0x806   : > { %2710 = vmax.xlane.f32.xlu0 %v2709_v23 }
 0x809   : > { %v4890_v2 = vpop.f32.mrf.mxu2  ;;  %v4892_v54 = vpop.f32.mrf.mxu3 }
 0x80a   : > { %v2384_v14 = vpack.c.bf16 %v4892_v54, %v4883_v29  ;;  %v2646_v3 = vpop.f32.mrf.mxu1 }
 0x80b   : > { %v4899_v7 = vadd.f32 %v2646_v3, %v4792_v60  ;;  %v415_v3 = vld [vmem:[%s5329_s4 + $0x4] sm:$0xf] }
 0x80d   : > { %v2712_v18 = vsel %vm651_vm2, %v4899_v7, -inf }
 0x80e   : > { %2713 = vmax.xlane.f32.xlu1 %v2712_v18  ;;  %2773 = vadd.xlane.f32.xlu0 %v2772_v4  ;;  %v1670_v18 = vsel %vm1668_vm3, %v415_v3, 0 }
 0x811   : > { %v4905_v35 = vpop.f32.mrf.mxu2  ;;  %v4907_v28 = vpop.f32.mrf.mxu3 }
 0x812   : > { %v2383_v63 = vpack.c.bf16 %v4905_v35, %v4890_v2 }
 0x819   : > { %v4911_v38 = vpop.f32.mrf.mxu2  ;;  %v4913_v21 = vpop.f32.mrf.mxu3 }
 0x821   : > { %v4917_v26 = vpop.f32.mrf.mxu2  ;;  %v4919_v22 = vpop.f32.mrf.mxu3 }
 0x829   : > { %v4923_v9 = vpop.f32.mrf.mxu2  ;;  %v4925_v34 = vpop.f32.mrf.mxu3 }
 0x831   : > { %v4929_v49 = vpop.f32.mrf.mxu2 }
 0x834   : > { %v1366_v56 = vpop.xlane.xlu2 %1365 }
 0x835   : > { %3635 = vrcp.f32 %v1366_v56 }
 0x839   : > { %v2524_v31 = vpop.f32.mrf.mxu2 }
 0x83a   : > { %v4934_v46 = vadd.f32 %v2524_v31, %v4860_v36 }
 0x83b   : > { %v3636_v31 = vpop.eup %3635 }
 0x83c   : > { %v1542_v51 = vpop.permute.xlu2 %1541  ;;  %v2679_v52 = vsel %vm651_vm2, %v4934_v46, -inf }
 0x83d   : > { %1554 = vmatpush.bf16.msra.mxu0 %v1542_v51  ;;  %2680 = vmax.xlane.f32.xlu0 %v2679_v52  ;;  %v1412_v51 = vmul.f32 %v3636_v31, %v4835_v61  ;;  %v2548_v31 = vpop.f32.mrf.mxu3 }
 0x841   : > { %v2526_v0 = vpop.f32.mrf.mxu2  ;;  %1679 = vmatpush.bf16.msrb.mxu0 %v1670_v18 }
 0x849   : > { %v2596_v10 = vpop.f32.mrf.mxu2 }
 0x84a   : > { %v4939_v45 = vadd.f32 %v2596_v10, %v4860_v36  ;;  %v1428_v10 = vpack.c.bf16 %v1412_v51, %v1412_v51 }
 0x84c   : > { %v2697_v23 = vsel %vm651_vm2, %v4939_v45, -inf  ;;  %v1538_v3 = vunpack.c.l.b16 %v1428_v10 }
 0x84d   : > { %2698 = vmax.xlane.f32.xlu0 %v2697_v23 }
 0x857   : > { %v1369_v4 = vpop.xlane.xlu1 %1368 }
 0x858   : > { %3637 = vrcp.f32 %v1369_v4 }
 0x85c   : > { %v1456_v61 = vpop.f32.mrf.mxu0 }
 0x85e   : > { %v3638_v52 = vpop.eup %3637 }
 0x85f   : > { %v1413_v55 = vmul.f32 %v3638_v52, %v4853_v13  ;;  %v2675_v44 = vpop.xlane.xlu1 %2674 }
 0x860   : > { %v2721_v23 = vsub.f32 %v4864_v16, %v2675_v44  ;;  %v4958_v16 = vadd.f32 %v2548_v31, %v4860_v36  ;;  %v2550_v44 = vpop.f32.mrf.mxu3 }
 0x861   : > { %v1429_v56 = vpack.c.bf16 %v1413_v55, %v1413_v55  ;;  %2920 = vrot.lane.b32.xlu0 %v3798_v30, %s3721_s23  ;;  %v4964_v10 = vadd.f32 %v2550_v44, %v4792_v60 }
 0x862   : > { %v2737_v15 = vmul.f32 1.442695, %v2721_v23  ;;  %v2685_v30 = vsel %vm651_vm2, %v4958_v16, -inf }
 0x863   : > { %v1539_v18 = vunpack.c.l.b16 %v1429_v56 }
 0x864   : > { %3639 = vpow2.f32 %v2737_v15  ;;  %v1458_v55 = vpop.f32.mrf.mxu0 }
 0x865   : > { %v1540_v53 = vpack.c.b16 %v1539_v18, %v1538_v3  ;;  %v1636_v15 = vpack.c.bf16 %v1458_v55, %v1456_v61  ;;  %v2598_v3 = vpop.f32.mrf.mxu2  ;;  %v2688_v18 = vsel %vm651_vm2, %v4964_v10, -inf }
 0x867   : > { %3342 = vmatmul.msk.bf16.vlgmr.msra.gmra.mxu0 %vm651_vm2, %v1540_v53  ;;  %v2696_v51 = vpop.xlane.xlu1 %2695 }
 0x868   : > { %v2728_v23 = vsub.f32 %v4871_v41, %v2696_v51  ;;  %v1637_v51 = vpack.c.bf16 %v4608_v58, %v4598_v42 }
 0x86a   : > { %v4953_v4 = vpop.eup %3639  ;;  %v2751_v31 = vmul.f32 1.442695, %v2728_v23 }
 0x86b   : > { %v2769_v13 = vsel %vm651_vm2, %v4953_v4, 0.0 }
 0x86c   : > { %2770 = vadd.xlane.f32.xlu1 %v2769_v13  ;;  %v4971_v13 = vadd.f32 %v2526_v0, %v4792_v60 }
 0x86d   : > { %v2668_v44 = vpop.f32.mrf.mxu2 }
 0x874   : > { %2686 = vmax.xlane.f32.xlu1 %v2685_v30  ;;  %v2620_v30 = vpop.f32.mrf.mxu3 }
 0x875   : > { %v2693_v53 = vpop.xlane.xlu2 %2692 }
 0x876   : > { %v2727_v52 = vsub.f32 %v4879_v27, %v2693_v53 }
 0x877   : > { %3346 = vmatmul.msk.bf16.vlgmr.msrb.gmra.mxu0 %vm441_vm1, %v1636_v15  ;;  %v2682_v15 = vsel %vm651_vm2, %v4971_v13, -inf }
 0x878   : > { %v2749_v56 = vmul.f32 1.442695, %v2727_v52  ;;  %v4985_v52 = vadd.f32 %v2668_v44, %v4860_v36 }
 0x879   : > { %v2711_v61 = vpop.xlane.xlu0 %2710 }
 0x87a   : > { %3641 = vpow2.f32 %v2749_v56  ;;  %v2733_v55 = vsub.f32 %v4886_v6, %v2711_v61  ;;  %v4988_v6 = vadd.f32 %v2620_v30, %v4860_v36  ;;  %v2715_v56 = vsel %vm651_vm2, %v4985_v52, -inf }
 0x87b   : > { %3643 = vpow2.f32 %v2751_v31 }
 0x87c   : > { %2689 = vmax.xlane.f32.xlu1 %v2688_v18  ;;  %v2761_v0 = vmul.f32 1.442695, %v2733_v55  ;;  %v2703_v42 = vsel %vm651_vm2, %v4988_v6, -inf  ;;  %v2622_v58 = vpop.f32.mrf.mxu3  ;;  %v4998_v18 = vadd.f32 %v2598_v3, %v4792_v60  ;;  %v2670_v55 = vpop.f32.mrf.mxu2  ;;  %v1638_v3 = vpack.c.bf16 %v4422_v47, %v4420_v25 }
 0x87d   : > { %v5003_v31 = vadd.f32 %v2622_v58, %v4792_v60  ;;  %v5014_v44 = vadd.f32 %v2670_v55, %v4792_v60 }
 0x87e   : > { %3645 = vpow2.f32 %v2761_v0  ;;  %v2700_v61 = vsel %vm651_vm2, %v4998_v18, -inf }
 0x87f   : > { %v2706_v30 = vsel %vm651_vm2, %v5003_v31, -inf }
 0x880   : > { %v4973_v27 = vpop.eup %3641 }
 0x881   : > { %v2787_v41 = vsel %vm651_vm2, %v4973_v27, 0.0  ;;  %v4982_v53 = vpop.eup %3643  ;;  %v5024_v0 = vpop.xlane.xlu0 %2773 }
 0x882   : > { %2788 = vadd.xlane.f32.xlu2 %v2787_v41  ;;  %v2790_v23 = vsel %vm651_vm2, %v4982_v53, 0.0 }
 0x884   : > { %2683 = vmax.xlane.f32.xlu1 %v2682_v15  ;;  %v5000_v36 = vpop.eup %3645  ;;  %v2718_v15 = vsel %vm651_vm2, %v5014_v44, -inf }
 0x885   : > { %v2805_v41 = vsel %vm651_vm2, %v5000_v36, 0.0 }
 0x887   : > { %3347 = vmatmul.msk.bf16.gmra.mxu0 %vm441_vm1, %v1637_v51  ;;  %v1639_v51 = vpack.c.bf16 %v4418_v37, %v4414_v33  ;;  %v2714_v37 = vpop.xlane.xlu1 %2713 }
 0x88a   : > { %2791 = vadd.xlane.f32.xlu2 %v2790_v23 }
 0x88b   : > { %2716 = vmax.xlane.f32.xlu0 %v2715_v56 }
 0x88c   : > { %2704 = vmax.xlane.f32.xlu1 %v2703_v42 }
 0x892   : > { %2701 = vmax.xlane.f32.xlu2 %v2700_v61 }
 0x893   : > { %2806 = vadd.xlane.f32.xlu0 %v2805_v41 }
 0x894   : > { %2707 = vmax.xlane.f32.xlu1 %v2706_v30 }
 0x897   : > { %3348 = vmatmul.msk.bf16.gmra.mxu0 %vm441_vm1, %v1638_v3 }
 0x89a   : > { %2719 = vmax.xlane.f32.xlu2 %v2718_v15 }
 0x8a7   : > { %3349 = vmatmul.msk.bf16.gmra.mxu0 %vm441_vm1, %v1639_v51 }
 0x8ad   : > { %2870 = vrot.lane.b32.xlu1 %v3792_v19, %s3721_s23 }
 0x8b0   : > { %v2681_v25 = vpop.xlane.xlu0 %2680 }
 0x8c0   : > { %v2699_v47 = vpop.xlane.xlu0 %2698 }
 0x8c1   : > { %v2729_v60 = vsub.f32 %v4939_v45, %v2699_v47  ;;  %v2723_v47 = vsub.f32 %v4934_v46, %v2681_v25  ;;  %v1641_v46 = vpack.c.bf16 %v4628_v32, %v4616_v17 }
 0x8c3   : > { %v2753_v23 = vmul.f32 1.442695, %v2729_v60 }
 0x8c5   : > { %3647 = vpow2.f32 %v2753_v23 }
 0x8cb   : > { %v5027_v56 = vpop.eup %3647 }
 0x8cc   : > { %v2793_v42 = vsel %vm651_vm2, %v5027_v56, 0.0 }
 0x8cd   : > { %2794 = vadd.xlane.f32.xlu0 %v2793_v42  ;;  %v2741_v42 = vmul.f32 1.442695, %v2723_v47 }
 0x8d3   : > { %v2921_v33 = vpop.permute.xlu0 %2920 }
 0x8d4   : > { %2933 = vmatpush.bf16.msrb.mxu2 %v2921_v33 }
 0x8df   : > { %v2771_v58 = vpop.xlane.xlu1 %2770 }
 0x8e4   : > { %v1556_v61 = vpop.f32.mrf.mxu0 }
 0x8e7   : > { %v2687_v19 = vpop.xlane.xlu1 %2686 }
 0x8e8   : > { %v2725_v55 = vsub.f32 %v4958_v16, %v2687_v19  ;;  %v2734_v19 = vsub.f32 %v4899_v7, %v2714_v37 }
 0x8ea   : > { %v2745_v41 = vmul.f32 1.442695, %v2725_v55 }
 0x8ec   : > { %3649 = vpow2.f32 %v2745_v41  ;;  %v1558_v30 = vpop.f32.mrf.mxu0  ;;  %v2763_v41 = vmul.f32 1.442695, %v2734_v19 }
 0x8ed   : > { %v1640_v45 = vpack.c.bf16 %v1558_v30, %v1556_v61 }
 0x8ef   : > { %v2690_v3 = vpop.xlane.xlu1 %2689  ;;  %3350 = vmatmul.msk.bf16.gmra.mxu0 %vm441_vm1, %v1640_v45 }
 0x8f0   : > { %v2726_v15 = vsub.f32 %v4964_v10, %v2690_v3 }
 0x8f2   : > { %v5034_v51 = vpop.eup %3649  ;;  %v2747_v60 = vmul.f32 1.442695, %v2726_v15 }
 0x8f3   : > { %v2781_v23 = vsel %vm651_vm2, %v5034_v51, 0.0 }
 0x8f4   : > { %3651 = vpow2.f32 %v2747_v60  ;;  %2782 = vadd.xlane.f32.xlu2 %v2781_v23 }
 0x8f5   : > { %v2789_v16 = vpop.xlane.xlu2 %2788 }
 0x8f6   : > { %3653 = vrcp.f32 %v2789_v16 }
 0x8f7   : > { %v5039_v33 = vpop.xlane.xlu1 %2683  ;;  %3655 = vpow2.f32 %v2741_v42 }
 0x8fa   : > { %v5041_v61 = vpop.eup %3651 }
 0x8fb   : > { %v2784_v10 = vsel %vm651_vm2, %v5041_v61, 0.0 }
 0x8fc   : > { %2785 = vadd.xlane.f32.xlu1 %v2784_v10  ;;  %v3654_v55 = vpop.eup %3653 }
 0x8fd   : > { %v2792_v25 = vpop.xlane.xlu2 %2791  ;;  %v5051_v45 = vpop.eup %3655  ;;  %v2839_v7 = vmul.f32 %v3654_v55, %v4973_v27 }
 0x8fe   : > { %3657 = vrcp.f32 %v2792_v25  ;;  %v2775_v37 = vsel %vm651_vm2, %v5051_v45, 0.0  ;;  %v2717_v23 = vpop.xlane.xlu0 %2716 }
 0x8ff   : > { %v5048_v30 = vpop.xlane.xlu1 %2704  ;;  %3351 = vmatmul.msk.bf16.gmra.mxu0 %vm441_vm1, %v1641_v46  ;;  %3659 = vpow2.f32 %v2763_v41  ;;  %v2855_v15 = vpack.c.bf16 %v2839_v7, %v2839_v7  ;;  %v2735_v25 = vsub.f32 %v4985_v52, %v2717_v23  ;;  %v1642_v52 = vpack.c.bf16 %v4439_v1, %v4426_v43  ;;  %v5357_v23 = vld [vmem:[#allocation6_spill] sm:$0xff] }
 0x901   : > { %v5061_v10 = vunpack.c.l.b16 %v2855_v15  ;;  %v2765_v41 = vmul.f32 1.442695, %v2735_v25 }
 0x904   : > { %v3658_v3 = vpop.eup %3657  ;;  %2776 = vadd.xlane.f32.xlu1 %v2775_v37 }
 0x905   : > { %v2840_v17 = vmul.f32 %v3658_v3, %v4982_v53  ;;  %v2702_v32 = vpop.xlane.xlu2 %2701  ;;  %v5058_v42 = vpop.eup %3659 }
 0x906   : > { %v2730_v47 = vsub.f32 %v4998_v18, %v2702_v32  ;;  %v2808_v18 = vsel %vm651_vm2, %v5058_v42, 0.0 }
 0x907   : > { %v2856_v60 = vpack.c.bf16 %v2840_v17, %v2840_v17  ;;  %v2708_v16 = vpop.xlane.xlu1 %2707 }
 0x908   : > { %v2755_v19 = vmul.f32 1.442695, %v2730_v47  ;;  %v2732_v27 = vsub.f32 %v5003_v31, %v2708_v16  ;;  %v416_v31 = vld [vmem:[%s5329_s4 + $0x8] sm:$0xf] }
 0x909   : > { %v5063_v46 = vunpack.c.l.b16 %v2856_v60 }
 0x90a   : > { %3661 = vpow2.f32 %v2755_v19  ;;  %v2759_v55 = vmul.f32 1.442695, %v2732_v27  ;;  %v5100_v19 = vpop.f32.mrf.mxu0 }
 0x90b   : > { %3663 = vrcp.f32 %v2771_v58  ;;  %v2944_v53 = vpack.c.b16 %v5063_v46, %v5061_v10  ;;  %v2414_v58 = vsel %vm1668_vm3, %v416_v31, 0  ;;  %v5359_v10 = vpack.c.bf16 %v4913_v21, %v4907_v28 }
 0x90c   : > { %3665 = vpow2.f32 %v2759_v55  ;;  %2945 = vrot.lane.b32.xlu2 %v3804_v39, %s3721_s23  ;;  %2809 = vadd.xlane.f32.xlu1 %v2808_v18  ;;  %v2731_v18 = vsub.f32 %v4988_v6, %v5048_v30  ;;  %v5360_v28 = vpack.c.bf16 %v4929_v49, %v4923_v9 }
 0x90d   : > { %3667 = vrcp.f32 %v5024_v0  ;;  %2423 = vmatpush.bf16.msra.mxu0 %v2414_v58  ;;  %v5358_v58 = vpack.c.bf16 %v4917_v26, %v4911_v38 }
 0x90e   : > { %3669 = vpow2.f32 %v2765_v41  ;;  %v2757_v11 = vmul.f32 1.442695, %v2731_v18 }
 0x90f   : > { %3352 = vmatmul.msk.bf16.gmra.mxu0 %vm441_vm1, %v1642_v52 }
 0x910   : > { %v5080_v7 = vpop.eup %3661 }
 0x911   : > { %v3664_v37 = vpop.eup %3663  ;;  %v2796_v3 = vsel %vm651_vm2, %v5080_v7, 0.0 }
 0x912   : > { %v5082_v39 = vpop.eup %3665  ;;  %v2833_v0 = vmul.f32 %v3664_v37, %v4953_v4  ;;  %v5104_v25 = vpop.f32.mrf.mxu0 }
 0x913   : > { %v2802_v43 = vsel %vm651_vm2, %v5082_v39, 0.0  ;;  %v3668_v1 = vpop.eup %3667 }
 0x914   : > { %2995 = vrot.lane.b32.xlu2 %v3818_v57, %s3721_s23  ;;  %2797 = vadd.xlane.f32.xlu1 %v2796_v3  ;;  %v2834_v15 = vmul.f32 %v3668_v1, %v4894_v50  ;;  %v5092_v17 = vpop.eup %3669  ;;  %v2849_v32 = vpack.c.bf16 %v2833_v0, %v2833_v0  ;;  %v1643_v57 = vpack.c.bf16 %v5357_v23, %v4424_v24 }
 0x915   : > { %2803 = vadd.xlane.f32.xlu0 %v2802_v43  ;;  %v2811_v60 = vsel %vm651_vm2, %v5092_v17, 0.0  ;;  %v2724_v24 = vsub.f32 %v4971_v13, %v5039_v33  ;;  %v2720_v33 = vpop.xlane.xlu2 %2719 }
 0x916   : > { %v2850_v47 = vpack.c.bf16 %v2834_v15, %v2834_v15  ;;  %v2867_v16 = vunpack.c.l.b16 %v2849_v32  ;;  %v2736_v1 = vsub.f32 %v5014_v44, %v2720_v33 }
 0x917   : > { %v2743_v55 = vmul.f32 1.442695, %v2724_v24 }
 0x918   : > { %v2868_v4 = vunpack.c.l.b16 %v2850_v47  ;;  %v2767_v46 = vmul.f32 1.442695, %v2736_v1 }
 0x919   : > { %3671 = vpow2.f32 %v2743_v55 }
 0x91a   : > { %v2869_v50 = vpack.c.b16 %v2868_v4, %v2867_v16  ;;  %3673 = vpow2.f32 %v2757_v11  ;;  %v5361_v4 = vpack.c.bf16 %v4925_v34, %v4919_v22  ;;  %v5362_v22 = vld [vmem:[#allocation7_spill] sm:$0xff] }
 0x91c   : > { %2895 = vrot.lane.b32.xlu2 %v3833_v12, %s3721_s23  ;;  %2812 = vadd.xlane.f32.xlu1 %v2811_v60  ;;  %v5112_v12 = vpop.f32.mrf.mxu0 }
 0x91d   : > { %v1763_v34 = vadd.f32 %v5362_v22, %v5112_v12 }
 0x91f   : > { %v2871_v27 = vpop.permute.xlu1 %2870  ;;  %3353 = vmatmul.msk.bf16.gmra.mxu0 %vm441_vm1, %v1643_v57  ;;  %v5125_v40 = vpop.eup %3671 }
 0x920   : > { %2883 = vmatpush.bf16.msra.mxu3 %v2871_v27  ;;  %v5131_v13 = vpop.eup %3673 }
 0x921   : > { %v2799_v6 = vsel %vm651_vm2, %v5131_v13, 0.0 }
 0x923   : > { %3394 = vmatmul.msk.bf16.vlgmr.msra.gmra.mxu3 %vm651_vm2, %v2869_v50 }
 0x924   : > { %v5120_v31 = vpop.f32.mrf.mxu0 }
 0x929   : > { %2970 = vrot.lane.b32.xlu0 %v3810_v48, %s3721_s23  ;;  %v2382_v48 = vpack.c.bf16 %v4875_v59, %v4868_v62 }
 0x92f   : > { %3378 = vmatmul.msk.bf16.vlgmr.msra.gmra.mxu0 %vm441_vm1, %v2381_v8  ;;  %v2778_v8 = vsel %vm651_vm2, %v5125_v40, 0.0 }
 0x935   : > { %3045 = vrot.lane.b32.xlu1 %v3838_v20, %s3721_s23  ;;  %v5129_v20 = vpop.f32.mrf.mxu0 }
 0x93d   : > { %v5139_v62 = vpop.f32.mrf.mxu0 }
 0x93f   : > { %3379 = vmatmul.msk.bf16.gmra.mxu0 %vm441_vm1, %v2382_v48 }
 0x945   : > { %2779 = vadd.xlane.f32.xlu2 %v2778_v8  ;;  %v5141_v59 = vpop.f32.mrf.mxu0 }
 0x94d   : > { %2800 = vadd.xlane.f32.xlu2 %v2799_v6  ;;  %v5147_v30 = vpop.f32.mrf.mxu0 }
 0x94f   : > { %3380 = vmatmul.msk.bf16.gmra.mxu0 %vm441_vm1, %v2383_v63 }
 0x95f   : > { %3381 = vmatmul.msk.bf16.gmra.mxu0 %vm441_vm1, %v2384_v14 }
 0x965   : > { %3020 = vrot.lane.b32.xlu2 %v3828_v5, %s3721_s23 }
 0x967   : > { %v2783_v52 = vpop.xlane.xlu2 %2782 }
 0x968   : > { %3675 = vrcp.f32 %v2783_v52 }
 0x96c   : > { %v5151_v2 = vpop.f32.mrf.mxu0 }
 0x96e   : > { %v3676_v41 = vpop.eup %3675 }
 0x96f   : > { %v2946_v35 = vpop.permute.xlu2 %2945  ;;  %v2786_v63 = vpop.xlane.xlu1 %2785  ;;  %3382 = vmatmul.msk.bf16.gmra.mxu0 %vm441_vm1, %v5358_v58  ;;  %v2837_v29 = vmul.f32 %v3676_v41, %v5034_v51 }
 0x970   : > { %3677 = vrcp.f32 %v2786_v63  ;;  %2958 = vmatpush.bf16.msrb.mxu3 %v2946_v35 }
 0x971   : > { %v2853_v14 = vpack.c.bf16 %v2837_v29, %v2837_v29  ;;  %3679 = vpow2.f32 %v2767_v46 }
 0x973   : > { %3397 = vmatmul.msk.bf16.vlgmr.msrb.gmra.mxu3 %vm651_vm2, %v2944_v53  ;;  %v2917_v26 = vunpack.c.l.b16 %v2853_v14 }
 0x974   : > { %v5162_v5 = vpop.f32.mrf.mxu0 }
 0x976   : > { %v3678_v54 = vpop.eup %3677 }
 0x977   : > { %v2838_v37 = vmul.f32 %v3678_v54, %v5041_v61  ;;  %v2996_v3 = vpop.permute.xlu2 %2995  ;;  %v2807_v61 = vpop.xlane.xlu0 %2806 }
 0x978   : > { %3008 = vmatpush.bf16.msra.mxu2 %v2996_v3  ;;  %v5175_v32 = vpop.eup %3679  ;;  %v2777_v27 = vpop.xlane.xlu1 %2776 }
 0x979   : > { %v2854_v38 = vpack.c.bf16 %v2838_v37, %v2838_v37  ;;  %v2814_v60 = vsel %vm651_vm2, %v5175_v32, 0.0  ;;  %3681 = vrcp.f32 %v2777_v27 }
 0x97b   : > { %v2918_v43 = vunpack.c.l.b16 %v2854_v38 }
 0x97c   : > { %v5166_v0 = vpop.f32.mrf.mxu0 }
 0x97d   : > { %v2919_v51 = vpack.c.b16 %v2918_v43, %v2917_v26 }
 0x97f   : > { %v2896_v15 = vpop.permute.xlu2 %2895  ;;  %3383 = vmatmul.msk.bf16.gmra.mxu0 %vm441_vm1, %v5359_v10  ;;  %3396 = vmatmul.msk.bf16.vlgmr.msrb.gmra.mxu2 %vm651_vm2, %v2919_v51  ;;  %v2795_v44 = vpop.xlane.xlu0 %2794 }
 0x980   : > { %2908 = vmatpush.bf16.msra.mxu1 %v2896_v15  ;;  %v2810_v24 = vpop.xlane.xlu1 %2809  ;;  %v3682_v48 = vpop.eup %3681 }
 0x981   : > { %3683 = vrcp.f32 %v2810_v24  ;;  %v2835_v8 = vmul.f32 %v3682_v48, %v5051_v45 }
 0x982   : > { %3685 = vrcp.f32 %v2807_v61 }
 0x983   : > { %v2851_v41 = vpack.c.bf16 %v2835_v8, %v2835_v8 }
 0x984   : > { %v5173_v53 = vpop.f32.mrf.mxu0 }
 0x985   : > { %v2892_v38 = vunpack.c.l.b16 %v2851_v41 }
 0x987   : > { %v3684_v11 = vpop.eup %3683 }
 0x988   : > { %v2804_v21 = vpop.xlane.xlu0 %2803  ;;  %v2798_v49 = vpop.xlane.xlu1 %2797  ;;  %v2846_v35 = vmul.f32 %v3684_v11, %v5058_v42 }
 0x989   : > { %v3686_v33 = vpop.eup %3685 }
 0x98a   : > { %v2845_v58 = vmul.f32 %v3686_v33, %v5000_v36  ;;  %v2862_v12 = vpack.c.bf16 %v2846_v35, %v2846_v35 }
 0x98c   : > { %v5177_v47 = vpop.f32.mrf.mxu0  ;;  %v2861_v45 = vpack.c.bf16 %v2845_v58, %v2845_v58  ;;  %v3018_v1 = vunpack.c.l.b16 %v2862_v12 }
 0x98e   : > { %2815 = vadd.xlane.f32.xlu2 %v2814_v60  ;;  %v3017_v15 = vunpack.c.l.b16 %v2861_v45 }
 0x98f   : > { %3384 = vmatmul.msk.bf16.gmra.mxu0 %vm441_vm1, %v5360_v28 }
 0x990   : > { %v2813_v29 = vpop.xlane.xlu1 %2812 }
 0x994   : > { %v5185_v23 = vpop.f32.mrf.mxu0 }
 0x99b   : > { %v2971_v57 = vpop.permute.xlu0 %2970 }
 0x99c   : > { %2983 = vmatpush.bf16.msrb.mxu1 %v2971_v57  ;;  %v5187_v16 = vpop.f32.mrf.mxu0 }
 0x99f   : > { %3385 = vmatmul.msk.bf16.gmra.mxu0 %vm441_vm1, %v5361_v4 }
 0x9a4   : > { %v5193_v50 = vpop.f32.mrf.mxu0 }
 0x9a6   : > { %v2885_v11 = vpop.f32.mrf.mxu3 }
 0x9a7   : > { %v3046_v46 = vpop.permute.xlu1 %3045 }
 0x9ac   : > { %v5195_v55 = vpop.f32.mrf.mxu0 }
 0x9ae   : > { %v2887_v33 = vpop.f32.mrf.mxu3 }
 0x9b4   : > { %v5197_v9 = vpop.f32.mrf.mxu0 }
 0x9b8   : > { %v2780_v18 = vpop.xlane.xlu2 %2779 }
 0x9b9   : > { %3687 = vrcp.f32 %v2780_v18 }
 0x9ba   : > { %3689 = vrcp.f32 %v2804_v21 }
 0x9bb   : > { %3691 = vrcp.f32 %v2798_v49 }
 0x9bc   : > { %v2430_v6 = vpop.f32.mrf.mxu0 }
 0x9bd   : > { %v5202_v52 = vadd.f32 %v2430_v6, %v1763_v34 }
 0x9bf   : > { %v3688_v63 = vpop.eup %3687 }
 0x9c0   : > { %v2836_v54 = vmul.f32 %v3688_v63, %v5125_v40  ;;  %v2801_v14 = vpop.xlane.xlu2 %2800  ;;  %v3690_v37 = vpop.eup %3689 }
 0x9c1   : > { %3693 = vrcp.f32 %v2801_v14  ;;  %v2844_v26 = vmul.f32 %v3690_v37, %v5082_v39  ;;  %v3692_v42 = vpop.eup %3691 }
 0x9c2   : > { %v2852_v3 = vpack.c.bf16 %v2836_v54, %v2836_v54  ;;  %3695 = vrcp.f32 %v2795_v44  ;;  %v3019_v44 = vpack.c.b16 %v3018_v1, %v3017_v15  ;;  %v2842_v28 = vmul.f32 %v3692_v42, %v5080_v7  ;;  %v417_v7 = vld [vmem:[%s5329_s4 + $0xc] sm:$0xf] }
 0x9c3   : > { %v2860_v10 = vpack.c.bf16 %v2844_v26, %v2844_v26  ;;  %3697 = vrcp.f32 %v2813_v29 }
 0x9c4   : > { %v2893_v43 = vunpack.c.l.b16 %v2852_v3  ;;  %v2858_v27 = vpack.c.bf16 %v2842_v28, %v2842_v28  ;;  %v5363_v28 = vld [vmem:[#allocation9_spill] sm:$0xff] }
 0x9c5   : > { %v2993_v57 = vunpack.c.l.b16 %v2860_v10 }
 0x9c6   : > { %v2894_v51 = vpack.c.b16 %v2893_v43, %v2892_v38 }
 0x9c7   : > { %v3694_v36 = vpop.eup %3693 }
 0x9c8   : > { %v2843_v40 = vmul.f32 %v3694_v36, %v5131_v13  ;;  %v3021_v61 = vpop.permute.xlu2 %3020  ;;  %3395 = vmatmul.msk.bf16.vlgmr.msra.gmra.mxu1 %vm651_vm2, %v2894_v51  ;;  %v3696_v60 = vpop.eup %3695  ;;  %v2968_v13 = vunpack.c.l.b16 %v2858_v27 }
 0x9c9   : > { %3058 = vmatpush.bf16.msra.mxu1 %v3046_v46  ;;  %3033 = vmatpush.bf16.msra.mxu3 %v3021_v61  ;;  %v2841_v21 = vmul.f32 %v3696_v60, %v5027_v56  ;;  %v3098_v56 = vsel %vm1668_vm3, %v417_v7, 0  ;;  %v3698_v34 = vpop.eup %3697  ;;  %v2432_v60 = vpop.f32.mrf.mxu0 }
 0x9ca   : > { %v2859_v39 = vpack.c.bf16 %v2843_v40, %v2843_v40  ;;  %3422 = vmatpush.bf16.msrb.mxu2 %v3098_v56  ;;  %v2847_v6 = vmul.f32 %v3698_v34, %v5092_v17  ;;  %v3065_v17 = vpack.c.bf16 %v2887_v33, %v2885_v11 }
 0x9cb   : > { %v2857_v49 = vpack.c.bf16 %v2841_v21, %v2841_v21 }
 0x9cc   : > { %v2992_v4 = vunpack.c.l.b16 %v2859_v39  ;;  %3400 = vmatmul.msk.bf16.vlgmr.msra.gmra.mxu3 %vm651_vm2, %v3019_v44  ;;  %v2863_v63 = vpack.c.bf16 %v2847_v6, %v2847_v6  ;;  %v1768_v39 = vadd.f32 %v5363_v28, %v5129_v20 }
 0x9cd   : > { %v2967_v18 = vunpack.c.l.b16 %v2857_v49  ;;  %3423 = vmatpush.bf16.msrb.mxu3 %v3098_v56 }
 0x9ce   : > { %v2994_v24 = vpack.c.b16 %v2993_v57, %v2992_v4  ;;  %v3042_v37 = vunpack.c.l.b16 %v2863_v63  ;;  %v5235_v4 = vld [vmem:[%s5330_s5] ss:$0 sm:$0xff] }
 0x9cf   : > { %v2969_v48 = vpack.c.b16 %v2968_v13, %v2967_v18  ;;  %v5364_v13 = vld [vmem:[#allocation10_spill] sm:$0xff] }
 0x9d0   : > { %3399 = vmatmul.msk.bf16.vlgmr.msra.gmra.mxu2 %vm651_vm2, %v2994_v24  ;;  %v1770_v18 = vadd.f32 %v5364_v13, %v5139_v62 }
 0x9d1   : > { %v2435_v44 = vpop.f32.mrf.mxu0 }
 0x9d2   : > { %v2469_v57 = vadd.f32 %v2435_v44, %v1768_v39 }
 0x9d8   : > { %3398 = vmatmul.msk.bf16.vlgmr.msrb.gmra.mxu1 %vm651_vm2, %v2969_v48 }
 0x9d9   : > { %3107 = vmatpush.bf16.msrb.mxu1 %v3098_v56  ;;  %v2437_v27 = vpop.f32.mrf.mxu0 }
 0x9da   : > { %v2470_v7 = vadd.f32 %v2437_v27, %v1770_v18 }
 0x9e1   : > { %v2440_v34 = vpop.f32.mrf.mxu0 }
 0x9f6   : > { %v2960_v29 = vpop.f32.mrf.mxu3 }
 0x9fe   : > { %v2962_v45 = vpop.f32.mrf.mxu3 }
 0x9ff   : > { %v3068_v38 = vpack.c.bf16 %v2962_v45, %v2960_v29 }
 0xa01   : > { %v2816_v22 = vpop.xlane.xlu2 %2815 }
 0xa02   : > { %3699 = vrcp.f32 %v2816_v22  ;;  %v2935_v8 = vpop.f32.mrf.mxu2 }
 0xa08   : > { %v3700_v35 = vpop.eup %3699 }
 0xa09   : > { %v2848_v58 = vmul.f32 %v3700_v35, %v5175_v32  ;;  %v5366_v35 = vld [vmem:[#allocation11_spill] sm:$0xff] }
 0xa0a   : > { %v2937_v41 = vpop.f32.mrf.mxu2  ;;  %v1773_v62 = vadd.f32 %v5366_v35, %v5141_v59 }
 0xa0b   : > { %v2864_v54 = vpack.c.bf16 %v2848_v58, %v2848_v58  ;;  %v3067_v14 = vpack.c.bf16 %v2937_v41, %v2935_v8  ;;  %v5365_v8 = vld [vmem:[#allocation4_spill] sm:$0xff] }
 0xa0c   : > { %v1758_v6 = vadd.f32 %v5365_v8, %v5100_v19  ;;  %v2471_v41 = vadd.f32 %v2440_v34, %v1773_v62  ;;  %v5367_v19 = vld [vmem:[#allocation5_spill] sm:$0xff] }
 0xa0d   : > { %v3043_v12 = vunpack.c.l.b16 %v2864_v54  ;;  %3404 = vmatmul.msk.bf16.vlgmr.msrb.gmra.mxu2 %vm441_vm1, %v3067_v14  ;;  %v1760_v29 = vadd.f32 %v5367_v19, %v5104_v25  ;;  %v5375_v19 = vld [vmem:[#allocation17_spill] sm:$0xff] }
 0xa0e   : > { %v2465_v63 = vadd.f32 %v5195_v55, %v1758_v6  ;;  %v5368_v55 = vld [vmem:[#allocation12_spill] sm:$0xff] }
 0xa0f   : > { %v3044_v3 = vpack.c.b16 %v3043_v12, %v3042_v37  ;;  %v1775_v45 = vadd.f32 %v5368_v55, %v5147_v30 }
 0xa11   : > { %3401 = vmatmul.msk.bf16.vlgmr.msra.gmra.mxu1 %vm651_vm2, %v3044_v3  ;;  %v2442_v3 = vpop.f32.mrf.mxu0 }
 0xa19   : > { %v2445_v30 = vpop.f32.mrf.mxu0 }
 0xa1d   : > { %3405 = vmatmul.msk.bf16.gmra.mxu2 %vm441_vm1, %v3068_v38  ;;  %v2466_v38 = vadd.f32 %v5197_v9, %v1760_v29  ;;  %v1790_v29 = vadd.f32 %v5375_v19, %v5185_v23 }
 0xa21   : > { %3402 = vmatmul.msk.bf16.vlgmr.msrb.gmra.mxu1 %vm441_vm1, %v3065_v17 }
 0xa45   : > { %v2910_v26 = vpop.f32.mrf.mxu1 }
 0xa4d   : > { %v2912_v32 = vpop.f32.mrf.mxu1 }
 0xa4e   : > { %v3066_v43 = vpack.c.bf16 %v2912_v32, %v2910_v26  ;;  %v2472_v26 = vadd.f32 %v2442_v3, %v1775_v45 }
 0xa4f   : > { %v3035_v46 = vpop.f32.mrf.mxu3 }
 0xa50   : > { %3403 = vmatmul.msk.bf16.gmra.mxu1 %vm441_vm1, %v3066_v43 }
 0xa53   : > { %v3010_v42 = vpop.f32.mrf.mxu2 }
 0xa55   : > { %v2985_v1 = vpop.f32.mrf.mxu1 }
 0xa57   : > { %v3037_v40 = vpop.f32.mrf.mxu3 }
 0xa58   : > { %v3071_v61 = vpack.c.bf16 %v3037_v40, %v3035_v46 }
 0xa5b   : > { %v3012_v51 = vpop.f32.mrf.mxu2 }
 0xa5c   : > { %v3070_v36 = vpack.c.bf16 %v3012_v51, %v3010_v42  ;;  %v2447_v51 = vpop.f32.mrf.mxu0 }
 0xa5d   : > { %v2987_v15 = vpop.f32.mrf.mxu1 }
 0xa5e   : > { %v3069_v10 = vpack.c.bf16 %v2987_v15, %v2985_v1  ;;  %3407 = vmatmul.msk.bf16.vlgmr.msrb.gmra.mxu3 %vm441_vm1, %v3070_v36 }
 0xa60   : > { %3406 = vmatmul.msk.bf16.gmra.mxu2 %vm441_vm1, %v3069_v10  ;;  %v5369_v10 = vld [vmem:[#allocation8_spill] sm:$0xff] }
 0xa61   : > { %v1765_v46 = vadd.f32 %v5369_v10, %v5120_v31 }
 0xa63   : > { %v2468_v40 = vadd.f32 %v2432_v60, %v1765_v46 }
 0xa64   : > { %v2450_v28 = vpop.f32.mrf.mxu0 }
 0xa6c   : > { %v2452_v31 = vpop.f32.mrf.mxu0 }
 0xa6e   : > { %3408 = vmatmul.msk.bf16.gmra.mxu3 %vm441_vm1, %v3071_v61 }
 0xa8e   : > { %v3060_v21 = vpop.f32.mrf.mxu1 }
 0xa90   : > { %v3119_v24 = vpop.f32.mrf.mxu2 }
 0xa91   : > { %v3153_v49 = vadd.f32 %v3119_v24, %v2469_v57  ;;  %v5371_v57 = vld [vmem:[#allocation13_spill] sm:$0xff] }
 0xa92   : > { %v1778_v27 = vadd.f32 %v5371_v57, %v5151_v2  ;;  %v5373_v2 = vld [vmem:[#allocation14_spill] sm:$0xff] }
 0xa93   : > { %v3173_v20 = vadd.f32 %v5235_v4, %v3153_v49 }
 0xa95   : > { %3189 = vst.msk [vmem:[%s5240_s10 + $0x20] sm:$0xff] %vm332_vm0, %v3173_v20  ;;  %v2473_v20 = vadd.f32 %v2445_v30, %v1778_v27 }
 0xa96   : > { %v3062_v48 = vpop.f32.mrf.mxu1 }
 0xa97   : > { %v3072_v56 = vpack.c.bf16 %v3062_v48, %v3060_v21  ;;  %v5370_v21 = vld [vmem:[#allocation15_spill] sm:$0xff] }
 0xa98   : > { %v3121_v11 = vpop.f32.mrf.mxu2 }
 0xa99   : > { %v3154_v22 = vadd.f32 %v3121_v11, %v2470_v7  ;;  %3409 = vmatmul.msk.bf16.gmra.mxu3 %vm441_vm1, %v3072_v56  ;;  %v5372_v7 = vld [vmem:[#allocation16_spill] sm:$0xff]  ;;  %v1780_v11 = vadd.f32 %v5373_v2, %v5162_v5 }
 0xa9a   : > { %v1785_v56 = vadd.f32 %v5372_v7, %v5173_v53 }
 0xa9b   : > { %v3174_v33 = vadd.f32 %v5235_v4, %v3154_v22  ;;  %v2474_v8 = vadd.f32 %v2447_v51, %v1780_v11 }
 0xa9c   : > { %v2476_v22 = vadd.f32 %v2452_v31, %v1785_v56 }
 0xa9d   : > { %3190 = vst.msk [vmem:[%s5240_s10 + $0x28] sm:$0xff] %vm332_vm0, %v3174_v33  ;;  %v2455_v33 = vpop.f32.mrf.mxu0 }
 0xa9e   : > { %v3109_v58 = vpop.f32.mrf.mxu1 }
 0xa9f   : > { %v3149_v54 = vadd.f32 %v3109_v58, %v2465_v63  ;;  %v5374_v63 = vld [vmem:[#allocation2_spill] sm:$0xff] }
 0xaa0   : > { %v3124_v14 = vpop.f32.mrf.mxu2  ;;  %v1788_v58 = vadd.f32 %v5374_v63, %v5177_v47 }
 0xaa1   : > { %v3169_v37 = vadd.f32 %v5235_v4, %v3149_v54  ;;  %v3155_v12 = vadd.f32 %v3124_v14, %v2471_v41 }
 0xaa2   : > { %v2477_v41 = vadd.f32 %v2455_v33, %v1788_v58 }
 0xaa3   : > { %3185 = vst.msk [vmem:[%s5240_s10] sm:$0xff] %vm332_vm0, %v3169_v37  ;;  %v3175_v59 = vadd.f32 %v5235_v4, %v3155_v12 }
 0xaa5   : > { %3191 = vst.msk [vmem:[%s5240_s10 + $0x30] sm:$0xff] %vm332_vm0, %v3175_v59  ;;  %v2457_v12 = vpop.f32.mrf.mxu0 }
 0xaa6   : > { %v3111_v17 = vpop.f32.mrf.mxu1  ;;  %v2478_v59 = vadd.f32 %v2457_v12, %v1790_v29 }
 0xaa7   : > { %v3150_v32 = vadd.f32 %v3111_v17, %v2466_v38  ;;  %v5376_v38 = vld [vmem:[#allocation18_spill] sm:$0xff] }
 0xaa8   : > { %v3126_v43 = vpop.f32.mrf.mxu2  ;;  %v1793_v17 = vadd.f32 %v5376_v38, %v5187_v16 }
 0xaa9   : > { %v3170_v42 = vadd.f32 %v5235_v4, %v3150_v32  ;;  %v3156_v25 = vadd.f32 %v3126_v43, %v2472_v26 }
 0xaab   : > { %3186 = vst.msk [vmem:[%s5240_s10 + $0x8] sm:$0xff] %vm332_vm0, %v3170_v42  ;;  %v3176_v1 = vadd.f32 %v5235_v4, %v3156_v25  ;;  %v5377_v25 = vld [vmem:[#allocation19_spill] sm:$0xff] }
 0xaad   : > { %3192 = vst.msk [vmem:[%s5240_s10 + $0x38] sm:$0xff] %vm332_vm0, %v3176_v1  ;;  %v2460_v45 = vpop.f32.mrf.mxu0  ;;  %v1795_v1 = vadd.f32 %v5377_v25, %v5193_v50 }
 0xaae   : > { %v2479_v26 = vadd.f32 %v2460_v45, %v1793_v17 }
 0xab5   : > { %v2462_v23 = vpop.f32.mrf.mxu0 }
 0xab6   : > { %v2480_v30 = vadd.f32 %v2462_v23, %v1795_v1 }
 0xacd   : > { %v3114_v9 = vpop.f32.mrf.mxu1 }
 0xace   : > { %v3151_v36 = vadd.f32 %v3114_v9, %v5202_v52  ;;  %v1783_v52 = vadd.f32 %v5370_v21, %v5166_v0 }
 0xad0   : > { %v3171_v15 = vadd.f32 %v5235_v4, %v3151_v36  ;;  %v2475_v24 = vadd.f32 %v2450_v28, %v1783_v52 }
 0xad2   : > { %3187 = vst.msk [vmem:[%s5240_s10 + $0x10] sm:$0xff] %vm332_vm0, %v3171_v15 }
 0xad5   : > { %v3116_v61 = vpop.f32.mrf.mxu1 }
 0xad6   : > { %v3152_v44 = vadd.f32 %v3116_v61, %v2468_v40 }
 0xad8   : > { %v3172_v39 = vadd.f32 %v5235_v4, %v3152_v44 }
 0xada   : > { %3188 = vst.msk [vmem:[%s5240_s10 + $0x18] sm:$0xff] %vm332_vm0, %v3172_v39 }
 0xae1   : > { %v3134_v49 = vpop.f32.mrf.mxu3 }
 0xae2   : > { %v3159_v60 = vadd.f32 %v3134_v49, %v2475_v24 }
 0xae3   : > { %v3129_v13 = vpop.f32.mrf.mxu2 }
 0xae4   : > { %v3179_v18 = vadd.f32 %v5235_v4, %v3159_v60  ;;  %v3157_v48 = vadd.f32 %v3129_v13, %v2473_v20 }
 0xae6   : > { %3195 = vst.msk [vmem:[%s5240_s10 + $0x50] sm:$0xff] %vm332_vm0, %v3179_v18  ;;  %v3177_v0 = vadd.f32 %v5235_v4, %v3157_v48 }
 0xae8   : > { %3193 = vst.msk [vmem:[%s5240_s10 + $0x40] sm:$0xff] %vm332_vm0, %v3177_v0 }
 0xae9   : > { %v3136_v34 = vpop.f32.mrf.mxu3 }
 0xaea   : > { %v3160_v6 = vadd.f32 %v3136_v34, %v2476_v22 }
 0xaeb   : > { %v3131_v35 = vpop.f32.mrf.mxu2 }
 0xaec   : > { %v3180_v62 = vadd.f32 %v5235_v4, %v3160_v6  ;;  %v3158_v53 = vadd.f32 %v3131_v35, %v2474_v8 }
 0xaee   : > { %3196 = vst.msk [vmem:[%s5240_s10 + $0x58] sm:$0xff] %vm332_vm0, %v3180_v62  ;;  %v3178_v5 = vadd.f32 %v5235_v4, %v3158_v53 }
 0xaf0   : > { %3194 = vst.msk [vmem:[%s5240_s10 + $0x48] sm:$0xff] %vm332_vm0, %v3178_v5 }
 0xaf1   : > { %v3139_v54 = vpop.f32.mrf.mxu3 }
 0xaf2   : > { %v3161_v14 = vadd.f32 %v3139_v54, %v2477_v41 }
 0xaf4   : > { %v3181_v37 = vadd.f32 %v5235_v4, %v3161_v14 }
 0xaf6   : > { %3197 = vst.msk [vmem:[%s5240_s10 + $0x60] sm:$0xff] %vm332_vm0, %v3181_v37 }
 0xaf9   : > { %v3141_v47 = vpop.f32.mrf.mxu3 }
 0xafa   : > { %v3162_v3 = vadd.f32 %v3141_v47, %v2478_v59 }
 0xafc   : > { %v3182_v55 = vadd.f32 %v5235_v4, %v3162_v3 }
 0xafe   : > { %3198 = vst.msk [vmem:[%s5240_s10 + $0x68] sm:$0xff] %vm332_vm0, %v3182_v55 }
 0xb1c   : > { %v3144_v32 = vpop.f32.mrf.mxu3 }
 0xb1d   : > { %v3163_v43 = vadd.f32 %v3144_v32, %v2479_v26 }
 0xb1f   : > { %v3183_v42 = vadd.f32 %v5235_v4, %v3163_v43 }
 0xb21   : > { %3199 = vst.msk [vmem:[%s5240_s10 + $0x70] sm:$0xff] %vm332_vm0, %v3183_v42 }
 0xb24   : > { %v3146_v51 = vpop.f32.mrf.mxu3 }
 0xb25   : > { %v3164_v9 = vadd.f32 %v3146_v51, %v2480_v30 }
 0xb27   : > { %v3184_v36 = vadd.f32 %v5235_v4, %v3164_v9 }
 0xb29   : > { %3200 = vst.msk [vmem:[%s5240_s10 + $0x78] sm:$0xff] %vm332_vm0, %v3184_v36 }
 0xb2a PF: > { %s16_s21 = sadd.s32 1, %s3709_s21  }
 0xb2b   : > { %p13_p4 = scmp.ge.s32.totalorder %s16_s21, 6  }
 0xb2d   :  { %15 = sbr.rel (!%p13_p4) target bundleno = 1 (0x1), region = 74 }

</bundles_post_ra>
